<compile_context>
chip_gen: v7x
topology: tpu7x:2x2x1
jax: 0.10.0
libtpu: 0.0.40
codegen_flags: <defaults>
</compile_context>

<pallas_src>
import functools

import numpy as np
import jax
import jax.numpy as jnp
from jax.experimental import pallas as pl
from jax.experimental.pallas import tpu as pltpu

DRAFT_ORDER = ['BB1', 'RB1', 'BB2', 'RB2', 'BB3', 'RB3', 'BP1', 'RP1', 'RP2',
               'BP2', 'BP3', 'RP3', 'RB4', 'BB4', 'RB5', 'BB5', 'RP4', 'BP4',
               'BP5', 'RP5']


# ----------------------------------------------------------------------------
# Kernel
# ----------------------------------------------------------------------------

def _layernorm(x, g, b, eps=1e-5):
    mu = jnp.mean(x, axis=-1, keepdims=True)
    xc = x - mu
    var = jnp.mean(xc * xc, axis=-1, keepdims=True)
    return xc * jax.lax.rsqrt(var + eps) * g + b


def fused_encoder_kernel(base_ref, feat_ref,
                         wf_ref, bf_ref,
                         wqkv_ref, bqkv_ref, wo_ref, bo_ref,
                         w1_ref, b1_ref, w2_ref, b2_ref,
                         g1_ref, be1_ref, g2_ref, be2_ref,
                         wp_ref, bp_ref, out_ref, *, nhead, num_layers):
    """Embedding-sum + feature proj + post-LN transformer + predictor."""
    Bt, S, D = base_ref.shape
    M = Bt * S
    dh = D // nhead
    G = Bt * nhead

    # ---- feature projection (ReLU) + embedding sum (precomputed in wrapper)
    feat = feat_ref[...].reshape(M, feat_ref.shape[-1])
    f = jnp.maximum(
        jnp.dot(feat, wf_ref[...], preferred_element_type=jnp.float32)
        + bf_ref[...], 0.0)
    x = base_ref[...].reshape(M, D) + f                          # [M, D]

    # ---- transformer encoder layers (post-LN).  Statically unrolled; L is
    # tiny here.  TODO(synk): lax.fori_loop with dynamic ref indexing for L>=4.
    for l in range(num_layers):
        # Fused QKV: one full-width matmul (scale folded into Wq/bq at pack).
        qkv = (jnp.dot(x, wqkv_ref[l], preferred_element_type=jnp.float32)
               + bqkv_ref[l])                                    # [M, 3D]

        def heads(t):                                            # [M,D]->[G,S,dh]
            return (t.reshape(Bt, S, nhead, dh)
                     .transpose(0, 2, 1, 3)
                     .reshape(G, S, dh))

        q = heads(qkv[:, :D])              # 128-aligned lane slices
        k = heads(qkv[:, D:2 * D])
        v = heads(qkv[:, 2 * D:])

        s = jnp.einsum('gqd,gkd->gqk', q, k,
                       preferred_element_type=jnp.float32)       # [G, S, S]
        s = s - jnp.max(s, axis=-1, keepdims=True)
        p = jnp.exp(s)
        p = p / jnp.sum(p, axis=-1, keepdims=True)               # exact softmax
        ctx = jnp.einsum('gqk,gkd->gqd', p, v,
                         preferred_element_type=jnp.float32)     # [G, S, dh]
        ctx = (ctx.reshape(Bt, nhead, S, dh)
                  .transpose(0, 2, 1, 3)
                  .reshape(M, D))                                # head-major concat

        # Output projection: head-sum folded into the contraction.
        attn = (jnp.dot(ctx, wo_ref[l], preferred_element_type=jnp.float32)
                + bo_ref[l])                                     # [M, D]

        h1 = _layernorm(x + attn, g1_ref[l], be1_ref[l])
        ff = jnp.maximum(
            jnp.dot(h1, w1_ref[l], preferred_element_type=jnp.float32)
            + b1_ref[l], 0.0)
        ff = (jnp.dot(ff, w2_ref[l], preferred_element_type=jnp.float32)
              + b2_ref[l])
        x = _layernorm(h1 + ff, g2_ref[l], be2_ref[l])

    # ---- champion predictor (lane-dense padded logits)
    logits = (jnp.dot(x, wp_ref[...], preferred_element_type=jnp.float32)
              + bp_ref[...])                                     # [M, Cpad]
    out_ref[...] = logits.reshape(Bt, S, -1)


# ----------------------------------------------------------------------------
# One-time parameter packing (outside jit)
# ----------------------------------------------------------------------------

def _round_up(x, m):
    return (x + m - 1) // m * m


def pack_params(params, *, nhead):
    """Stack per-layer weights, fold 1/sqrt(dh) into Wq/bq, pad lane dims."""
    D = params['champ_table'].shape[1]
    C = params['pred_w'].shape[1]
    F = params['feat_w'].shape[0]
    assert D % nhead == 0, "embedding_dim must be divisible by nhead"
    dh = D // nhead
    scale = 1.0 / (dh ** 0.5)
    Cp = _round_up(C, 128)
    Fp = _round_up(F, 128)

    def pad_last(a, n):
        return jnp.pad(a, [(0, 0)] * (a.ndim - 1) + [(0, n - a.shape[-1])])

    def pad_first(a, n):
        return jnp.pad(a, [(0, n - a.shape[0])] + [(0, 0)] * (a.ndim - 1))

    layers = params['layers']
    packed = dict(
        champ_table=params['champ_table'],
        gcn_w1=params['gcn_w1'], gcn_b1=params['gcn_b1'],
        gcn_w2=params['gcn_w2'], gcn_b2=params['gcn_b2'],
        step_table=params['step_table'],
        team_table=params['team_table'],
        pos_table=params['pos_table'],
        feat_w=pad_first(params['feat_w'], Fp),                 # [Fp, D]
        feat_b=params['feat_b'],                                # [1, D]
        pred_w=pad_last(params['pred_w'], Cp),                  # [D, Cp]
        pred_b=pad_last(params['pred_b'], Cp),                  # [1, Cp]
        wqkv=jnp.stack([jnp.concatenate(
            [lp['wq'] * scale, lp['wk'], lp['wv']], axis=1)
            for lp in layers]),                                 # [L, D, 3D]
        bqkv=jnp.stack([jnp.concatenate(
            [lp['bq'] * scale, lp['bk'], lp['bv']], axis=1)
            for lp in layers]),                                 # [L, 1, 3D]
        wo=jnp.stack([lp['wo'] for lp in layers]),              # [L, D, D]
        bo=jnp.stack([lp['bo'] for lp in layers]),              # [L, 1, D]
        w1=jnp.stack([lp['w1'] for lp in layers]),              # [L, D, 4D]
        b1=jnp.stack([lp['b1'] for lp in layers]),              # [L, 1, 4D]
        w2=jnp.stack([lp['w2'] for lp in layers]),              # [L, 4D, D]
        b2=jnp.stack([lp['b2'] for lp in layers]),              # [L, 1, D]
        g1=jnp.stack([lp['g1'] for lp in layers]),
        be1=jnp.stack([lp['be1'] for lp in layers]),
        g2=jnp.stack([lp['g2'] for lp in layers]),
        be2=jnp.stack([lp['be2'] for lp in layers]),
    )
    return packed


# ----------------------------------------------------------------------------
# Forward
# ----------------------------------------------------------------------------

@functools.partial(jax.jit, static_argnames=("nhead",))
def garenrec_forward(packed, champion_sequence, position_sequence,
                     mask_sequence, edge_index, edge_weight, feature_sequence,
                     *, nhead=4):
    B, S = champion_sequence.shape
    C, D = packed['champ_table'].shape
    Cp = packed['pred_w'].shape[1]
    Fp = packed['feat_w'].shape[0]
    L = packed['wqkv'].shape[0]

    # ---- GraphEmbeddingLayer -------------------------------------------------
    # TODO(synk): GraphEmbeddingLayer is undefined in the reference source;
    # implemented as a standard 2-layer GCN over a learned champion table.
    # It is tiny ([C,C]x[C,D]) so it stays in plain JAX (no extra kernel
    # dispatch / HBM round trip), per the perf review.
    src, dst = edge_index[0], edge_index[1]
    A = jnp.zeros((C, C), jnp.float32)
    A = A.at[src, dst].add(edge_weight)
    A = A.at[dst, src].add(edge_weight)
    A = A + jnp.eye(C, dtype=jnp.float32)
    dinv = jax.lax.rsqrt(jnp.sum(A, axis=1))
    A_hat = A * dinv[:, None] * dinv[None, :]
    h = jnp.maximum(
        (A_hat @ packed['champ_table']) @ packed['gcn_w1'] + packed['gcn_b1'],
        0.0)
    graph_emb = (A_hat @ h) @ packed['gcn_w2'] + packed['gcn_b2']  # [C, D]

    # ---- embedding gathers + pick-counter logic (data-dependent glue) --------
    x_champ = jnp.take(graph_emb, champion_sequence, axis=0)       # [B, S, D]
    step_emb = packed['step_table'][:S]                            # [S, D]
    team_idx = np.array([1 if DRAFT_ORDER[i].startswith('R') else 0
                         for i in range(S)], dtype=np.int32)       # static
    team_emb = jnp.take(packed['team_table'], team_idx, axis=0)    # [S, D]

    # Vectorized equivalent of the PyTorch per-step pick-counter loop.
    mask_i = mask_sequence.astype(jnp.int32)
    picks_before = jnp.cumsum(mask_i, axis=1) - mask_i             # exclusive
    k = jnp.clip(picks_before, 0, position_sequence.shape[1] - 1)
    pos_idx = jnp.take_along_axis(position_sequence, k, axis=1)    # [B, S]
    pos_emb = (jnp.take(packed['pos_table'], pos_idx, axis=0)
               * mask_sequence.astype(jnp.float32)[..., None])     # [B, S, D]

    base = x_champ + step_emb[None] + team_emb[None] + pos_emb     # [B, S, D]
    feat = jnp.pad(feature_sequence.astype(jnp.float32),
                   ((0, 0), (0, 0), (0, Fp - feature_sequence.shape[-1])))

    # ---- row batching per grid step ------------------------------------------
    bt = 1
    for cand in range(1, B + 1):
        if B % cand == 0 and cand * S <= 512:
            bt = cand
    # TODO(synk): on v7x keep (B // bt) a multiple of 2 so both TensorCores
    # receive grid steps once B is large enough to both batch and split.
    grid = (B // bt,)

    weights = [packed[n] for n in
               ('feat_w', 'feat_b', 'wqkv', 'bqkv', 'wo', 'bo',
                'w1', 'b1', 'w2', 'b2', 'g1', 'be1', 'g2', 'be2',
                'pred_w', 'pred_b')]

    def _const_spec(shape):
        nd = len(shape)
        return pl.BlockSpec(shape, lambda b, _nd=nd: (0,) * _nd)

    in_specs = ([pl.BlockSpec((bt, S, D), lambda b: (b, 0, 0)),
                 pl.BlockSpec((bt, S, Fp), lambda b: (b, 0, 0))]
                + [_const_spec(w.shape) for w in weights])

    # Resident footprint: (double-buffered) IO blocks + weights, plus slack.
    # TODO(synk): pipeline_mode=pl.Buffered(1) on the grid-invariant weight
    # specs would halve the weight share at production sizes (v7x headroom).
    io_bytes = 4 * bt * S * (D + Fp + Cp)
    w_bytes = sum(int(np.prod(w.shape)) * 4 for w in weights)
    vmem_limit = int(min(max(2 * (io_bytes + w_bytes) + (4 << 20), 32 << 20),
                         100 << 20))

    logits_p = pl.pallas_call(
        functools.partial(fused_encoder_kernel, nhead=nhead, num_layers=L),
        grid=grid,
        in_specs=in_specs,
        out_specs=pl.BlockSpec((bt, S, Cp), lambda b: (b, 0, 0)),
        out_shape=jax.ShapeDtypeStruct((B, S, Cp), jnp.float32),
        compiler_params=pltpu.CompilerParams(
            dimension_semantics=("parallel",),
            vmem_limit_bytes=vmem_limit),
    )(base, feat, *weights)

    return logits_p[:, :, :C]


# ----------------------------------------------------------------------------
# Deterministic parameter init (unpacked, PyTorch-like layout)
# ----------------------------------------------------------------------------

def init_params(key, num_champions, embedding_dim, gnn_hidden_dim,
                feature_dim, num_positions, num_layers):
    keys = iter(jax.random.split(key, 64))

    def nrm(shape, s=0.05):
        return (s * jax.random.normal(next(keys), shape)).astype(jnp.float32)

    C, D, HG, F = num_champions, embedding_dim, gnn_hidden_dim, feature_dim
    params = dict(
        champ_table=nrm((C, D)),
        gcn_w1=nrm((D, HG)), gcn_b1=nrm((1, HG)),
        gcn_w2=nrm((HG, D)), gcn_b2=nrm((1, D)),
        step_table=nrm((20, D)),
        team_table=nrm((2, D)),
        pos_table=nrm((num_positions, D)),
        feat_w=nrm((F, D)), feat_b=nrm((1, D)),
        pred_w=nrm((D, C)), pred_b=nrm((1, C)),
        layers=[],
    )
    for _ in range(num_layers):
        params['layers'].append(dict(
            wq=nrm((D, D)), bq=nrm((1, D)),
            wk=nrm((D, D)), bk=nrm((1, D)),
            wv=nrm((D, D)), bv=nrm((1, D)),
            wo=nrm((D, D)), bo=nrm((1, D)),
            w1=nrm((D, 4 * D)), b1=nrm((1, 4 * D)),
            w2=nrm((4 * D, D)), b2=nrm((1, D)),
            g1=jnp.ones((1, D), jnp.float32), be1=jnp.zeros((1, D), jnp.float32),
            g2=jnp.ones((1, D), jnp.float32), be2=jnp.zeros((1, D), jnp.float32),
        ))
    return params


# ----------------------------------------------------------------------------
# Demo
# ----------------------------------------------------------------------------

if __name__ == "__main__":
    B, S = 2, 16
    NUM_CHAMPIONS = 100     # padded to 128 inside the kernel path
    EMBED_DIM = 128         # module default -> lane-dense D
    GNN_HIDDEN = 64
    FEATURE_DIM = 18        # padded to 128 inside the kernel path
    NUM_POSITIONS = 5
    NHEAD = 4
    NUM_LAYERS = 2
    NUM_EDGES = 200

    root = jax.random.PRNGKey(0)
    kp, k1, k2, k3, k4, k5 = jax.random.split(root, 6)

    params = init_params(kp, NUM_CHAMPIONS, EMBED_DIM, GNN_HIDDEN,
                         FEATURE_DIM, NUM_POSITIONS, NUM_LAYERS)
    packed = pack_params(params, nhead=NHEAD)   # one-time, outside jit

    champion_sequence = jax.random.randint(k1, (B, S), 0, NUM_CHAMPIONS,
                                           dtype=jnp.int32)
    position_sequence = jax.random.randint(k2, (B, NUM_POSITIONS), 0,
                                           NUM_POSITIONS, dtype=jnp.int32)
    # picks (second char 'P' in the draft order) get mask=1, bans mask=0
    mask_row = jnp.array([1 if DRAFT_ORDER[i][1] == 'P' else 0
                          for i in range(S)], dtype=jnp.int32)
    mask_sequence = jnp.broadcast_to(mask_row, (B, S))
    edge_index = jax.random.randint(k3, (2, NUM_EDGES), 0, NUM_CHAMPIONS,
                                    dtype=jnp.int32)
    edge_weight = jax.random.uniform(k4, (NUM_EDGES,), dtype=jnp.float32,
                                     minval=0.1, maxval=1.0)
    feature_sequence = jax.random.normal(k5, (B, S, FEATURE_DIM),
                                         dtype=jnp.float32)

    logits = garenrec_forward(packed, champion_sequence, position_sequence,
                              mask_sequence, edge_index, edge_weight,
                              feature_sequence, nhead=NHEAD)
    jax.block_until_ready(logits)
    assert logits.shape == (B, S, NUM_CHAMPIONS)
    assert bool(jnp.all(jnp.isfinite(logits)))
    print("KERNEL_OK")
</pallas_src>

<mosaic_0001>
module attributes {stable_mosaic.version = 11 : i64} {
  func.func @fused_encoder_kernel(%arg0: i32, %arg1: memref<2x16x128xf32, #tpu.memory_space<vmem>>, %arg2: memref<2x16x128xf32, #tpu.memory_space<vmem>>, %arg3: memref<128x128xf32, #tpu.memory_space<vmem>>, %arg4: memref<1x128xf32, #tpu.memory_space<vmem>>, %arg5: memref<2x128x384xf32, #tpu.memory_space<vmem>>, %arg6: memref<2x1x384xf32, #tpu.memory_space<vmem>>, %arg7: memref<2x128x128xf32, #tpu.memory_space<vmem>>, %arg8: memref<2x1x128xf32, #tpu.memory_space<vmem>>, %arg9: memref<2x128x512xf32, #tpu.memory_space<vmem>>, %arg10: memref<2x1x512xf32, #tpu.memory_space<vmem>>, %arg11: memref<2x512x128xf32, #tpu.memory_space<vmem>>, %arg12: memref<2x1x128xf32, #tpu.memory_space<vmem>>, %arg13: memref<2x1x128xf32, #tpu.memory_space<vmem>>, %arg14: memref<2x1x128xf32, #tpu.memory_space<vmem>>, %arg15: memref<2x1x128xf32, #tpu.memory_space<vmem>>, %arg16: memref<2x1x128xf32, #tpu.memory_space<vmem>>, %arg17: memref<128x128xf32, #tpu.memory_space<vmem>>, %arg18: memref<1x128xf32, #tpu.memory_space<vmem>>, %arg19: memref<2x16x128xf32, #tpu.memory_space<vmem>>) attributes {dimension_semantics = [#tpu.dimension_semantics<parallel>], iteration_bounds = array<i64: 1>, scalar_prefetch = 0 : i64, scratch_operands = 0 : i64, tpu.core_type = #tpu.core_type<tc>, window_params = [{transform_indices = @transform_0, window_bounds = array<i64: 2, 16, 128>}, {transform_indices = @transform_1, window_bounds = array<i64: 2, 16, 128>}, {pipeline_mode = #tpu.pipeline_mode<synchronous>, transform_indices = @transform_2, window_bounds = array<i64: 128, 128>}, {pipeline_mode = #tpu.pipeline_mode<synchronous>, transform_indices = @transform_3, window_bounds = array<i64: 1, 128>}, {pipeline_mode = #tpu.pipeline_mode<synchronous>, transform_indices = @transform_4, window_bounds = array<i64: 2, 128, 384>}, {pipeline_mode = #tpu.pipeline_mode<synchronous>, transform_indices = @transform_5, window_bounds = array<i64: 2, 1, 384>}, {pipeline_mode = #tpu.pipeline_mode<synchronous>, transform_indices = @transform_6, window_bounds = array<i64: 2, 128, 128>}, {pipeline_mode = #tpu.pipeline_mode<synchronous>, transform_indices = @transform_7, window_bounds = array<i64: 2, 1, 128>}, {pipeline_mode = #tpu.pipeline_mode<synchronous>, transform_indices = @transform_8, window_bounds = array<i64: 2, 128, 512>}, {pipeline_mode = #tpu.pipeline_mode<synchronous>, transform_indices = @transform_9, window_bounds = array<i64: 2, 1, 512>}, {pipeline_mode = #tpu.pipeline_mode<synchronous>, transform_indices = @transform_10, window_bounds = array<i64: 2, 512, 128>}, {pipeline_mode = #tpu.pipeline_mode<synchronous>, transform_indices = @transform_11, window_bounds = array<i64: 2, 1, 128>}, {pipeline_mode = #tpu.pipeline_mode<synchronous>, transform_indices = @transform_12, window_bounds = array<i64: 2, 1, 128>}, {pipeline_mode = #tpu.pipeline_mode<synchronous>, transform_indices = @transform_13, window_bounds = array<i64: 2, 1, 128>}, {pipeline_mode = #tpu.pipeline_mode<synchronous>, transform_indices = @transform_14, window_bounds = array<i64: 2, 1, 128>}, {pipeline_mode = #tpu.pipeline_mode<synchronous>, transform_indices = @transform_15, window_bounds = array<i64: 2, 1, 128>}, {pipeline_mode = #tpu.pipeline_mode<synchronous>, transform_indices = @transform_16, window_bounds = array<i64: 128, 128>}, {pipeline_mode = #tpu.pipeline_mode<synchronous>, transform_indices = @transform_17, window_bounds = array<i64: 1, 128>}, {transform_indices = @transform_18, window_bounds = array<i64: 2, 16, 128>}]} {
    %c0 = arith.constant 0 : index
    %c0_0 = arith.constant 0 : index
    %c0_1 = arith.constant 0 : index
    %0 = vector.load %arg2[%c0, %c0_0, %c0_1] : memref<2x16x128xf32, #tpu.memory_space<vmem>>, vector<2x16x128xf32>
    %1 = vector.shape_cast %0 : vector<2x16x128xf32> to vector<32x128xf32>
    %c0_2 = arith.constant 0 : index
    %c0_3 = arith.constant 0 : index
    %2 = vector.load %arg3[%c0_2, %c0_3] : memref<128x128xf32, #tpu.memory_space<vmem>>, vector<128x128xf32>
    %cst = arith.constant dense<0.000000e+00> : vector<32x128xf32>
    %3 = tpu.matmul %1, %2, %cst {dimension_numbers = #tpu.dot_dimension_numbers<[1], [0], [0], [1], [0, 0, 1, 1], [], []>} : vector<32x128xf32>, vector<128x128xf32>, vector<32x128xf32> -> vector<32x128xf32>
    %c0_4 = arith.constant 0 : index
    %c0_5 = arith.constant 0 : index
    %4 = vector.load %arg4[%c0_4, %c0_5] : memref<1x128xf32, #tpu.memory_space<vmem>>, vector<1x128xf32>
    %5 = vector.broadcast %4 : vector<1x128xf32> to vector<32x128xf32>
    %6 = arith.addf %3, %5 : vector<32x128xf32>
    %cst_6 = arith.constant 0.000000e+00 : f32
    %7 = vector.broadcast %cst_6 : f32 to vector<32x128xf32>
    %8 = arith.maximumf %6, %7 : vector<32x128xf32>
    %c0_7 = arith.constant 0 : index
    %c0_8 = arith.constant 0 : index
    %c0_9 = arith.constant 0 : index
    %9 = vector.load %arg1[%c0_7, %c0_8, %c0_9] : memref<2x16x128xf32, #tpu.memory_space<vmem>>, vector<2x16x128xf32>
    %10 = vector.shape_cast %9 : vector<2x16x128xf32> to vector<32x128xf32>
    %11 = arith.addf %10, %8 : vector<32x128xf32>
    %c0_10 = arith.constant 0 : index
    %c0_11 = arith.constant 0 : index
    %c0_12 = arith.constant 0 : index
    %12 = vector.load %arg5[%c0_10, %c0_11, %c0_12] : memref<2x128x384xf32, #tpu.memory_space<vmem>>, vector<1x128x384xf32>
    %13 = vector.shape_cast %12 : vector<1x128x384xf32> to vector<128x384xf32>
    %cst_13 = arith.constant dense<0.000000e+00> : vector<32x384xf32>
    %14 = tpu.matmul %11, %13, %cst_13 {dimension_numbers = #tpu.dot_dimension_numbers<[1], [0], [0], [1], [0, 0, 1, 1], [], []>} : vector<32x128xf32>, vector<128x384xf32>, vector<32x384xf32> -> vector<32x384xf32>
    %c0_14 = arith.constant 0 : index
    %c0_15 = arith.constant 0 : index
    %c0_16 = arith.constant 0 : index
    %15 = vector.load %arg6[%c0_14, %c0_15, %c0_16] : memref<2x1x384xf32, #tpu.memory_space<vmem>>, vector<1x1x384xf32>
    %16 = vector.shape_cast %15 : vector<1x1x384xf32> to vector<1x384xf32>
    %17 = vector.broadcast %16 : vector<1x384xf32> to vector<32x384xf32>
    %18 = arith.addf %14, %17 : vector<32x384xf32>
    %19 = vector.extract_strided_slice %18 {offsets = [0, 0], sizes = [32, 128], strides = [1, 1]} : vector<32x384xf32> to vector<32x128xf32>
    %20 = vector.shape_cast %19 : vector<32x128xf32> to vector<2x16x4x32xf32>
    %21 = tpu.transpose %20, [0, 2, 1, 3] : vector<2x16x4x32xf32> -> vector<2x4x16x32xf32>
    %22 = vector.shape_cast %21 : vector<2x4x16x32xf32> to vector<8x16x32xf32>
    %23 = vector.extract_strided_slice %18 {offsets = [0, 128], sizes = [32, 128], strides = [1, 1]} : vector<32x384xf32> to vector<32x128xf32>
    %24 = vector.shape_cast %23 : vector<32x128xf32> to vector<2x16x4x32xf32>
    %25 = tpu.transpose %24, [0, 2, 1, 3] : vector<2x16x4x32xf32> -> vector<2x4x16x32xf32>
    %26 = vector.shape_cast %25 : vector<2x4x16x32xf32> to vector<8x16x32xf32>
    %27 = vector.extract_strided_slice %18 {offsets = [0, 256], sizes = [32, 128], strides = [1, 1]} : vector<32x384xf32> to vector<32x128xf32>
    %28 = vector.shape_cast %27 : vector<32x128xf32> to vector<2x16x4x32xf32>
    %29 = tpu.transpose %28, [0, 2, 1, 3] : vector<2x16x4x32xf32> -> vector<2x4x16x32xf32>
    %30 = vector.shape_cast %29 : vector<2x4x16x32xf32> to vector<8x16x32xf32>
    "tpu.trace_start"() <{level = 10 : i32, message = "gqd,gkd->gqk"}> : () -> ()
    %cst_17 = arith.constant dense<0.000000e+00> : vector<8x16x16xf32>
    %31 = tpu.matmul %22, %26, %cst_17 {dimension_numbers = #tpu.dot_dimension_numbers<[2], [2], [1], [1], [0, 0, 0, 1, 1, 1], [0], [0]>} : vector<8x16x32xf32>, vector<8x16x32xf32>, vector<8x16x16xf32> -> vector<8x16x16xf32>
    "tpu.trace_stop"() : () -> ()
    %cst_18 = arith.constant dense<0xFF800000> : vector<8x16xf32>
    %32 = vector.multi_reduction <maximumf>, %31, %cst_18 [2] : vector<8x16x16xf32> to vector<8x16xf32>
    %33 = vector.shape_cast %32 : vector<8x16xf32> to vector<8x16x1xf32>
    %34 = vector.broadcast %33 : vector<8x16x1xf32> to vector<8x16x16xf32>
    %35 = arith.subf %31, %34 : vector<8x16x16xf32>
    %36 = math.exp %35 : vector<8x16x16xf32>
    %cst_19 = arith.constant dense<0.000000e+00> : vector<8x16xf32>
    %37 = vector.multi_reduction <add>, %36, %cst_19 [2] : vector<8x16x16xf32> to vector<8x16xf32>
    %38 = vector.shape_cast %37 : vector<8x16xf32> to vector<8x16x1xf32>
    %39 = vector.broadcast %38 : vector<8x16x1xf32> to vector<8x16x16xf32>
    %40 = arith.divf %36, %39 : vector<8x16x16xf32>
    "tpu.trace_start"() <{level = 10 : i32, message = "gqk,gkd->gqd"}> : () -> ()
    %cst_20 = arith.constant dense<0.000000e+00> : vector<8x16x32xf32>
    %41 = tpu.matmul %40, %30, %cst_20 {dimension_numbers = #tpu.dot_dimension_numbers<[2], [1], [1], [2], [0, 0, 0, 1, 1, 2], [0], [0]>} : vector<8x16x16xf32>, vector<8x16x32xf32>, vector<8x16x32xf32> -> vector<8x16x32xf32>
    "tpu.trace_stop"() : () -> ()
    %42 = vector.shape_cast %41 : vector<8x16x32xf32> to vector<2x4x16x32xf32>
    %43 = tpu.transpose %42, [0, 2, 1, 3] : vector<2x4x16x32xf32> -> vector<2x16x4x32xf32>
    %44 = vector.shape_cast %43 : vector<2x16x4x32xf32> to vector<32x128xf32>
    %c0_21 = arith.constant 0 : index
    %c0_22 = arith.constant 0 : index
    %c0_23 = arith.constant 0 : index
    %45 = vector.load %arg7[%c0_21, %c0_22, %c0_23] : memref<2x128x128xf32, #tpu.memory_space<vmem>>, vector<1x128x128xf32>
    %46 = vector.shape_cast %45 : vector<1x128x128xf32> to vector<128x128xf32>
    %cst_24 = arith.constant dense<0.000000e+00> : vector<32x128xf32>
    %47 = tpu.matmul %44, %46, %cst_24 {dimension_numbers = #tpu.dot_dimension_numbers<[1], [0], [0], [1], [0, 0, 1, 1], [], []>} : vector<32x128xf32>, vector<128x128xf32>, vector<32x128xf32> -> vector<32x128xf32>
    %c0_25 = arith.constant 0 : index
    %c0_26 = arith.constant 0 : index
    %c0_27 = arith.constant 0 : index
    %48 = vector.load %arg8[%c0_25, %c0_26, %c0_27] : memref<2x1x128xf32, #tpu.memory_space<vmem>>, vector<1x1x128xf32>
    %49 = vector.shape_cast %48 : vector<1x1x128xf32> to vector<1x128xf32>
    %50 = vector.broadcast %49 : vector<1x128xf32> to vector<32x128xf32>
    %51 = arith.addf %47, %50 : vector<32x128xf32>
    %52 = arith.addf %11, %51 : vector<32x128xf32>
    %c0_28 = arith.constant 0 : index
    %c0_29 = arith.constant 0 : index
    %c0_30 = arith.constant 0 : index
    %53 = vector.load %arg13[%c0_28, %c0_29, %c0_30] : memref<2x1x128xf32, #tpu.memory_space<vmem>>, vector<1x1x128xf32>
    %54 = vector.shape_cast %53 : vector<1x1x128xf32> to vector<1x128xf32>
    %c0_31 = arith.constant 0 : index
    %c0_32 = arith.constant 0 : index
    %c0_33 = arith.constant 0 : index
    %55 = vector.load %arg14[%c0_31, %c0_32, %c0_33] : memref<2x1x128xf32, #tpu.memory_space<vmem>>, vector<1x1x128xf32>
    %56 = vector.shape_cast %55 : vector<1x1x128xf32> to vector<1x128xf32>
    %cst_34 = arith.constant dense<0.000000e+00> : vector<32xf32>
    %57 = vector.multi_reduction <add>, %52, %cst_34 [1] : vector<32x128xf32> to vector<32xf32>
    %58 = vector.shape_cast %57 : vector<32xf32> to vector<32x1xf32>
    %cst_35 = arith.constant 1.280000e+02 : f32
    %59 = vector.broadcast %cst_35 : f32 to vector<32x1xf32>
    %60 = arith.divf %58, %59 : vector<32x1xf32>
    %61 = vector.broadcast %60 : vector<32x1xf32> to vector<32x128xf32>
    %62 = arith.subf %52, %61 : vector<32x128xf32>
    %63 = arith.mulf %62, %62 : vector<32x128xf32>
    %cst_36 = arith.constant dense<0.000000e+00> : vector<32xf32>
    %64 = vector.multi_reduction <add>, %63, %cst_36 [1] : vector<32x128xf32> to vector<32xf32>
    %65 = vector.shape_cast %64 : vector<32xf32> to vector<32x1xf32>
    %cst_37 = arith.constant 1.280000e+02 : f32
    %66 = vector.broadcast %cst_37 : f32 to vector<32x1xf32>
    %67 = arith.divf %65, %66 : vector<32x1xf32>
    %cst_38 = arith.constant 9.99999974E-6 : f32
    %68 = vector.broadcast %cst_38 : f32 to vector<32x1xf32>
    %69 = arith.addf %67, %68 : vector<32x1xf32>
    %70 = math.rsqrt %69 : vector<32x1xf32>
    %71 = vector.broadcast %70 : vector<32x1xf32> to vector<32x128xf32>
    %72 = arith.mulf %62, %71 : vector<32x128xf32>
    %73 = vector.broadcast %54 : vector<1x128xf32> to vector<32x128xf32>
    %74 = arith.mulf %72, %73 : vector<32x128xf32>
    %75 = vector.broadcast %56 : vector<1x128xf32> to vector<32x128xf32>
    %76 = arith.addf %74, %75 : vector<32x128xf32>
    %c0_39 = arith.constant 0 : index
    %c0_40 = arith.constant 0 : index
    %c0_41 = arith.constant 0 : index
    %77 = vector.load %arg9[%c0_39, %c0_40, %c0_41] : memref<2x128x512xf32, #tpu.memory_space<vmem>>, vector<1x128x512xf32>
    %78 = vector.shape_cast %77 : vector<1x128x512xf32> to vector<128x512xf32>
    %cst_42 = arith.constant dense<0.000000e+00> : vector<32x512xf32>
    %79 = tpu.matmul %76, %78, %cst_42 {dimension_numbers = #tpu.dot_dimension_numbers<[1], [0], [0], [1], [0, 0, 1, 1], [], []>} : vector<32x128xf32>, vector<128x512xf32>, vector<32x512xf32> -> vector<32x512xf32>
    %c0_43 = arith.constant 0 : index
    %c0_44 = arith.constant 0 : index
    %c0_45 = arith.constant 0 : index
    %80 = vector.load %arg10[%c0_43, %c0_44, %c0_45] : memref<2x1x512xf32, #tpu.memory_space<vmem>>, vector<1x1x512xf32>
    %81 = vector.shape_cast %80 : vector<1x1x512xf32> to vector<1x512xf32>
    %82 = vector.broadcast %81 : vector<1x512xf32> to vector<32x512xf32>
    %83 = arith.addf %79, %82 : vector<32x512xf32>
    %cst_46 = arith.constant 0.000000e+00 : f32
    %84 = vector.broadcast %cst_46 : f32 to vector<32x512xf32>
    %85 = arith.maximumf %83, %84 : vector<32x512xf32>
    %c0_47 = arith.constant 0 : index
    %c0_48 = arith.constant 0 : index
    %c0_49 = arith.constant 0 : index
    %86 = vector.load %arg11[%c0_47, %c0_48, %c0_49] : memref<2x512x128xf32, #tpu.memory_space<vmem>>, vector<1x512x128xf32>
    %87 = vector.shape_cast %86 : vector<1x512x128xf32> to vector<512x128xf32>
    %cst_50 = arith.constant dense<0.000000e+00> : vector<32x128xf32>
    %88 = tpu.matmul %85, %87, %cst_50 {dimension_numbers = #tpu.dot_dimension_numbers<[1], [0], [0], [1], [0, 0, 1, 1], [], []>} : vector<32x512xf32>, vector<512x128xf32>, vector<32x128xf32> -> vector<32x128xf32>
    %c0_51 = arith.constant 0 : index
    %c0_52 = arith.constant 0 : index
    %c0_53 = arith.constant 0 : index
    %89 = vector.load %arg12[%c0_51, %c0_52, %c0_53] : memref<2x1x128xf32, #tpu.memory_space<vmem>>, vector<1x1x128xf32>
    %90 = vector.shape_cast %89 : vector<1x1x128xf32> to vector<1x128xf32>
    %91 = vector.broadcast %90 : vector<1x128xf32> to vector<32x128xf32>
    %92 = arith.addf %88, %91 : vector<32x128xf32>
    %93 = arith.addf %76, %92 : vector<32x128xf32>
    %c0_54 = arith.constant 0 : index
    %c0_55 = arith.constant 0 : index
    %c0_56 = arith.constant 0 : index
    %94 = vector.load %arg15[%c0_54, %c0_55, %c0_56] : memref<2x1x128xf32, #tpu.memory_space<vmem>>, vector<1x1x128xf32>
    %95 = vector.shape_cast %94 : vector<1x1x128xf32> to vector<1x128xf32>
    %c0_57 = arith.constant 0 : index
    %c0_58 = arith.constant 0 : index
    %c0_59 = arith.constant 0 : index
    %96 = vector.load %arg16[%c0_57, %c0_58, %c0_59] : memref<2x1x128xf32, #tpu.memory_space<vmem>>, vector<1x1x128xf32>
    %97 = vector.shape_cast %96 : vector<1x1x128xf32> to vector<1x128xf32>
    %cst_60 = arith.constant dense<0.000000e+00> : vector<32xf32>
    %98 = vector.multi_reduction <add>, %93, %cst_60 [1] : vector<32x128xf32> to vector<32xf32>
    %99 = vector.shape_cast %98 : vector<32xf32> to vector<32x1xf32>
    %cst_61 = arith.constant 1.280000e+02 : f32
    %100 = vector.broadcast %cst_61 : f32 to vector<32x1xf32>
    %101 = arith.divf %99, %100 : vector<32x1xf32>
    %102 = vector.broadcast %101 : vector<32x1xf32> to vector<32x128xf32>
    %103 = arith.subf %93, %102 : vector<32x128xf32>
    %104 = arith.mulf %103, %103 : vector<32x128xf32>
    %cst_62 = arith.constant dense<0.000000e+00> : vector<32xf32>
    %105 = vector.multi_reduction <add>, %104, %cst_62 [1] : vector<32x128xf32> to vector<32xf32>
    %106 = vector.shape_cast %105 : vector<32xf32> to vector<32x1xf32>
    %cst_63 = arith.constant 1.280000e+02 : f32
    %107 = vector.broadcast %cst_63 : f32 to vector<32x1xf32>
    %108 = arith.divf %106, %107 : vector<32x1xf32>
    %cst_64 = arith.constant 9.99999974E-6 : f32
    %109 = vector.broadcast %cst_64 : f32 to vector<32x1xf32>
    %110 = arith.addf %108, %109 : vector<32x1xf32>
    %111 = math.rsqrt %110 : vector<32x1xf32>
    %112 = vector.broadcast %111 : vector<32x1xf32> to vector<32x128xf32>
    %113 = arith.mulf %103, %112 : vector<32x128xf32>
    %114 = vector.broadcast %95 : vector<1x128xf32> to vector<32x128xf32>
    %115 = arith.mulf %113, %114 : vector<32x128xf32>
    %116 = vector.broadcast %97 : vector<1x128xf32> to vector<32x128xf32>
    %117 = arith.addf %115, %116 : vector<32x128xf32>
    %c1 = arith.constant 1 : index
    %c0_65 = arith.constant 0 : index
    %c0_66 = arith.constant 0 : index
    %118 = vector.load %arg5[%c1, %c0_65, %c0_66] : memref<2x128x384xf32, #tpu.memory_space<vmem>>, vector<1x128x384xf32>
    %119 = vector.shape_cast %118 : vector<1x128x384xf32> to vector<128x384xf32>
    %cst_67 = arith.constant dense<0.000000e+00> : vector<32x384xf32>
    %120 = tpu.matmul %117, %119, %cst_67 {dimension_numbers = #tpu.dot_dimension_numbers<[1], [0], [0], [1], [0, 0, 1, 1], [], []>} : vector<32x128xf32>, vector<128x384xf32>, vector<32x384xf32> -> vector<32x384xf32>
    %c1_68 = arith.constant 1 : index
    %c0_69 = arith.constant 0 : index
    %c0_70 = arith.constant 0 : index
    %121 = vector.load %arg6[%c1_68, %c0_69, %c0_70] : memref<2x1x384xf32, #tpu.memory_space<vmem>>, vector<1x1x384xf32>
    %122 = vector.shape_cast %121 : vector<1x1x384xf32> to vector<1x384xf32>
    %123 = vector.broadcast %122 : vector<1x384xf32> to vector<32x384xf32>
    %124 = arith.addf %120, %123 : vector<32x384xf32>
    %125 = vector.extract_strided_slice %124 {offsets = [0, 0], sizes = [32, 128], strides = [1, 1]} : vector<32x384xf32> to vector<32x128xf32>
    %126 = vector.shape_cast %125 : vector<32x128xf32> to vector<2x16x4x32xf32>
    %127 = tpu.transpose %126, [0, 2, 1, 3] : vector<2x16x4x32xf32> -> vector<2x4x16x32xf32>
    %128 = vector.shape_cast %127 : vector<2x4x16x32xf32> to vector<8x16x32xf32>
    %129 = vector.extract_strided_slice %124 {offsets = [0, 128], sizes = [32, 128], strides = [1, 1]} : vector<32x384xf32> to vector<32x128xf32>
    %130 = vector.shape_cast %129 : vector<32x128xf32> to vector<2x16x4x32xf32>
    %131 = tpu.transpose %130, [0, 2, 1, 3] : vector<2x16x4x32xf32> -> vector<2x4x16x32xf32>
    %132 = vector.shape_cast %131 : vector<2x4x16x32xf32> to vector<8x16x32xf32>
    %133 = vector.extract_strided_slice %124 {offsets = [0, 256], sizes = [32, 128], strides = [1, 1]} : vector<32x384xf32> to vector<32x128xf32>
    %134 = vector.shape_cast %133 : vector<32x128xf32> to vector<2x16x4x32xf32>
    %135 = tpu.transpose %134, [0, 2, 1, 3] : vector<2x16x4x32xf32> -> vector<2x4x16x32xf32>
    %136 = vector.shape_cast %135 : vector<2x4x16x32xf32> to vector<8x16x32xf32>
    "tpu.trace_start"() <{level = 10 : i32, message = "gqd,gkd->gqk"}> : () -> ()
    %cst_71 = arith.constant dense<0.000000e+00> : vector<8x16x16xf32>
    %137 = tpu.matmul %128, %132, %cst_71 {dimension_numbers = #tpu.dot_dimension_numbers<[2], [2], [1], [1], [0, 0, 0, 1, 1, 1], [0], [0]>} : vector<8x16x32xf32>, vector<8x16x32xf32>, vector<8x16x16xf32> -> vector<8x16x16xf32>
    "tpu.trace_stop"() : () -> ()
    %cst_72 = arith.constant dense<0xFF800000> : vector<8x16xf32>
    %138 = vector.multi_reduction <maximumf>, %137, %cst_72 [2] : vector<8x16x16xf32> to vector<8x16xf32>
    %139 = vector.shape_cast %138 : vector<8x16xf32> to vector<8x16x1xf32>
    %140 = vector.broadcast %139 : vector<8x16x1xf32> to vector<8x16x16xf32>
    %141 = arith.subf %137, %140 : vector<8x16x16xf32>
    %142 = math.exp %141 : vector<8x16x16xf32>
    %cst_73 = arith.constant dense<0.000000e+00> : vector<8x16xf32>
    %143 = vector.multi_reduction <add>, %142, %cst_73 [2] : vector<8x16x16xf32> to vector<8x16xf32>
    %144 = vector.shape_cast %143 : vector<8x16xf32> to vector<8x16x1xf32>
    %145 = vector.broadcast %144 : vector<8x16x1xf32> to vector<8x16x16xf32>
    %146 = arith.divf %142, %145 : vector<8x16x16xf32>
    "tpu.trace_start"() <{level = 10 : i32, message = "gqk,gkd->gqd"}> : () -> ()
    %cst_74 = arith.constant dense<0.000000e+00> : vector<8x16x32xf32>
    %147 = tpu.matmul %146, %136, %cst_74 {dimension_numbers = #tpu.dot_dimension_numbers<[2], [1], [1], [2], [0, 0, 0, 1, 1, 2], [0], [0]>} : vector<8x16x16xf32>, vector<8x16x32xf32>, vector<8x16x32xf32> -> vector<8x16x32xf32>
    "tpu.trace_stop"() : () -> ()
    %148 = vector.shape_cast %147 : vector<8x16x32xf32> to vector<2x4x16x32xf32>
    %149 = tpu.transpose %148, [0, 2, 1, 3] : vector<2x4x16x32xf32> -> vector<2x16x4x32xf32>
    %150 = vector.shape_cast %149 : vector<2x16x4x32xf32> to vector<32x128xf32>
    %c1_75 = arith.constant 1 : index
    %c0_76 = arith.constant 0 : index
    %c0_77 = arith.constant 0 : index
    %151 = vector.load %arg7[%c1_75, %c0_76, %c0_77] : memref<2x128x128xf32, #tpu.memory_space<vmem>>, vector<1x128x128xf32>
    %152 = vector.shape_cast %151 : vector<1x128x128xf32> to vector<128x128xf32>
    %cst_78 = arith.constant dense<0.000000e+00> : vector<32x128xf32>
    %153 = tpu.matmul %150, %152, %cst_78 {dimension_numbers = #tpu.dot_dimension_numbers<[1], [0], [0], [1], [0, 0, 1, 1], [], []>} : vector<32x128xf32>, vector<128x128xf32>, vector<32x128xf32> -> vector<32x128xf32>
    %c1_79 = arith.constant 1 : index
    %c0_80 = arith.constant 0 : index
    %c0_81 = arith.constant 0 : index
    %154 = vector.load %arg8[%c1_79, %c0_80, %c0_81] : memref<2x1x128xf32, #tpu.memory_space<vmem>>, vector<1x1x128xf32>
    %155 = vector.shape_cast %154 : vector<1x1x128xf32> to vector<1x128xf32>
    %156 = vector.broadcast %155 : vector<1x128xf32> to vector<32x128xf32>
    %157 = arith.addf %153, %156 : vector<32x128xf32>
    %158 = arith.addf %117, %157 : vector<32x128xf32>
    %c1_82 = arith.constant 1 : index
    %c0_83 = arith.constant 0 : index
    %c0_84 = arith.constant 0 : index
    %159 = vector.load %arg13[%c1_82, %c0_83, %c0_84] : memref<2x1x128xf32, #tpu.memory_space<vmem>>, vector<1x1x128xf32>
    %160 = vector.shape_cast %159 : vector<1x1x128xf32> to vector<1x128xf32>
    %c1_85 = arith.constant 1 : index
    %c0_86 = arith.constant 0 : index
    %c0_87 = arith.constant 0 : index
    %161 = vector.load %arg14[%c1_85, %c0_86, %c0_87] : memref<2x1x128xf32, #tpu.memory_space<vmem>>, vector<1x1x128xf32>
    %162 = vector.shape_cast %161 : vector<1x1x128xf32> to vector<1x128xf32>
    %cst_88 = arith.constant dense<0.000000e+00> : vector<32xf32>
    %163 = vector.multi_reduction <add>, %158, %cst_88 [1] : vector<32x128xf32> to vector<32xf32>
    %164 = vector.shape_cast %163 : vector<32xf32> to vector<32x1xf32>
    %cst_89 = arith.constant 1.280000e+02 : f32
    %165 = vector.broadcast %cst_89 : f32 to vector<32x1xf32>
    %166 = arith.divf %164, %165 : vector<32x1xf32>
    %167 = vector.broadcast %166 : vector<32x1xf32> to vector<32x128xf32>
    %168 = arith.subf %158, %167 : vector<32x128xf32>
    %169 = arith.mulf %168, %168 : vector<32x128xf32>
    %cst_90 = arith.constant dense<0.000000e+00> : vector<32xf32>
    %170 = vector.multi_reduction <add>, %169, %cst_90 [1] : vector<32x128xf32> to vector<32xf32>
    %171 = vector.shape_cast %170 : vector<32xf32> to vector<32x1xf32>
    %cst_91 = arith.constant 1.280000e+02 : f32
    %172 = vector.broadcast %cst_91 : f32 to vector<32x1xf32>
    %173 = arith.divf %171, %172 : vector<32x1xf32>
    %cst_92 = arith.constant 9.99999974E-6 : f32
    %174 = vector.broadcast %cst_92 : f32 to vector<32x1xf32>
    %175 = arith.addf %173, %174 : vector<32x1xf32>
    %176 = math.rsqrt %175 : vector<32x1xf32>
    %177 = vector.broadcast %176 : vector<32x1xf32> to vector<32x128xf32>
    %178 = arith.mulf %168, %177 : vector<32x128xf32>
    %179 = vector.broadcast %160 : vector<1x128xf32> to vector<32x128xf32>
    %180 = arith.mulf %178, %179 : vector<32x128xf32>
    %181 = vector.broadcast %162 : vector<1x128xf32> to vector<32x128xf32>
    %182 = arith.addf %180, %181 : vector<32x128xf32>
    %c1_93 = arith.constant 1 : index
    %c0_94 = arith.constant 0 : index
    %c0_95 = arith.constant 0 : index
    %183 = vector.load %arg9[%c1_93, %c0_94, %c0_95] : memref<2x128x512xf32, #tpu.memory_space<vmem>>, vector<1x128x512xf32>
    %184 = vector.shape_cast %183 : vector<1x128x512xf32> to vector<128x512xf32>
    %cst_96 = arith.constant dense<0.000000e+00> : vector<32x512xf32>
    %185 = tpu.matmul %182, %184, %cst_96 {dimension_numbers = #tpu.dot_dimension_numbers<[1], [0], [0], [1], [0, 0, 1, 1], [], []>} : vector<32x128xf32>, vector<128x512xf32>, vector<32x512xf32> -> vector<32x512xf32>
    %c1_97 = arith.constant 1 : index
    %c0_98 = arith.constant 0 : index
    %c0_99 = arith.constant 0 : index
    %186 = vector.load %arg10[%c1_97, %c0_98, %c0_99] : memref<2x1x512xf32, #tpu.memory_space<vmem>>, vector<1x1x512xf32>
    %187 = vector.shape_cast %186 : vector<1x1x512xf32> to vector<1x512xf32>
    %188 = vector.broadcast %187 : vector<1x512xf32> to vector<32x512xf32>
    %189 = arith.addf %185, %188 : vector<32x512xf32>
    %cst_100 = arith.constant 0.000000e+00 : f32
    %190 = vector.broadcast %cst_100 : f32 to vector<32x512xf32>
    %191 = arith.maximumf %189, %190 : vector<32x512xf32>
    %c1_101 = arith.constant 1 : index
    %c0_102 = arith.constant 0 : index
    %c0_103 = arith.constant 0 : index
    %192 = vector.load %arg11[%c1_101, %c0_102, %c0_103] : memref<2x512x128xf32, #tpu.memory_space<vmem>>, vector<1x512x128xf32>
    %193 = vector.shape_cast %192 : vector<1x512x128xf32> to vector<512x128xf32>
    %cst_104 = arith.constant dense<0.000000e+00> : vector<32x128xf32>
    %194 = tpu.matmul %191, %193, %cst_104 {dimension_numbers = #tpu.dot_dimension_numbers<[1], [0], [0], [1], [0, 0, 1, 1], [], []>} : vector<32x512xf32>, vector<512x128xf32>, vector<32x128xf32> -> vector<32x128xf32>
    %c1_105 = arith.constant 1 : index
    %c0_106 = arith.constant 0 : index
    %c0_107 = arith.constant 0 : index
    %195 = vector.load %arg12[%c1_105, %c0_106, %c0_107] : memref<2x1x128xf32, #tpu.memory_space<vmem>>, vector<1x1x128xf32>
    %196 = vector.shape_cast %195 : vector<1x1x128xf32> to vector<1x128xf32>
    %197 = vector.broadcast %196 : vector<1x128xf32> to vector<32x128xf32>
    %198 = arith.addf %194, %197 : vector<32x128xf32>
    %199 = arith.addf %182, %198 : vector<32x128xf32>
    %c1_108 = arith.constant 1 : index
    %c0_109 = arith.constant 0 : index
    %c0_110 = arith.constant 0 : index
    %200 = vector.load %arg15[%c1_108, %c0_109, %c0_110] : memref<2x1x128xf32, #tpu.memory_space<vmem>>, vector<1x1x128xf32>
    %201 = vector.shape_cast %200 : vector<1x1x128xf32> to vector<1x128xf32>
    %c1_111 = arith.constant 1 : index
    %c0_112 = arith.constant 0 : index
    %c0_113 = arith.constant 0 : index
    %202 = vector.load %arg16[%c1_111, %c0_112, %c0_113] : memref<2x1x128xf32, #tpu.memory_space<vmem>>, vector<1x1x128xf32>
    %203 = vector.shape_cast %202 : vector<1x1x128xf32> to vector<1x128xf32>
    %cst_114 = arith.constant dense<0.000000e+00> : vector<32xf32>
    %204 = vector.multi_reduction <add>, %199, %cst_114 [1] : vector<32x128xf32> to vector<32xf32>
    %205 = vector.shape_cast %204 : vector<32xf32> to vector<32x1xf32>
    %cst_115 = arith.constant 1.280000e+02 : f32
    %206 = vector.broadcast %cst_115 : f32 to vector<32x1xf32>
    %207 = arith.divf %205, %206 : vector<32x1xf32>
    %208 = vector.broadcast %207 : vector<32x1xf32> to vector<32x128xf32>
    %209 = arith.subf %199, %208 : vector<32x128xf32>
    %210 = arith.mulf %209, %209 : vector<32x128xf32>
    %cst_116 = arith.constant dense<0.000000e+00> : vector<32xf32>
    %211 = vector.multi_reduction <add>, %210, %cst_116 [1] : vector<32x128xf32> to vector<32xf32>
    %212 = vector.shape_cast %211 : vector<32xf32> to vector<32x1xf32>
    %cst_117 = arith.constant 1.280000e+02 : f32
    %213 = vector.broadcast %cst_117 : f32 to vector<32x1xf32>
    %214 = arith.divf %212, %213 : vector<32x1xf32>
    %cst_118 = arith.constant 9.99999974E-6 : f32
    %215 = vector.broadcast %cst_118 : f32 to vector<32x1xf32>
    %216 = arith.addf %214, %215 : vector<32x1xf32>
    %217 = math.rsqrt %216 : vector<32x1xf32>
    %218 = vector.broadcast %217 : vector<32x1xf32> to vector<32x128xf32>
    %219 = arith.mulf %209, %218 : vector<32x128xf32>
    %220 = vector.broadcast %201 : vector<1x128xf32> to vector<32x128xf32>
    %221 = arith.mulf %219, %220 : vector<32x128xf32>
    %222 = vector.broadcast %203 : vector<1x128xf32> to vector<32x128xf32>
    %223 = arith.addf %221, %222 : vector<32x128xf32>
    %c0_119 = arith.constant 0 : index
    %c0_120 = arith.constant 0 : index
    %224 = vector.load %arg17[%c0_119, %c0_120] : memref<128x128xf32, #tpu.memory_space<vmem>>, vector<128x128xf32>
    %cst_121 = arith.constant dense<0.000000e+00> : vector<32x128xf32>
    %225 = tpu.matmul %223, %224, %cst_121 {dimension_numbers = #tpu.dot_dimension_numbers<[1], [0], [0], [1], [0, 0, 1, 1], [], []>} : vector<32x128xf32>, vector<128x128xf32>, vector<32x128xf32> -> vector<32x128xf32>
    %c0_122 = arith.constant 0 : index
    %c0_123 = arith.constant 0 : index
    %226 = vector.load %arg18[%c0_122, %c0_123] : memref<1x128xf32, #tpu.memory_space<vmem>>, vector<1x128xf32>
    %227 = vector.broadcast %226 : vector<1x128xf32> to vector<32x128xf32>
    %228 = arith.addf %225, %227 : vector<32x128xf32>
    %229 = vector.shape_cast %228 : vector<32x128xf32> to vector<2x16x128xf32>
    %c0_124 = arith.constant 0 : index
    %c0_125 = arith.constant 0 : index
    %c0_126 = arith.constant 0 : index
    %230 = vector.load %arg19[%c0_124, %c0_125, %c0_126] : memref<2x16x128xf32, #tpu.memory_space<vmem>>, vector<2x16x128xf32>
    tpu.vector_store %arg19[%c0_124, %c0_125, %c0_126], %229 {strides = array<i32>} : memref<2x16x128xf32, #tpu.memory_space<vmem>>, vector<2x16x128xf32>,
    return
  }
  func.func @transform_0(%arg0: i32) -> (i32, i32, i32) {
    %c0_i32 = arith.constant 0 : i32
    %c0_i32_0 = arith.constant 0 : i32
    %c0_i32_1 = arith.constant 0 : i32
    return %arg0, %c0_i32, %c0_i32_0 : i32, i32, i32
  }
  func.func @transform_1(%arg0: i32) -> (i32, i32, i32) {
    %c0_i32 = arith.constant 0 : i32
    %c0_i32_0 = arith.constant 0 : i32
    %c0_i32_1 = arith.constant 0 : i32
    return %arg0, %c0_i32, %c0_i32_0 : i32, i32, i32
  }
  func.func @transform_2(%arg0: i32) -> (i32, i32) {
    %c0_i32 = arith.constant 0 : i32
    %c0_i32_0 = arith.constant 0 : i32
    %c0_i32_1 = arith.constant 0 : i32
    return %c0_i32, %c0_i32_0 : i32, i32
  }
  func.func @transform_3(%arg0: i32) -> (i32, i32) {
    %c0_i32 = arith.constant 0 : i32
    %c0_i32_0 = arith.constant 0 : i32
    %c0_i32_1 = arith.constant 0 : i32
    return %c0_i32, %c0_i32_0 : i32, i32
  }
  func.func @transform_4(%arg0: i32) -> (i32, i32, i32) {
    %c0_i32 = arith.constant 0 : i32
    %c0_i32_0 = arith.constant 0 : i32
    %c0_i32_1 = arith.constant 0 : i32
    %c0_i32_2 = arith.constant 0 : i32
    return %c0_i32, %c0_i32_0, %c0_i32_1 : i32, i32, i32
  }
  func.func @transform_5(%arg0: i32) -> (i32, i32, i32) {
    %c0_i32 = arith.constant 0 : i32
    %c0_i32_0 = arith.constant 0 : i32
    %c0_i32_1 = arith.constant 0 : i32
    %c0_i32_2 = arith.constant 0 : i32
    return %c0_i32, %c0_i32_0, %c0_i32_1 : i32, i32, i32
  }
  func.func @transform_6(%arg0: i32) -> (i32, i32, i32) {
    %c0_i32 = arith.constant 0 : i32
    %c0_i32_0 = arith.constant 0 : i32
    %c0_i32_1 = arith.constant 0 : i32
    %c0_i32_2 = arith.constant 0 : i32
    return %c0_i32, %c0_i32_0, %c0_i32_1 : i32, i32, i32
  }
  func.func @transform_7(%arg0: i32) -> (i32, i32, i32) {
    %c0_i32 = arith.constant 0 : i32
    %c0_i32_0 = arith.constant 0 : i32
    %c0_i32_1 = arith.constant 0 : i32
    %c0_i32_2 = arith.constant 0 : i32
    return %c0_i32, %c0_i32_0, %c0_i32_1 : i32, i32, i32
  }
  func.func @transform_8(%arg0: i32) -> (i32, i32, i32) {
    %c0_i32 = arith.constant 0 : i32
    %c0_i32_0 = arith.constant 0 : i32
    %c0_i32_1 = arith.constant 0 : i32
    %c0_i32_2 = arith.constant 0 : i32
    return %c0_i32, %c0_i32_0, %c0_i32_1 : i32, i32, i32
  }
  func.func @transform_9(%arg0: i32) -> (i32, i32, i32) {
    %c0_i32 = arith.constant 0 : i32
    %c0_i32_0 = arith.constant 0 : i32
    %c0_i32_1 = arith.constant 0 : i32
    %c0_i32_2 = arith.constant 0 : i32
    return %c0_i32, %c0_i32_0, %c0_i32_1 : i32, i32, i32
  }
  func.func @transform_10(%arg0: i32) -> (i32, i32, i32) {
    %c0_i32 = arith.constant 0 : i32
    %c0_i32_0 = arith.constant 0 : i32
    %c0_i32_1 = arith.constant 0 : i32
    %c0_i32_2 = arith.constant 0 : i32
    return %c0_i32, %c0_i32_0, %c0_i32_1 : i32, i32, i32
  }
  func.func @transform_11(%arg0: i32) -> (i32, i32, i32) {
    %c0_i32 = arith.constant 0 : i32
    %c0_i32_0 = arith.constant 0 : i32
    %c0_i32_1 = arith.constant 0 : i32
    %c0_i32_2 = arith.constant 0 : i32
    return %c0_i32, %c0_i32_0, %c0_i32_1 : i32, i32, i32
  }
  func.func @transform_12(%arg0: i32) -> (i32, i32, i32) {
    %c0_i32 = arith.constant 0 : i32
    %c0_i32_0 = arith.constant 0 : i32
    %c0_i32_1 = arith.constant 0 : i32
    %c0_i32_2 = arith.constant 0 : i32
    return %c0_i32, %c0_i32_0, %c0_i32_1 : i32, i32, i32
  }
  func.func @transform_13(%arg0: i32) -> (i32, i32, i32) {
    %c0_i32 = arith.constant 0 : i32
    %c0_i32_0 = arith.constant 0 : i32
    %c0_i32_1 = arith.constant 0 : i32
    %c0_i32_2 = arith.constant 0 : i32
    return %c0_i32, %c0_i32_0, %c0_i32_1 : i32, i32, i32
  }
  func.func @transform_14(%arg0: i32) -> (i32, i32, i32) {
    %c0_i32 = arith.constant 0 : i32
    %c0_i32_0 = arith.constant 0 : i32
    %c0_i32_1 = arith.constant 0 : i32
    %c0_i32_2 = arith.constant 0 : i32
    return %c0_i32, %c0_i32_0, %c0_i32_1 : i32, i32, i32
  }
  func.func @transform_15(%arg0: i32) -> (i32, i32, i32) {
    %c0_i32 = arith.constant 0 : i32
    %c0_i32_0 = arith.constant 0 : i32
    %c0_i32_1 = arith.constant 0 : i32
    %c0_i32_2 = arith.constant 0 : i32
    return %c0_i32, %c0_i32_0, %c0_i32_1 : i32, i32, i32
  }
  func.func @transform_16(%arg0: i32) -> (i32, i32) {
    %c0_i32 = arith.constant 0 : i32
    %c0_i32_0 = arith.constant 0 : i32
    %c0_i32_1 = arith.constant 0 : i32
    return %c0_i32, %c0_i32_0 : i32, i32
  }
  func.func @transform_17(%arg0: i32) -> (i32, i32) {
    %c0_i32 = arith.constant 0 : i32
    %c0_i32_0 = arith.constant 0 : i32
    %c0_i32_1 = arith.constant 0 : i32
    return %c0_i32, %c0_i32_0 : i32, i32
  }
  func.func @transform_18(%arg0: i32) -> (i32, i32, i32) {
    %c0_i32 = arith.constant 0 : i32
    %c0_i32_0 = arith.constant 0 : i32
    %c0_i32_1 = arith.constant 0 : i32
    return %arg0, %c0_i32, %c0_i32_0 : i32, i32, i32
  }
}

</mosaic_0001>

<bundles_post_ra>
// kernel: garenrec_forward.1
= control target key start
LH: loop header
LB: loop body
LE: loop exit
PB: predicated region body
PF: predicated region fallthrough
CT: control target
= control target key end

     0   :  { %s15711_s0 = inlined_call_operand.vmem [shape: f32[2,16,128], index: 0, kind: input, shape index: {}]   ;;  %s15712_s1 = inlined_call_operand.vmem [shape: f32[2,16,128], index: 1, kind: input, shape index: {}]   ;;  %s15713_s2 = inlined_call_operand.vmem [shape: f32[128,128], index: 2, kind: input, shape index: {}]   ;;  %s15714_s3 = inlined_call_operand.vmem [shape: f32[1,128], index: 3, kind: input, shape index: {}]   ;;  %s15715_s4 = inlined_call_operand.vmem [shape: f32[2,128,384], index: 4, kind: input, shape index: {}]   ;;  %s15716_s5 = inlined_call_operand.vmem [shape: f32[2,1,384], index: 5, kind: input, shape index: {}]   ;;  %s15717_s6 = inlined_call_operand.vmem [shape: f32[2,128,128], index: 6, kind: input, shape index: {}]   ;;  %s15718_s7 = inlined_call_operand.vmem [shape: f32[2,1,128], index: 7, kind: input, shape index: {}]   ;;  %s15719_s8 = inlined_call_operand.vmem [shape: f32[2,128,512], index: 8, kind: input, shape index: {}]   ;;  %s15720_s9 = inlined_call_operand.vmem [shape: f32[2,1,512], index: 9, kind: input, shape index: {}]   ;;  %s15721_s10 = inlined_call_operand.vmem [shape: f32[2,512,128], index: 10, kind: input, shape index: {}]   ;;  %s15722_s11 = inlined_call_operand.vmem [shape: f32[2,1,128], index: 11, kind: input, shape index: {}]   ;;  %s15723_s12 = inlined_call_operand.vmem [shape: f32[2,1,128], index: 12, kind: input, shape index: {}]   ;;  %s15724_s13 = inlined_call_operand.vmem [shape: f32[2,1,128], index: 13, kind: input, shape index: {}]   ;;  %s15725_s14 = inlined_call_operand.vmem [shape: f32[2,1,128], index: 14, kind: input, shape index: {}]   ;;  %s15726_s15 = inlined_call_operand.vmem [shape: f32[2,1,128], index: 15, kind: input, shape index: {}]   ;;  %s15727_s16 = inlined_call_operand.vmem [shape: f32[128,128], index: 16, kind: input, shape index: {}]   ;;  %s15728_s17 = inlined_call_operand.vmem [shape: f32[1,128], index: 17, kind: input, shape index: {}]   ;;  %s15729_s18 = inlined_call_operand.hbm [shape: f32[2,16,128], index: 18, kind: output, shape index: {}]  }
   0x1   :  { %15736 = sst [smem:[#allocation5_spill]] %s15711_s0 }
   0x2   :  { %15737 = sst [smem:[#allocation6_spill]] %s15712_s1 }
   0x3   :  { %15738 = sst [smem:[#allocation7_spill]] %s15713_s2 }
   0x4   :  { %s15739_s29 = sld [smem:[#allocation7_spill]]  ;;  %s15740_s27 = sld [smem:[#allocation6_spill]]  ;;  %v185_v12 = vld [vmem:[%s15715_s4 + $0x8] sm:$0xff]  ;;  %v188_v13 = vld [vmem:[%s15715_s4 + $0x20] sm:$0xff]  ;;  %v187_v15 = vld [vmem:[%s15715_s4 + $0x18] sm:$0xff] }
   0x5   :  { %v184_v14 = vld [vmem:[%s15715_s4] sm:$0xff]  ;;  %v11379_v16 = vpack.c.bf16 %v188_v13, %v185_v12  ;;  %v191_v18 = vld [vmem:[%s15715_s4 + $0x38] sm:$0xff]  ;;  %v194_v20 = vld [vmem:[%s15715_s4 + $0x50] sm:$0xff] }
   0x6   :  { %v11381_v17 = vpack.c.bf16 %v187_v15, %v184_v14  ;;  %v190_v21 = vld [vmem:[%s15715_s4 + $0x30] sm:$0xff]  ;;  %v193_v22 = vld [vmem:[%s15715_s4 + $0x48] sm:$0xff]  ;;  %v11383_v25 = vpack.c.bf16 %v194_v20, %v191_v18  ;;  %v200_v28 = vld [vmem:[%s15715_s4 + $0x80] sm:$0xff] }
   0x7   :  { %11380 = vmatprep.subr.bf16.mxu1 %v11379_v16  ;;  %v197_v26 = vld [vmem:[%s15715_s4 + $0x68] sm:$0xff]  ;;  %v11385_v27 = vpack.c.bf16 %v193_v22, %v190_v21  ;;  %v196_v30 = vld [vmem:[%s15715_s4 + $0x60] sm:$0xff]  ;;  %v199_v31 = vld [vmem:[%s15715_s4 + $0x78] sm:$0xff] }
   0x8   :  { %11382 = vmatpush1.bf16.msra.mxu1 %v11381_v17  ;;  %v11387_v29 = vpack.c.bf16 %v200_v28, %v197_v26  ;;  %v203_v33 = vld [vmem:[%s15715_s4 + $0x98] sm:$0xff]  ;;  %v206_v34 = vld [vmem:[%s15715_s4 + $0xb0] sm:$0xff]  ;;  %v11389_v37 = vpack.c.bf16 %v199_v31, %v196_v30  ;;  %v205_v40 = vld [vmem:[%s15715_s4 + $0xa8] sm:$0xff] }
   0x9   :  { %11384 = vmatprep.subr.bf16.mxu1 %v11383_v25  ;;  %v11391_v38 = vpack.c.bf16 %v206_v34, %v203_v33  ;;  %v202_v39 = vld [vmem:[%s15715_s4 + $0x90] sm:$0xff]  ;;  %v209_v42 = vld [vmem:[%s15715_s4 + $0xc8] sm:$0xff]  ;;  %v212_v43 = vld [vmem:[%s15715_s4 + $0xe0] sm:$0xff] }
   0xa   :  { %v64_v0 = vld [vmem:[%s15739_s29] sm:$0xff]  ;;  %v65_v1 = vld [vmem:[%s15739_s29 + $0x8] sm:$0xff]  ;;  %v66_v2 = vld [vmem:[%s15739_s29 + $0x10] sm:$0xff] }
   0xb   :  { %v11347_v3 = vpack.c.bf16 %v65_v1, %v64_v0  ;;  %v67_v4 = vld [vmem:[%s15739_s29 + $0x18] sm:$0xff]  ;;  %v68_v6 = vld [vmem:[%s15739_s29 + $0x20] sm:$0xff]  ;;  %v69_v7 = vld [vmem:[%s15739_s29 + $0x28] sm:$0xff] }
   0xc   :  { %v11351_v5 = vpack.c.bf16 %v67_v4, %v66_v2  ;;  %v11355_v8 = vpack.c.bf16 %v69_v7, %v68_v6  ;;  %v60_v9 = vld [vmem:[%s15740_s27] sm:$0xff]  ;;  %v70_v10 = vld [vmem:[%s15739_s29 + $0x30] sm:$0xff]  ;;  %v71_v11 = vld [vmem:[%s15739_s29 + $0x38] sm:$0xff]  ;;  %11386 = vmatpush1.bf16.msra.mxu1 %v11385_v27 }
   0xd   :  { %11348 = vmatprep.subr.bf16.mxu0 %v11347_v3  ;;  %10927 = vmatprep.mubr.f32.mxu0 %v60_v9  ;;  %v11359_v19 = vpack.c.bf16 %v71_v11, %v70_v10  ;;  %v72_v23 = vld [vmem:[%s15739_s29 + $0x40] sm:$0xff]  ;;  %v73_v24 = vld [vmem:[%s15739_s29 + $0x48] sm:$0xff]  ;;  %v74_v35 = vld [vmem:[%s15739_s29 + $0x50] sm:$0xff] }
   0xe   :  { %11350 = vmatpush3.bf16.msra.mxu0 %v11347_v3  ;;  %v11363_v32 = vpack.c.bf16 %v73_v24, %v72_v23  ;;  %v75_v36 = vld [vmem:[%s15739_s29 + $0x58] sm:$0xff]  ;;  %11388 = vmatprep.subr.bf16.mxu1 %v11387_v29  ;;  %v76_v44 = vld [vmem:[%s15739_s29 + $0x60] sm:$0xff]  ;;  %v77_v45 = vld [vmem:[%s15739_s29 + $0x68] sm:$0xff] }
   0xf   :  { %11352 = vmatprep.subr.bf16.mxu0 %v11351_v5  ;;  %v11367_v41 = vpack.c.bf16 %v75_v36, %v74_v35 }
  0x12   :  { %11354 = vmatpush3.bf16.msra.mxu0 %v11351_v5 }
  0x13   :  { %11356 = vmatprep.subr.bf16.mxu0 %v11355_v8 }
  0x16   :  { %11358 = vmatpush3.bf16.msra.mxu0 %v11355_v8 }
  0x17   :  { %11360 = vmatprep.subr.bf16.mxu0 %v11359_v19 }
  0x1a   :  { %11362 = vmatpush3.bf16.msra.mxu0 %v11359_v19 }
  0x1b   :  { %11364 = vmatprep.subr.bf16.mxu0 %v11363_v32 }
  0x1c   :  { %23 = vsyncpa [#allocation3], 0  ;;  %11390 = vmatpush1.bf16.msra.mxu1 %v11389_v37  ;;  %v11393_v46 = vpack.c.bf16 %v205_v40, %v202_v39  ;;  %v11395_v47 = vpack.c.bf16 %v212_v43, %v209_v42  ;;  %v208_v48 = vld [vmem:[%s15715_s4 + $0xc0] sm:$0xff]  ;;  %v211_v49 = vld [vmem:[%s15715_s4 + $0xd8] sm:$0xff]  ;;  %v11371_v50 = vpack.c.bf16 %v77_v45, %v76_v44  ;;  %v15734_v36 = vmov 0.0   ;;  %s15741_s0 = sld [smem:[#allocation5_spill]] }
  0x1d   :  { %11392 = vmatprep.subr.bf16.mxu1 %v11391_v38  ;;  %v215_v51 = vld [vmem:[%s15715_s4 + $0xf8] sm:$0xff]  ;;  %v218_v52 = vld [vmem:[%s15715_s4 + $0x110] sm:$0xff]  ;;  %v11397_v55 = vpack.c.bf16 %v211_v49, %v208_v48  ;;  %v217_v58 = vld [vmem:[%s15715_s4 + $0x108] sm:$0xff]  ;;  %313 = vmatprep.mubr.f32.mxu1 %v15734_v36  ;;  %s12273_s23 = smov 64   ;;  %s12274_s24 = smov 96   ;;  %vm2175_vm0 = vcmask 261120  }
  0x1e   :  { %11366 = vmatpush3.bf16.msra.mxu0 %v11363_v32  ;;  %v78_v53 = vld [vmem:[%s15739_s29 + $0x70] sm:$0xff]  ;;  %v79_v54 = vld [vmem:[%s15739_s29 + $0x78] sm:$0xff]  ;;  %v11399_v56 = vpack.c.bf16 %v218_v52, %v215_v51  ;;  %v189_v61 = vld [vmem:[%s15715_s4 + $0x28] sm:$0xff]  ;;  %s12275_s25 = smov 32   ;;  %vm2872_vm2 = vcmask 130048   ;;  %vm4293_vm3 = vcmask 523264  }
  0x1f   :  { %11368 = vmatprep.subr.bf16.mxu0 %v11367_v41  ;;  %v214_v57 = vld [vmem:[%s15715_s4 + $0xf0] sm:$0xff]  ;;  %v11375_v59 = vpack.c.bf16 %v79_v54, %v78_v53  ;;  %v192_v0 = vld [vmem:[%s15715_s4 + $0x40] sm:$0xff]  ;;  %v195_v1 = vld [vmem:[%s15715_s4 + $0x58] sm:$0xff]  ;;  %vm4298_vm4 = vcmask 785408   ;;  %s12278_s19 = smov [#allocation2]  }
  0x20   :  { %11394 = vmatpush1.bf16.msra.mxu1 %v11393_v46  ;;  %v186_v60 = vld [vmem:[%s15715_s4 + $0x10] sm:$0xff]  ;;  %v11401_v62 = vpack.c.bf16 %v217_v58, %v214_v57  ;;  %v61_v2 = vld [vmem:[%s15740_s27 + $0x8] sm:$0xff]  ;;  %v11415_v4 = vpack.c.bf16 %v195_v1, %v192_v0  ;;  %v63_v7 = vld [vmem:[%s15740_s27 + $0x18] sm:$0xff]  ;;  %v234_v58 = vlaneseq  ;;  %s10086_s1 = sshll.u32 %s12278_s19, 4  ;;  %s10087_s1 = int_to_ptr.vmem [resolvable:$true] %s10086_s1 }
  0x21   :  { %11396 = vmatprep.subr.bf16.mxu1 %v11395_v47  ;;  %v11411_v63 = vpack.c.bf16 %v189_v61, %v186_v60  ;;  %v62_v3 = vld [vmem:[%s15740_s27 + $0x10] sm:$0xff]  ;;  %v201_v6 = vld [vmem:[%s15715_s4 + $0x88] sm:$0xff]  ;;  %v204_v9 = vld [vmem:[%s15715_s4 + $0xa0] sm:$0xff]  ;;  %p12253_p1 = scmp.lt.s32.totalorder %s10087_s1, %s10087_s1 }
  0x22   :  { %11370 = vmatpush3.bf16.msra.mxu0 %v11367_v41  ;;  %v198_v5 = vld [vmem:[%s15715_s4 + $0x70] sm:$0xff]  ;;  %v207_v10 = vld [vmem:[%s15715_s4 + $0xb8] sm:$0xff]  ;;  %v213_v13 = vld [vmem:[%s15715_s4 + $0xe8] sm:$0xff] }
  0x23   :  { %11372 = vmatprep.subr.bf16.mxu0 %v11371_v50  ;;  %v11419_v8 = vpack.c.bf16 %v201_v6, %v198_v5  ;;  %v11423_v11 = vpack.c.bf16 %v207_v10, %v204_v9  ;;  %v210_v12 = vld [vmem:[%s15715_s4 + $0xd0] sm:$0xff]  ;;  %v216_v15 = vld [vmem:[%s15715_s4 + $0x100] sm:$0xff]  ;;  %v219_v16 = vld [vmem:[%s15715_s4 + $0x118] sm:$0xff] }
  0x24   :  { %11398 = vmatpush1.bf16.msra.mxu1 %v11397_v55  ;;  %v11427_v14 = vpack.c.bf16 %v213_v13, %v210_v12  ;;  %v11431_v17 = vpack.c.bf16 %v219_v16, %v216_v15  ;;  %v221_v18 = vld [vmem:[%s15715_s4 + $0x128] sm:$0xff]  ;;  %v224_v19 = vld [vmem:[%s15715_s4 + $0x140] sm:$0xff]  ;;  %v223_v22 = vld [vmem:[%s15715_s4 + $0x138] sm:$0xff] }
  0x25   :  { %11400 = vmatprep.subr.bf16.mxu1 %v11399_v56  ;;  %v11403_v20 = vpack.c.bf16 %v224_v19, %v221_v18  ;;  %v220_v21 = vld [vmem:[%s15715_s4 + $0x120] sm:$0xff]  ;;  %v222_v23 = vld [vmem:[%s15715_s4 + $0x130] sm:$0xff]  ;;  %v225_v25 = vld [vmem:[%s15715_s4 + $0x148] sm:$0xff] }
  0x26   :  { %11374 = vmatpush3.bf16.msra.mxu0 %v11371_v50  ;;  %v11405_v24 = vpack.c.bf16 %v223_v22, %v220_v21  ;;  %v11435_v26 = vpack.c.bf16 %v225_v25, %v222_v23  ;;  %v227_v27 = vld [vmem:[%s15715_s4 + $0x158] sm:$0xff]  ;;  %v230_v28 = vld [vmem:[%s15715_s4 + $0x170] sm:$0xff]  ;;  %v229_v31 = vld [vmem:[%s15715_s4 + $0x168] sm:$0xff] }
  0x27   :  { %11376 = vmatprep.subr.bf16.mxu0 %v11375_v59  ;;  %v11407_v29 = vpack.c.bf16 %v230_v28, %v227_v27  ;;  %v226_v30 = vld [vmem:[%s15715_s4 + $0x150] sm:$0xff]  ;;  %v228_v32 = vld [vmem:[%s15715_s4 + $0x160] sm:$0xff]  ;;  %v231_v34 = vld [vmem:[%s15715_s4 + $0x178] sm:$0xff]  ;;  %v12276_v27 = vmov 1983009808  }
  0x28   :  { %11402 = vmatpush1.bf16.msra.mxu1 %v11401_v62  ;;  %v11409_v33 = vpack.c.bf16 %v229_v31, %v226_v30  ;;  %v11439_v35 = vpack.c.bf16 %v231_v34, %v228_v32  ;;  %v10097_v37 = vld [vmem:[%s15714_s3] ss:$0 sm:$0xff]  ;;  %v177_v44 = vld [vmem:[%s15741_s0 + $0x8] sm:$0xff]  ;;  %v178_v53 = vld [vmem:[%s15741_s0 + $0x10] sm:$0xff]  ;;  %v466_v28 = vunpack.c.l.s4 %v12276_v27 }
  0x29   :  { %11404 = vmatprep.subr.bf16.mxu1 %v11403_v20  ;;  %v176_v43 = vld [vmem:[%s15741_s0] sm:$0xff]  ;;  %v179_v54 = vld [vmem:[%s15741_s0 + $0x18] sm:$0xff]  ;;  %vm12858_vm1 = vmpackc.low %vm2175_vm0, %vm2175_vm0 }
  0x2a   :  { %11378 = vmatpush3.bf16.msra.mxu0 %v11375_v59  ;;  %v12615_v59 = vshrl.u32 %v234_v58, 7  ;;  %v232_v61 = vld [vmem:[%s15716_s5] sm:$0x7]  ;;  %v467_v31 = vunpack.c.0.s8 %v466_v28 }
  0x2b   :  { %11412 = vmatprep.subr.bf16.mxu0 %v11411_v63 }
  0x2c   :  { %11406 = vmatpush1.bf16.msra.mxu1 %v11405_v24  ;;  %v12618_v60 = vsub.s32 1, %v12615_v59  ;;  %v12625_v0 = vsub.s32 2, %v12615_v59  ;;  %v12635_v9 = vsub.s32 0, %v12615_v59 }
  0x2d   :  { %10928 = vmatmul.mubr.f32.vlgmr.msra.gmra.mrb[0].mxu0 %v61_v2  ;;  %11408 = vmatprep.subr.bf16.mxu1 %v11407_v29  ;;  %v12277_v29 = vmov 1934713408  }
  0x2e   :  { %10930 = vmatprep.mubr.f32.mxu0 %v62_v3  ;;  %11414 = vmatpush3.bf16.msra.mxu0 %v11411_v63  ;;  %v241_v62 = vrot.slane %v232_v61, %v12618_v60  ;;  %v245_v5 = vrot.slane %v232_v61, %v12625_v0  ;;  %v237_v15 = vrot.slane %v232_v61, %v12635_v9  ;;  %v498_v30 = vunpack.c.l.s4 %v12277_v29 }
  0x2f   :  { %11416 = vmatprep.subr.bf16.mxu0 %v11415_v4 }
  0x30   :  { %11410 = vmatpush1.bf16.msra.mxu1 %v11409_v33  ;;  %v499_v34 = vunpack.c.0.s8 %v498_v30 }
  0x31   :  { %10931 = vmatmul.mubr.f32.gmra.mrb[2].mxu0 %v63_v7 }
  0x32   :  { %11418 = vmatpush3.bf16.msra.mxu0 %v11415_v4 }
  0x33   :  { %11420 = vmatprep.subr.bf16.mxu0 %v11419_v8 }
  0x36   :  { %11422 = vmatpush3.bf16.msra.mxu0 %v11419_v8 }
  0x37   :  { %11424 = vmatprep.subr.bf16.mxu0 %v11423_v11 }
  0x3a   :  { %11426 = vmatpush3.bf16.msra.mxu0 %v11423_v11 }
  0x3b   :  { %11428 = vmatprep.subr.bf16.mxu0 %v11427_v14 }
  0x3e   :  { %11430 = vmatpush3.bf16.msra.mxu0 %v11427_v14 }
  0x3f   :  { %11432 = vmatprep.subr.bf16.mxu0 %v11431_v17 }
  0x42   :  { %11434 = vmatpush3.bf16.msra.mxu0 %v11431_v17 }
  0x43   :  { %11436 = vmatprep.subr.bf16.mxu0 %v11435_v26 }
  0x46   :  { %11438 = vmatpush3.bf16.msra.mxu0 %v11435_v26 }
  0x47   :  { %11440 = vmatprep.subr.bf16.mxu0 %v11439_v35 }
  0x4a   :  { %11442 = vmatpush3.bf16.msra.mxu0 %v11439_v35  ;;  %v12719_v35 = vsub.s32 %v467_v31, %v12615_v59 }
 0x100   :  { %v10929_v38 = vpop.f32.mrb[0].mxu0 }
 0x101   :  { %v159_v39 = vadd.f32 %v10929_v38, %v10097_v37  ;;  %v153_v40 = vpop.f32.mrb[1].mxu0 }
 0x102   :  { %v154_v41 = vadd.f32 %v10097_v37, %v153_v40 }
 0x103   :  { %v173_v42 = vmax.f32 %v159_v39, 0.0 }
 0x104   :  { %v172_v45 = vmax.f32 %v154_v41, 0.0  ;;  %v10932_v46 = vpop.f32.mrb[2].mxu0 }
 0x105   :  { %v169_v47 = vadd.f32 %v10932_v46, %v10097_v37  ;;  %v163_v48 = vpop.f32.mrb[3].mxu0  ;;  %v12592_v51 = vadd.f32 %v177_v44, %v173_v42 }
 0x106   :  { %v12590_v49 = vadd.f32 %v176_v43, %v172_v45  ;;  %v164_v50 = vadd.f32 %v10097_v37, %v163_v48  ;;  %v12724_v43 = vsub.s32 %v499_v34, %v12615_v59 }
 0x107   :  { %v175_v52 = vmax.f32 %v169_v47, 0.0 }
 0x108   :  { %314 = vmatmul.mubr.f32.vlgmr.msra.gmra.mrb[0].mxu1 %v12590_v49  ;;  %10965 = vmatprep.mubr.f32.mxu0 %v12590_v49  ;;  %v174_v55 = vmax.f32 %v164_v50, 0.0 }
 0x109   :  { %10966 = vmatmul.mubr.f32.vlgmr.msra.gmra.mrb[4].mxu0 %v12592_v51  ;;  %319 = vmatprep.mubr.f32.mxu1 %v15734_v36  ;;  %v12606_v57 = vadd.f32 %v179_v54, %v175_v52 }
 0x10a   :  { %v12604_v56 = vadd.f32 %v178_v53, %v174_v55 }
 0x10c   :  { %320 = vmatmul.mubr.f32.gmra.mrb[2].mxu1 %v12592_v51  ;;  %10968 = vmatprep.mubr.f32.mxu0 %v12604_v56 }
 0x10d   :  { %325 = vmatprep.mubr.f32.mxu1 %v15734_v36  ;;  %10969 = vmatmul.mubr.f32.gmra.mrb[6].mxu0 %v12606_v57 }
 0x110   :  { %326 = vmatmul.mubr.f32.gmra.mrb[4].mxu1 %v12604_v56 }
 0x111   :  { %331 = vmatprep.mubr.f32.mxu1 %v15734_v36 }
 0x114   :  { %332 = vmatmul.mubr.f32.gmra.mrb[6].mxu1 %v12606_v57 }
 0x1db   :  { %v315_v63 = vpop.f32.mrb[0].mxu1 }
 0x1dc   :  { %v317_v1 = vpop.f32.mrb[1].mxu1  ;;  %v10967_v2 = vpop.f32.mrb[4].mxu0  ;;  %v12650_v18 = vadd.f32 %v315_v63, %v237_v15 }
 0x1dd   :  { %v12627_v3 = vadd.f32 %v317_v1, %v241_v62  ;;  %v404_v4 = vpop.f32.mrb[5].mxu0  ;;  %v12698_v24 = vadd.f32 %v10967_v2, %v245_v5 }
 0x1de   :  { %v12700_v25 = vadd.f32 %v404_v4, %v245_v5 }
 0x1df   :  { %v321_v6 = vpop.f32.mrb[2].mxu1  ;;  %1023 = vrot.lane.b32.xlu1 %v12627_v3, %s12273_s23  ;;  %1011 = vrot.lane.b32.xlu0 %v12627_v3, %s12274_s24 }
 0x1e0   :  { %v323_v7 = vpop.f32.mrb[3].mxu1  ;;  %v10970_v8 = vpop.f32.mrb[6].mxu0  ;;  %v12656_v19 = vadd.f32 %v321_v6, %v237_v15 }
 0x1e1   :  { %v12637_v10 = vadd.f32 %v323_v7, %v241_v62  ;;  %v12639_v11 = vadd.f32 %v10970_v8, %v245_v5  ;;  %v414_v12 = vpop.f32.mrb[7].mxu0 }
 0x1e2   :  { %v12714_v26 = vadd.f32 %v414_v12, %v245_v5 }
 0x1e3   :  { %1025 = vrot.lane.b32.xlu1 %v12637_v10, %s12273_s23  ;;  %1035 = vrot.lane.b32.xlu0 %v12627_v3, %s12275_s25  ;;  %v327_v13 = vpop.f32.mrb[4].mxu1 }
 0x1e4   :  { %v329_v14 = vpop.f32.mrb[5].mxu1  ;;  %v12678_v22 = vadd.f32 %v327_v13, %v237_v15 }
 0x1e5   :  { %v12662_v20 = vadd.f32 %v329_v14, %v241_v62 }
 0x1e7   :  { %1037 = vrot.lane.b32.xlu1 %v12637_v10, %s12275_s25  ;;  %1013 = vrot.lane.b32.xlu0 %v12637_v10, %s12274_s24  ;;  %v333_v16 = vpop.f32.mrb[6].mxu1 }
 0x1e8   :  { %v335_v17 = vpop.f32.mrb[7].mxu1  ;;  %v12688_v23 = vadd.f32 %v333_v16, %v237_v15 }
 0x1e9   :  { %v12668_v21 = vadd.f32 %v335_v17, %v241_v62 }
 0x1eb   :  { %439 = vrot.lane.b32.xlu1 %v12650_v18, %s12273_s23  ;;  %427 = vrot.lane.b32.xlu0 %v12650_v18, %s12274_s24 }
 0x1ef   :  { %429 = vrot.lane.b32.xlu1 %v12656_v19, %s12274_s24  ;;  %451 = vrot.lane.b32.xlu0 %v12650_v18, %s12275_s25 }
 0x1f3   :  { %453 = vrot.lane.b32.xlu1 %v12656_v19, %s12275_s25  ;;  %441 = vrot.lane.b32.xlu0 %v12656_v19, %s12273_s23 }
 0x1f7   :  { %1017 = vrot.lane.b32.xlu1 %v12668_v21, %s12274_s24  ;;  %1015 = vrot.lane.b32.xlu0 %v12662_v20, %s12274_s24 }
 0x1fb   :  { %1029 = vrot.lane.b32.xlu1 %v12668_v21, %s12273_s23  ;;  %1027 = vrot.lane.b32.xlu0 %v12662_v20, %s12273_s23 }
 0x1ff   :  { %1041 = vrot.lane.b32.xlu1 %v12668_v21, %s12275_s25  ;;  %1039 = vrot.lane.b32.xlu0 %v12662_v20, %s12275_s25 }
 0x203   :  { %443 = vrot.lane.b32.xlu1 %v12678_v22, %s12273_s23  ;;  %431 = vrot.lane.b32.xlu0 %v12678_v22, %s12274_s24 }
 0x207   :  { %433 = vrot.lane.b32.xlu1 %v12688_v23, %s12274_s24  ;;  %455 = vrot.lane.b32.xlu0 %v12678_v22, %s12275_s25 }
 0x20b   :  { %457 = vrot.lane.b32.xlu1 %v12688_v23, %s12275_s25  ;;  %445 = vrot.lane.b32.xlu0 %v12688_v23, %s12273_s23 }
 0x20f   :  { %1595 = vrot.lane.b32.xlu1 %v12700_v25, %s12274_s24  ;;  %1597 = vrot.lane.b32.xlu0 %v12698_v24, %s12274_s24 }
 0x213   :  { %1607 = vrot.lane.b32.xlu1 %v12700_v25, %s12273_s23  ;;  %1619 = vrot.lane.b32.xlu0 %v12700_v25, %s12275_s25 }
 0x217   :  { %1609 = vrot.lane.b32.xlu1 %v12698_v24, %s12273_s23 }
 0x21b   :  { %1621 = vrot.lane.b32.xlu1 %v12698_v24, %s12275_s25 }
 0x21f   :  { %1599 = vrot.lane.b32.xlu1 %v12714_v26, %s12274_s24 }
 0x251   :  { %v1024_v32 = vpop.permute.xlu1 %1023  ;;  %v1012_v33 = vpop.permute.xlu0 %1011 }
 0x252   :  { %v1047_v37 = vcombine.low %v12627_v3, %v1024_v32  ;;  %v1048_v38 = vcombine.high %v12627_v3, %v1024_v32 }
 0x254   :  { %v1055_v44 = vrot.slane %v1047_v37, %v12719_v35  ;;  %v1062_v45 = vrot.slane %v1048_v38, %v12719_v35 }
 0x255   :  { %v1026_v39 = vpop.permute.xlu1 %1025  ;;  %v1036_v40 = vpop.permute.xlu0 %1035 }
 0x256   :  { %v1063_v41 = vcombine.low %v1012_v33, %v1036_v40  ;;  %v1064_v42 = vcombine.high %v1012_v33, %v1036_v40  ;;  %v1115_v48 = vcombine.low %v12637_v10, %v1026_v39  ;;  %v1116_v50 = vcombine.high %v12637_v10, %v1026_v39 }
 0x258   :  { %v1071_v46 = vrot.slane %v1063_v41, %v12719_v35  ;;  %v1078_v47 = vrot.slane %v1064_v42, %v12719_v35  ;;  %v1123_v5 = vrot.slane %v1115_v48, %v12719_v35  ;;  %v1130_v6 = vrot.slane %v1116_v50, %v12719_v35 }
 0x259   :  { %v1038_v52 = vpop.permute.xlu1 %1037  ;;  %v1014_v53 = vpop.permute.xlu0 %1013 }
 0x25a   :  { %v1079_v54 = vcombine.low %v1055_v44, %v1071_v46  ;;  %v1080_v55 = vcombine.high %v1055_v44, %v1071_v46  ;;  %v1095_v58 = vcombine.low %v1062_v45, %v1078_v47  ;;  %v1096_v61 = vcombine.high %v1062_v45, %v1078_v47 }
 0x25b   :  { %v1131_v62 = vcombine.low %v1014_v53, %v1038_v52  ;;  %v1132_v63 = vcombine.high %v1014_v53, %v1038_v52 }
 0x25c   :  { %v1087_v1 = vrot.slane %v1079_v54, %v12724_v43  ;;  %v1094_v2 = vrot.slane %v1080_v55, %v12724_v43  ;;  %v1103_v3 = vrot.slane %v1095_v58, %v12724_v43  ;;  %v1110_v4 = vrot.slane %v1096_v61, %v12724_v43 }
 0x25d   :  { %v1139_v7 = vrot.slane %v1131_v62, %v12719_v35  ;;  %v1146_v8 = vrot.slane %v1132_v63, %v12719_v35  ;;  %v440_v10 = vpop.permute.xlu1 %439  ;;  %v428_v12 = vpop.permute.xlu0 %427 }
 0x25e   :  { %v1319_v13 = vcombine.low %v1087_v1, %v1094_v2  ;;  %v10106_v14 = vcombine.high %v1087_v1, %v1094_v2  ;;  %v1335_v15 = vcombine.low %v1103_v3, %v1110_v4  ;;  %v10107_v16 = vcombine.high %v1103_v3, %v1110_v4 }
 0x25f   :  { %v1147_v17 = vcombine.low %v1123_v5, %v1139_v7  ;;  %v1148_v27 = vcombine.high %v1123_v5, %v1139_v7  ;;  %v1163_v28 = vcombine.low %v1130_v6, %v1146_v8  ;;  %v1164_v29 = vcombine.high %v1130_v6, %v1146_v8 }
 0x260   :  { %v12741_v30 = vrot.slane %v1319_v13, %v12719_v35  ;;  %v12744_v31 = vrot.slane %v10106_v14, %v12719_v35  ;;  %v12747_v32 = vrot.slane %v1335_v15, %v12719_v35  ;;  %v12750_v33 = vrot.slane %v10107_v16, %v12719_v35 }
 0x261   :  { %v1155_v34 = vrot.slane %v1147_v17, %v12724_v43  ;;  %v1162_v37 = vrot.slane %v1148_v27, %v12724_v43  ;;  %v1171_v38 = vrot.slane %v1163_v28, %v12724_v43  ;;  %v1178_v39 = vrot.slane %v1164_v29, %v12724_v43  ;;  %v430_v40 = vpop.permute.xlu1 %429  ;;  %v452_v41 = vpop.permute.xlu0 %451 }
 0x262   :  { %v463_v42 = vcombine.low %v12650_v18, %v440_v10  ;;  %v464_v44 = vcombine.high %v12650_v18, %v440_v10  ;;  %v479_v45 = vcombine.low %v428_v12, %v452_v41  ;;  %v480_v46 = vcombine.high %v428_v12, %v452_v41 }
 0x263   :  { %v1387_v47 = vcombine.low %v1155_v34, %v1162_v37  ;;  %v10108_v48 = vcombine.high %v1155_v34, %v1162_v37  ;;  %v1403_v50 = vcombine.low %v1171_v38, %v1178_v39  ;;  %v10109_v52 = vcombine.high %v1171_v38, %v1178_v39 }
 0x264   :  { %v471_v53 = vrot.slane %v463_v42, %v12719_v35  ;;  %v478_v54 = vrot.slane %v464_v44, %v12719_v35  ;;  %v487_v55 = vrot.slane %v479_v45, %v12719_v35  ;;  %v494_v58 = vrot.slane %v480_v46, %v12719_v35 }
 0x265   :  { %v12763_v61 = vrot.slane %v1387_v47, %v12719_v35  ;;  %v12766_v62 = vrot.slane %v10108_v48, %v12719_v35  ;;  %v12769_v18 = vrot.slane %v1403_v50, %v12719_v35  ;;  %v12772_v63 = vrot.slane %v10109_v52, %v12719_v35  ;;  %v454_v1 = vpop.permute.xlu1 %453  ;;  %v442_v2 = vpop.permute.xlu0 %441 }
 0x266   :  { %v495_v3 = vcombine.low %v471_v53, %v487_v55  ;;  %v496_v4 = vcombine.high %v471_v53, %v487_v55  ;;  %v511_v5 = vcombine.low %v478_v54, %v494_v58  ;;  %v512_v6 = vcombine.high %v478_v54, %v494_v58 }
 0x267   :  { %v547_v7 = vcombine.low %v430_v40, %v454_v1  ;;  %v548_v8 = vcombine.high %v430_v40, %v454_v1  ;;  %v531_v10 = vcombine.low %v12656_v19, %v442_v2  ;;  %v532_v12 = vcombine.high %v12656_v19, %v442_v2 }
 0x268   :  { %v12777_v13 = vrot.slane %v495_v3, %v12724_v43  ;;  %v12780_v14 = vrot.slane %v496_v4, %v12724_v43  ;;  %v12783_v15 = vrot.slane %v511_v5, %v12724_v43  ;;  %v12786_v16 = vrot.slane %v512_v6, %v12724_v43 }
 0x269   :  { %v555_v17 = vrot.slane %v547_v7, %v12719_v35  ;;  %v562_v27 = vrot.slane %v548_v8, %v12719_v35  ;;  %v539_v28 = vrot.slane %v531_v10, %v12719_v35  ;;  %v546_v19 = vrot.slane %v532_v12, %v12719_v35  ;;  %v12792_v29 = vpop.permute.xlu1 %1017  ;;  %v12794_v34 = vpop.permute.xlu0 %1015 }
 0x26a   :  { %v735_v37 = vcombine.low %v12777_v13, %v12780_v14  ;;  %v10098_v38 = vcombine.high %v12777_v13, %v12780_v14  ;;  %v751_v39 = vcombine.low %v12783_v15, %v12786_v16  ;;  %v10099_v40 = vcombine.high %v12783_v15, %v12786_v16 }
 0x26b   :  { %v563_v41 = vcombine.low %v539_v28, %v555_v17  ;;  %v564_v42 = vcombine.high %v539_v28, %v555_v17  ;;  %v579_v44 = vcombine.low %v546_v19, %v562_v27  ;;  %v580_v45 = vcombine.high %v546_v19, %v562_v27 }
 0x26c   :  { %v1351_v46 = vcombine.low %v12741_v30, %v12744_v31  ;;  %v1367_v47 = vcombine.low %v12747_v32, %v12750_v33  ;;  %v1419_v48 = vcombine.low %v12763_v61, %v12766_v62  ;;  %v1435_v50 = vcombine.low %v12769_v18, %v12772_v63 }
 0x26d   :  { %v571_v52 = vrot.slane %v563_v41, %v12724_v43  ;;  %v578_v53 = vrot.slane %v564_v42, %v12724_v43  ;;  %v587_v54 = vrot.slane %v579_v44, %v12724_v43  ;;  %v594_v55 = vrot.slane %v580_v45, %v12724_v43  ;;  %v1030_v58 = vpop.permute.xlu1 %1029  ;;  %v1028_v1 = vpop.permute.xlu0 %1027 }
 0x26e   :  { %v1251_v2 = vcombine.low %v12668_v21, %v1030_v58  ;;  %v1252_v3 = vcombine.high %v12668_v21, %v1030_v58  ;;  %v1183_v4 = vcombine.low %v12662_v20, %v1028_v1  ;;  %v1184_v5 = vcombine.high %v12662_v20, %v1028_v1 }
 0x26f   :  { %v803_v6 = vcombine.low %v571_v52, %v578_v53  ;;  %v10100_v7 = vcombine.high %v571_v52, %v578_v53  ;;  %v819_v8 = vcombine.low %v587_v54, %v594_v55  ;;  %v10101_v10 = vcombine.high %v587_v54, %v594_v55 }
 0x270   :  { %v12821_v12 = vrot.slane %v1251_v2, %v12719_v35  ;;  %v12824_v17 = vrot.slane %v1252_v3, %v12719_v35  ;;  %v12827_v27 = vrot.slane %v1183_v4, %v12719_v35  ;;  %v12830_v28 = vrot.slane %v1184_v5, %v12719_v35 }
 0x271   :  { %v810_v21 = vrot.slane %v803_v6, %v12719_v35  ;;  %v818_v20 = vrot.slane %v10100_v7, %v12719_v35  ;;  %v826_v19 = vrot.slane %v819_v8, %v12719_v35  ;;  %v834_v41 = vrot.slane %v10101_v10, %v12719_v35  ;;  %v1042_v42 = vpop.permute.xlu1 %1041  ;;  %v1040_v54 = vpop.permute.xlu0 %1039 }
 0x272   :  { %v1359_v44 = vrot.slane %v1351_v46, %v12724_v43  ;;  %v1375_v45 = vrot.slane %v1367_v47, %v12724_v43  ;;  %v1427_v52 = vrot.slane %v1419_v48, %v12724_v43  ;;  %v1443_v53 = vrot.slane %v1435_v50, %v12724_v43 }
 0x273   :  { %v835_v55 = vcombine.low %v810_v21, %v818_v20  ;;  %v836_v58 = vcombine.high %v810_v21, %v818_v20  ;;  %v851_v1 = vcombine.low %v826_v19, %v834_v41  ;;  %v852_v2 = vcombine.high %v826_v19, %v834_v41 }
 0x274   :  { %v1383_v3 = vcombine.low %v1359_v44, %v1375_v45  ;;  %v1451_v4 = vcombine.low %v1427_v52, %v1443_v53  ;;  %v1352_v5 = vcombine.high %v12741_v30, %v12744_v31  ;;  %v1368_v6 = vcombine.high %v12747_v32, %v12750_v33 }
 0x275   :  { %v12845_v46 = vrot.slane %v835_v55, %v12724_v43  ;;  %v12848_v47 = vrot.slane %v836_v58, %v12724_v43  ;;  %v12851_v48 = vrot.slane %v851_v1, %v12724_v43  ;;  %v12854_v50 = vrot.slane %v852_v2, %v12724_v43  ;;  %v12873_v19 = vpop.permute.xlu1 %443 }
 0x276   :  { %v11443_v30 = vpack.c.bf16 %v1451_v4, %v1383_v3  ;;  %v12863_v31 = vrot.slane %v1352_v5, %v12724_v43  ;;  %v12866_v32 = vrot.slane %v1368_v6, %v12724_v43  ;;  %v1420_v33 = vcombine.high %v12763_v61, %v12766_v62 }
 0x277   :  { %v1436_v8 = vcombine.high %v12769_v18, %v12772_v63  ;;  %v1384_v10 = vcombine.high %v1359_v44, %v1375_v45  ;;  %v1452_v21 = vcombine.high %v1427_v52, %v1443_v53  ;;  %v1267_v20 = vcombine.low %v12792_v29, %v1042_v42  ;;  %v12884_v18 = vpop.permute.xlu0 %431 }
 0x278   :  { %11445 = vmatprep.subr.msk.bf16.mxu1 %vm12858_vm1, %v11443_v30  ;;  %v1386_v41 = vcombine.high %v12863_v31, %v12866_v32  ;;  %v12880_v55 = vrot.slane %v1420_v33, %v12724_v43  ;;  %v1268_v61 = vcombine.high %v12792_v29, %v1042_v42  ;;  %v1199_v62 = vcombine.low %v12794_v34, %v1040_v54 }
 0x279   :  { %v12887_v63 = vrot.slane %v1436_v8, %v12724_v43  ;;  %11448 = vmatpush3.bf16.xpose.msk.msra.mxu1 %vm12858_vm1, %v11443_v30  ;;  %v12891_v44 = vpack.c.bf16 %v1452_v21, %v1384_v10  ;;  %v1275_v45 = vrot.slane %v1267_v20, %v12719_v35  ;;  %v1200_v52 = vcombine.high %v12794_v34, %v1040_v54  ;;  %v434_v30 = vpop.permute.xlu1 %433 }
 0x27a   :  { %v1282_v53 = vrot.slane %v1268_v61, %v12719_v35  ;;  %v1207_v29 = vrot.slane %v1199_v62, %v12719_v35  ;;  %v742_v42 = vrot.slane %v735_v37, %v12719_v35  ;;  %v750_v58 = vrot.slane %v10098_v38, %v12719_v35 }
 0x27b   :  { %v1454_v1 = vcombine.high %v12880_v55, %v12887_v63  ;;  %11451 = vmatprep.subr.msk.bf16.mxu1 %vm12858_vm1, %v12891_v44  ;;  %v1283_v34 = vcombine.low %v12821_v12, %v1275_v45  ;;  %v1284_v54 = vcombine.high %v12821_v12, %v1275_v45  ;;  %v1214_v2 = vrot.slane %v1200_v52, %v12719_v35  ;;  %v456_v10 = vpop.permute.xlu0 %455 }
 0x27c   :  { %v1299_v37 = vcombine.low %v12824_v17, %v1282_v53  ;;  %v1300_v3 = vcombine.high %v12824_v17, %v1282_v53  ;;  %v1215_v13 = vcombine.low %v12827_v27, %v1207_v29  ;;  %v1216_v14 = vcombine.high %v12827_v27, %v1207_v29 }
 0x27d   :  { %v11461_v38 = vpack.c.bf16 %v1454_v1, %v1386_v41  ;;  %v1291_v4 = vrot.slane %v1283_v34, %v12724_v43  ;;  %v1298_v5 = vrot.slane %v1284_v54, %v12724_v43  ;;  %v1231_v6 = vcombine.low %v12830_v28, %v1214_v2 }
 0x27e   :  { %v1307_v12 = vrot.slane %v1299_v37, %v12724_v43  ;;  %v1314_v33 = vrot.slane %v1300_v3, %v12724_v43  ;;  %v1223_v8 = vrot.slane %v1215_v13, %v12724_v43  ;;  %v1230_v17 = vrot.slane %v1216_v14, %v12724_v43 }
 0x27f   :  { %11463 = vmatprep.subr.msk.bf16.mxu0 %vm12858_vm1, %v11461_v38  ;;  %v1523_v27 = vcombine.low %v1291_v4, %v1298_v5  ;;  %v10112_v21 = vcombine.high %v1291_v4, %v1298_v5  ;;  %v1232_v20 = vcombine.high %v12830_v28, %v1214_v2  ;;  %v1239_v41 = vrot.slane %v1231_v6, %v12724_v43 }
 0x280   :  { %11466 = vmatpush3.bf16.xpose.msk.msra.mxu0 %vm12858_vm1, %v11461_v38  ;;  %v1539_v61 = vcombine.low %v1307_v12, %v1314_v33  ;;  %v10113_v62 = vcombine.high %v1307_v12, %v1314_v33  ;;  %v1455_v45 = vcombine.low %v1223_v8, %v1230_v17  ;;  %v10110_v52 = vcombine.high %v1223_v8, %v1230_v17  ;;  %v458_v38 = vpop.permute.xlu1 %457  ;;  %v446_v33 = vpop.permute.xlu0 %445 }
 0x281   :  { %v12931_v53 = vrot.slane %v1523_v27, %v12719_v35  ;;  %v12934_v29 = vrot.slane %v10112_v21, %v12719_v35  ;;  %v1246_v1 = vrot.slane %v1232_v20, %v12724_v43  ;;  %v758_v28 = vrot.slane %v751_v39, %v12719_v35 }
 0x282   :  { %v12942_v34 = vrot.slane %v1539_v61, %v12719_v35  ;;  %v12945_v54 = vrot.slane %v10113_v62, %v12719_v35  ;;  %v12948_v2 = vrot.slane %v1455_v45, %v12719_v35  ;;  %v12951_v37 = vrot.slane %v10110_v52, %v12719_v35 }
 0x283   :  { %v1471_v3 = vcombine.low %v1239_v41, %v1246_v1  ;;  %v10111_v13 = vcombine.high %v1239_v41, %v1246_v1  ;;  %v766_v14 = vrot.slane %v10099_v40, %v12719_v35  ;;  %v767_v39 = vcombine.low %v742_v42, %v750_v58 }
 0x284   :  { %v768_v4 = vcombine.high %v742_v42, %v750_v58  ;;  %v599_v5 = vcombine.low %v12678_v22, %v12873_v19  ;;  %v600_v6 = vcombine.high %v12678_v22, %v12873_v19  ;;  %v867_v12 = vcombine.low %v12845_v46, %v12851_v48 }
 0x285   :  { %v12964_v8 = vrot.slane %v1471_v3, %v12719_v35  ;;  %v12967_v17 = vrot.slane %v10111_v13, %v12719_v35  ;;  %v775_v15 = vrot.slane %v767_v39, %v12724_v43  ;;  %v783_v16 = vcombine.low %v758_v28, %v766_v14  ;;  %v1596_v13 = vpop.permute.xlu1 %1595 }
 0x286   :  { %v12971_v40 = vrot.slane %v768_v4, %v12724_v43  ;;  %v784_v42 = vcombine.high %v758_v28, %v766_v14  ;;  %v607_v58 = vrot.slane %v599_v5, %v12719_v35  ;;  %v614_v22 = vrot.slane %v600_v6, %v12719_v35 }
 0x287   :  { %v791_v19 = vrot.slane %v783_v16, %v12724_v43  ;;  %v870_v27 = vcombine.high %v12848_v47, %v12854_v50  ;;  %v1385_v21 = vcombine.low %v12863_v31, %v12866_v32  ;;  %v1453_v20 = vcombine.low %v12880_v55, %v12887_v63  ;;  %v12992_v63 = vpop.permute.xlu0 %1597 }
 0x288   :  { %v12983_v41 = vrot.slane %v784_v42, %v12724_v43  ;;  %v615_v61 = vcombine.low %v12884_v18, %v456_v10  ;;  %v616_v62 = vcombine.high %v12884_v18, %v456_v10  ;;  %v683_v45 = vcombine.low %v434_v30, %v458_v38 }
 0x289   :  { %v799_v52 = vcombine.low %v775_v15, %v791_v19  ;;  %v800_v1 = vcombine.high %v775_v15, %v791_v19  ;;  %v11455_v28 = vpack.c.bf16 %v1453_v20, %v1385_v21  ;;  %v684_v3 = vcombine.high %v434_v30, %v458_v38 }
 0x28a   :  { %v802_v14 = vcombine.high %v12971_v40, %v12983_v41  ;;  %v623_v31 = vrot.slane %v615_v61, %v12719_v35  ;;  %v630_v32 = vrot.slane %v616_v62, %v12719_v35  ;;  %v691_v55 = vrot.slane %v683_v45, %v12719_v35 }
 0x28b   :  { %10975 = vmatprep.mubr.msk.f32.mxu1 %vm2175_vm0, %v799_v52  ;;  %v698_v18 = vrot.slane %v684_v3, %v12719_v35  ;;  %v667_v10 = vcombine.low %v12688_v23, %v446_v33  ;;  %v668_v30 = vcombine.high %v12688_v23, %v446_v33  ;;  %v868_v39 = vcombine.high %v12845_v46, %v12851_v48  ;;  %v1620_v20 = vpop.permute.xlu0 %1619 }
 0x28c   :  { %10996 = vmatprep.mubr.msk.f32.mxu0 %vm2175_vm0, %v802_v14  ;;  %10976 = vmatmul.mubr.msk.f32.vlgmr.msra.gmra.mrb[8].mxu1 %vm2175_vm0, %v867_v12  ;;  %v631_v38 = vcombine.low %v607_v58, %v623_v31  ;;  %v632_v4 = vcombine.high %v607_v58, %v623_v31  ;;  %v647_v5 = vcombine.low %v614_v22, %v630_v32  ;;  %v1608_v58 = vpop.permute.xlu1 %1607 }
 0x28d   :  { %11454 = vmatpush3.bf16.xpose.msk.msra.mxu1 %vm12858_vm1, %v12891_v44  ;;  %10997 = vmatmul.mubr.msk.f32.vlgmr.msra.gmra.mrb[8].mxu0 %vm2175_vm0, %v870_v27  ;;  %v648_v6 = vcombine.high %v614_v22, %v630_v32  ;;  %v675_v15 = vrot.slane %v667_v10, %v12719_v35  ;;  %v682_v23 = vrot.slane %v668_v30, %v12719_v35 }
 0x28e   :  { %10982 = vmatprep.mubr.msk.f32.mxu1 %vm2175_vm0, %v800_v1  ;;  %11457 = vmatprep.subr.msk.bf16.mxu1 %vm12858_vm1, %v11455_v28  ;;  %v13012_v46 = vrot.slane %v631_v38, %v12724_v43  ;;  %v13015_v48 = vrot.slane %v632_v4, %v12724_v43  ;;  %v13018_v44 = vrot.slane %v647_v5, %v12724_v43 }
 0x28f   :  { %v13021_v12 = vrot.slane %v648_v6, %v12724_v43  ;;  %v699_v33 = vcombine.low %v675_v15, %v691_v55  ;;  %v700_v16 = vcombine.high %v675_v15, %v691_v55  ;;  %v715_v42 = vcombine.low %v682_v23, %v698_v18 }
 0x290   :  { %v871_v22 = vcombine.low %v13012_v46, %v13015_v48  ;;  %v10102_v19 = vcombine.high %v13012_v46, %v13015_v48  ;;  %v716_v27 = vcombine.high %v682_v23, %v698_v18  ;;  %v801_v21 = vcombine.low %v12971_v40, %v12983_v41 }
 0x291   :  { %v887_v61 = vcombine.low %v13018_v44, %v13021_v12  ;;  %v10103_v62 = vcombine.high %v13018_v44, %v13021_v12  ;;  %v707_v45 = vrot.slane %v699_v33, %v12724_v43  ;;  %v714_v52 = vrot.slane %v700_v16, %v12724_v43 }
 0x292   :  { %v723_v1 = vrot.slane %v715_v42, %v12724_v43  ;;  %v730_v3 = vrot.slane %v716_v27, %v12724_v43  ;;  %v1631_v14 = vcombine.low %v12700_v25, %v1608_v58  ;;  %v1632_v31 = vcombine.high %v12700_v25, %v1608_v58 }
 0x293   :  { %v939_v40 = vcombine.low %v707_v45, %v714_v52  ;;  %v10104_v41 = vcombine.high %v707_v45, %v714_v52  ;;  %v1647_v32 = vcombine.low %v1596_v13, %v1620_v20  ;;  %v1648_v55 = vcombine.high %v1596_v13, %v1620_v20 }
 0x294   :  { %v955_v18 = vcombine.low %v723_v1, %v730_v3  ;;  %v10105_v10 = vcombine.high %v723_v1, %v730_v3  ;;  %10983 = vmatmul.mubr.msk.f32.vlgmr.msra.gmra.mrb[10].mxu1 %vm2175_vm0, %v868_v39  ;;  %v1639_v30 = vrot.slane %v1631_v14, %v12719_v35  ;;  %v1646_v38 = vrot.slane %v1632_v31, %v12719_v35 }
 0x295   :  { %v13043_v4 = vrot.slane %v939_v40, %v12719_v35  ;;  %v13046_v5 = vrot.slane %v10104_v41, %v12719_v35  ;;  %11460 = vmatpush3.bf16.xpose.msk.msra.mxu1 %vm12858_vm1, %v11455_v28  ;;  %10989 = vmatprep.mubr.msk.f32.mxu1 %vm2175_vm0, %v801_v21  ;;  %v1655_v25 = vrot.slane %v1647_v32, %v12719_v35 }
 0x296   :  { %v13053_v13 = vrot.slane %v955_v18, %v12719_v35  ;;  %v13056_v39 = vrot.slane %v10105_v10, %v12719_v35  ;;  %v1662_v6 = vrot.slane %v1648_v55, %v12719_v35  ;;  %v1487_v15 = vcombine.low %v12948_v2, %v12951_v37  ;;  %v1610_v10 = vpop.permute.xlu1 %1609 }
 0x297   :  { %v971_v23 = vcombine.low %v13043_v4, %v13046_v5  ;;  %v972_v28 = vcombine.high %v13043_v4, %v13046_v5  ;;  %v1663_v33 = vcombine.low %v1639_v30, %v1655_v25  ;;  %v1664_v16 = vcombine.high %v1639_v30, %v1655_v25 }
 0x298   :  { %v987_v42 = vcombine.low %v13053_v13, %v13056_v39  ;;  %v988_v58 = vcombine.high %v13053_v13, %v13056_v39  ;;  %v1679_v27 = vcombine.low %v1646_v38, %v1662_v6  ;;  %v1680_v21 = vcombine.high %v1646_v38, %v1662_v6 }
 0x299   :  { %v13070_v20 = vrot.slane %v1663_v33, %v12724_v43  ;;  %v13073_v45 = vrot.slane %v1664_v16, %v12724_v43  ;;  %v1495_v52 = vrot.slane %v1487_v15, %v12724_v43  ;;  %v1503_v1 = vcombine.low %v12964_v8, %v12967_v17 }
 0x29a   :  { %v13079_v3 = vrot.slane %v1679_v27, %v12724_v43  ;;  %v13082_v14 = vrot.slane %v1680_v21, %v12724_v43  ;;  %v1555_v31 = vcombine.low %v12931_v53, %v12934_v29  ;;  %v1571_v40 = vcombine.low %v12942_v34, %v12945_v54 }
 0x29b   :  { %v1903_v41 = vcombine.low %v13070_v20, %v13073_v45  ;;  %v10114_v32 = vcombine.high %v13070_v20, %v13073_v45  ;;  %v1511_v55 = vrot.slane %v1503_v1, %v12724_v43  ;;  %v869_v18 = vcombine.low %v12848_v47, %v12854_v50 }
 0x29c   :  { %v1919_v30 = vcombine.low %v13079_v3, %v13082_v14  ;;  %v10115_v38 = vcombine.high %v13079_v3, %v13082_v14  ;;  %v1563_v25 = vrot.slane %v1555_v31, %v12724_v43  ;;  %v1579_v6 = vrot.slane %v1571_v40, %v12724_v43 }
 0x29d   :  { %v1519_v15 = vcombine.low %v1495_v52, %v1511_v55  ;;  %v1520_v33 = vcombine.high %v1495_v52, %v1511_v55  ;;  %10990 = vmatmul.mubr.msk.f32.vlgmr.msra.gmra.mrb[12].mxu1 %vm2175_vm0, %v869_v18  ;;  %v1488_v16 = vcombine.high %v12948_v2, %v12951_v37  ;;  %v1504_v47 = vcombine.high %v12964_v8, %v12967_v17 }
 0x29e   :  { %v1587_v50 = vcombine.low %v1563_v25, %v1579_v6  ;;  %v1588_v27 = vcombine.high %v1563_v25, %v1579_v6  ;;  %v1556_v21 = vcombine.high %v12931_v53, %v12934_v29  ;;  %v1572_v1 = vcombine.high %v12942_v34, %v12945_v54  ;;  %v1622_v54 = vpop.permute.xlu1 %1621 }
 0x29f   :  { %v1502_v31 = vrot.slane %v1488_v16, %v12724_v43  ;;  %v1518_v52 = vrot.slane %v1504_v47, %v12724_v43  ;;  %v1699_v40 = vcombine.low %v12698_v24, %v1610_v10  ;;  %v1700_v55 = vcombine.high %v12698_v24, %v1610_v10 }
 0x2a0   :  { %v11467_v2 = vpack.c.bf16 %v1587_v50, %v1519_v15  ;;  %v11473_v37 = vpack.c.bf16 %v1588_v27, %v1520_v33  ;;  %v1570_v8 = vrot.slane %v1556_v21, %v12724_v43  ;;  %v1586_v17 = vrot.slane %v1572_v1, %v12724_v43 }
 0x2a1   :  { %v1522_v18 = vcombine.high %v1502_v31, %v1518_v52  ;;  %v1707_v53 = vrot.slane %v1699_v40, %v12719_v35  ;;  %v1714_v29 = vrot.slane %v1700_v55, %v12719_v35  ;;  %v1521_v34 = vcombine.low %v1502_v31, %v1518_v52 }
 0x2a2   :  { %11469 = vmatprep.subr.msk.bf16.mxu1 %vm12858_vm1, %v11467_v2  ;;  %11475 = vmatprep.subr.msk.bf16.mxu0 %vm12858_vm1, %v11473_v37  ;;  %v1590_v24 = vcombine.high %v1570_v8, %v1586_v17  ;;  %v1589_v10 = vcombine.low %v1570_v8, %v1586_v17  ;;  %v878_v25 = vrot.slane %v871_v22, %v12719_v35 }
 0x2a3   :  { %11478 = vmatpush3.bf16.xpose.msk.msra.mxu0 %vm12858_vm1, %v11473_v37  ;;  %11472 = vmatpush3.bf16.xpose.msk.msra.mxu1 %vm12858_vm1, %v11467_v2  ;;  %v886_v6 = vrot.slane %v10102_v19, %v12719_v35  ;;  %v894_v15 = vrot.slane %v887_v61, %v12719_v35  ;;  %v902_v22 = vrot.slane %v10103_v62, %v12719_v35 }
 0x2a4   :  { %v11485_v33 = vpack.c.bf16 %v1590_v24, %v1522_v18  ;;  %v11479_v16 = vpack.c.bf16 %v1589_v10, %v1521_v34  ;;  %v1715_v47 = vcombine.low %v12992_v63, %v1622_v54  ;;  %v1716_v50 = vcombine.high %v12992_v63, %v1622_v54 }
 0x2a5   :  { %v903_v27 = vcombine.low %v878_v25, %v886_v6  ;;  %v919_v21 = vcombine.low %v894_v15, %v902_v22  ;;  %v979_v46 = vrot.slane %v971_v23, %v12724_v43  ;;  %v995_v48 = vrot.slane %v987_v42, %v12724_v43 }
 0x2a6   :  { %11487 = vmatprep.subr.msk.bf16.mxu0 %vm12858_vm1, %v11485_v33  ;;  %11481 = vmatprep.subr.msk.bf16.mxu1 %vm12858_vm1, %v11479_v16  ;;  %v1723_v44 = vrot.slane %v1715_v47, %v12719_v35  ;;  %v1730_v12 = vrot.slane %v1716_v50, %v12719_v35  ;;  %v904_v63 = vcombine.high %v878_v25, %v886_v6 }
 0x2a7   :  { %v911_v19 = vrot.slane %v903_v27, %v12724_v43  ;;  %v927_v61 = vrot.slane %v919_v21, %v12724_v43  ;;  %v1003_v62 = vcombine.low %v979_v46, %v995_v48  ;;  %v1004_v1 = vcombine.high %v979_v46, %v995_v48 }
 0x2a8   :  { %v1731_v23 = vcombine.low %v1707_v53, %v1723_v44  ;;  %v1732_v31 = vcombine.high %v1707_v53, %v1723_v44  ;;  %v1747_v42 = vcombine.low %v1714_v29, %v1730_v12  ;;  %v1748_v52 = vcombine.high %v1714_v29, %v1730_v12 }
 0x2a9   :  { %v935_v40 = vcombine.low %v911_v19, %v927_v61  ;;  %v936_v55 = vcombine.high %v911_v19, %v927_v61  ;;  %v918_v2 = vrot.slane %v904_v63, %v12724_v43  ;;  %v920_v37 = vcombine.high %v894_v15, %v902_v22 }
 0x2aa   :  { %v1739_v8 = vrot.slane %v1731_v23, %v12724_v43  ;;  %v1746_v17 = vrot.slane %v1732_v31, %v12724_v43  ;;  %v1755_v18 = vrot.slane %v1747_v42, %v12724_v43  ;;  %v1762_v34 = vrot.slane %v1748_v52, %v12724_v43 }
 0x2ab   :  { %11003 = vmatprep.mubr.msk.f32.mxu1 %vm2175_vm0, %v935_v40  ;;  %11010 = vmatprep.mubr.msk.f32.mxu0 %vm2175_vm0, %v936_v55  ;;  %v934_v53 = vrot.slane %v920_v37, %v12724_v43  ;;  %v986_v29 = vrot.slane %v972_v28, %v12724_v43  ;;  %v1002_v54 = vrot.slane %v988_v58, %v12724_v43 }
 0x2ac   :  { %v1971_v24 = vcombine.low %v1739_v8, %v1746_v17  ;;  %v10116_v10 = vcombine.high %v1739_v8, %v1746_v17  ;;  %v1987_v25 = vcombine.low %v1755_v18, %v1762_v34  ;;  %v10117_v6 = vcombine.high %v1755_v18, %v1762_v34  ;;  %11004 = vmatmul.mubr.msk.f32.vlgmr.msra.gmra.mrb[14].mxu1 %vm2175_vm0, %v1003_v62 }
 0x2ad   :  { %11011 = vmatmul.mubr.msk.f32.vlgmr.msra.gmra.mrb[10].mxu0 %vm2175_vm0, %v1004_v1  ;;  %11484 = vmatpush3.bf16.xpose.msk.msra.mxu1 %vm12858_vm1, %v11479_v16  ;;  %v937_v15 = vcombine.low %v918_v2, %v934_v53  ;;  %v938_v22 = vcombine.high %v918_v2, %v934_v53  ;;  %v1005_v4 = vcombine.low %v986_v29, %v1002_v54 }
 0x2ae   :  { %11490 = vmatpush3.bf16.xpose.msk.msra.mxu0 %vm12858_vm1, %v11485_v33  ;;  %v1006_v5 = vcombine.high %v986_v29, %v1002_v54  ;;  %v1910_v13 = vrot.slane %v1903_v41, %v12719_v35  ;;  %v1918_v39 = vrot.slane %v10114_v32, %v12719_v35  ;;  %v1926_v28 = vrot.slane %v1919_v30, %v12719_v35 }
 0x2af   :  { %11017 = vmatprep.mubr.msk.f32.mxu1 %vm2175_vm0, %v937_v15  ;;  %11024 = vmatprep.mubr.msk.f32.mxu0 %vm2175_vm0, %v938_v22  ;;  %v1934_v58 = vrot.slane %v10115_v38, %v12719_v35  ;;  %v1978_v41 = vrot.slane %v1971_v24, %v12719_v35  ;;  %v1986_v33 = vrot.slane %v10116_v10, %v12719_v35 }
 0x2b0   :  { %v1935_v20 = vcombine.low %v1910_v13, %v1918_v39  ;;  %v1994_v45 = vrot.slane %v1987_v25, %v12719_v35  ;;  %v2002_v32 = vrot.slane %v10117_v6, %v12719_v35  ;;  %v1936_v16 = vcombine.high %v1910_v13, %v1918_v39 }
 0x2b1   :  { %v1951_v30 = vcombine.low %v1926_v28, %v1934_v58  ;;  %v2003_v47 = vcombine.low %v1978_v41, %v1986_v33  ;;  %v1952_v50 = vcombine.high %v1926_v28, %v1934_v58  ;;  %v2004_v27 = vcombine.high %v1978_v41, %v1986_v33 }
 0x2b2   :  { %v1943_v21 = vrot.slane %v1935_v20, %v12724_v43  ;;  %v2019_v46 = vcombine.low %v1994_v45, %v2002_v32  ;;  %v1950_v3 = vrot.slane %v1936_v16, %v12724_v43  ;;  %v2020_v14 = vcombine.high %v1994_v45, %v2002_v32 }
 0x2b3   :  { %v1959_v38 = vrot.slane %v1951_v30, %v12724_v43  ;;  %v2011_v48 = vrot.slane %v2003_v47, %v12724_v43  ;;  %v1966_v44 = vrot.slane %v1952_v50, %v12724_v43  ;;  %v2018_v12 = vrot.slane %v2004_v27, %v12724_v43 }
 0x2b4   :  { %11018 = vmatmul.mubr.msk.f32.vlgmr.msra.gmra.mrb[16].mxu1 %vm2175_vm0, %v1005_v4  ;;  %v2027_v63 = vrot.slane %v2019_v46, %v12724_v43  ;;  %v2034_v19 = vrot.slane %v2020_v14, %v12724_v43 }
 0x2b5   :  { %11025 = vmatmul.mubr.msk.f32.vlgmr.msra.gmra.mrb[12].mxu0 %vm2175_vm0, %v1006_v5  ;;  %v1967_v61 = vcombine.low %v1943_v21, %v1959_v38  ;;  %v1969_v62 = vcombine.low %v1950_v3, %v1966_v44  ;;  %v1970_v1 = vcombine.high %v1950_v3, %v1966_v44  ;;  %v1968_v55 = vcombine.high %v1943_v21, %v1959_v38  ;;  %v13276_v38 = vpop.permute.xlu1 %1599 }
 0x2b6   :  { %v2035_v23 = vcombine.low %v2011_v48, %v2027_v63  ;;  %v2036_v31 = vcombine.high %v2011_v48, %v2027_v63  ;;  %v2037_v42 = vcombine.low %v2018_v12, %v2034_v19  ;;  %v2038_v52 = vcombine.high %v2018_v12, %v2034_v19 }
 0x2b8   :  { %v11491_v40 = vpack.c.bf16 %v2035_v23, %v1967_v61  ;;  %v13211_v2 = vpack.c.bf16 %v2037_v42, %v1969_v62  ;;  %v13213_v37 = vpack.c.bf16 %v2038_v52, %v1970_v1  ;;  %v13215_v8 = vpack.c.bf16 %v2036_v31, %v1968_v55 }
 0x2ba   :  { %11492 = vmatprep.subr.bf16.mxu1 %v11491_v40 }
 0x2bb   :  { %11494 = vmatpush3.bf16.msra.mxu1 %v11491_v40 }
 0x2bc   :  { %11496 = vmatprep.subr.bf16.mxu1 %v13215_v8 }
 0x35f   :  { %v10977_v17 = vpop.f32.mrb[8].mxu1 }
 0x360   :  { %v10998_v18 = vpop.f32.mrb[8].mxu0  ;;  %v13218_v34 = vpop.f32.mrb[9].mxu1  ;;  %v2876_v53 = vsel %vm2872_vm2, %v10977_v17, -inf }
 0x361   :  { %v2515_v29 = vpop.f32.mrb[9].mxu0  ;;  %v2894_v54 = vsel %vm2872_vm2, %v10998_v18, -inf  ;;  %2877 = vmax.xlane.f32.xlu1 %v2876_v53  ;;  %v2873_v10 = vsel %vm2872_vm2, %v13218_v34, -inf }
 0x362   :  { %2895 = vmax.xlane.f32.xlu0 %v2894_v54  ;;  %v2891_v24 = vsel %vm2872_vm2, %v2515_v29, -inf }
 0x365   :  { %2892 = vmax.xlane.f32.xlu1 %v2891_v24 }
 0x366   :  { %2874 = vmax.xlane.f32.xlu0 %v2873_v10 }
 0x367   :  { %v10984_v25 = vpop.f32.mrb[10].mxu1 }
 0x368   :  { %v13225_v6 = vpop.f32.mrb[11].mxu1  ;;  %v2882_v15 = vsel %vm2872_vm2, %v10984_v25, -inf }
 0x369   :  { %v2879_v41 = vsel %vm2872_vm2, %v13225_v6, -inf }
 0x36a   :  { %2883 = vmax.xlane.f32.xlu0 %v2882_v15 }
 0x370   :  { %v13228_v22 = vpop.f32.mrb[12].mxu1 }
 0x371   :  { %v13230_v4 = vpop.f32.mrb[13].mxu1  ;;  %v2888_v30 = vsel %vm2872_vm2, %v13228_v22, -inf }
 0x372   :  { %v2885_v47 = vsel %vm2872_vm2, %v13230_v4, -inf }
 0x376   :  { %1611 = vrot.lane.b32.xlu1 %v12714_v26, %s12273_s23 }
 0x37f   :  { %v13234_v5 = vpop.f32.mrb[14].mxu1 }
 0x380   :  { %v13236_v13 = vpop.f32.mrb[10].mxu0  ;;  %v13238_v39 = vpop.f32.mrb[15].mxu1  ;;  %v2900_v50 = vsel %vm2872_vm2, %v13234_v5, -inf }
 0x381   :  { %v13240_v28 = vpop.f32.mrb[11].mxu0  ;;  %v2906_v58 = vsel %vm2872_vm2, %v13236_v13, -inf  ;;  %v2897_v27 = vsel %vm2872_vm2, %v13238_v39, -inf }
 0x382   :  { %2907 = vmax.xlane.f32.xlu0 %v2906_v58  ;;  %v2903_v16 = vsel %vm2872_vm2, %v13240_v28, -inf }
 0x386   :  { %2880 = vmax.xlane.f32.xlu0 %v2879_v41 }
 0x387   :  { %v13246_v33 = vpop.f32.mrb[16].mxu1 }
 0x388   :  { %v13248_v20 = vpop.f32.mrb[12].mxu0  ;;  %v13250_v45 = vpop.f32.mrb[17].mxu1  ;;  %v2912_v21 = vsel %vm2872_vm2, %v13246_v33, -inf }
 0x389   :  { %v13252_v32 = vpop.f32.mrb[13].mxu0  ;;  %v2909_v46 = vsel %vm2872_vm2, %v13250_v45, -inf  ;;  %v2918_v3 = vsel %vm2872_vm2, %v13248_v20, -inf }
 0x38a   :  { %2904 = vmax.xlane.f32.xlu0 %v2903_v16  ;;  %v2915_v14 = vsel %vm2872_vm2, %v13252_v32, -inf }
 0x38e   :  { %2889 = vmax.xlane.f32.xlu0 %v2888_v30 }
 0x39a   :  { %2886 = vmax.xlane.f32.xlu1 %v2885_v47 }
 0x39e   :  { %2901 = vmax.xlane.f32.xlu1 %v2900_v50 }
 0x3a2   :  { %2898 = vmax.xlane.f32.xlu1 %v2897_v27 }
 0x3a4   :  { %1601 = vrot.lane.b32.xlu0 %v12639_v11, %s12274_s24 }
 0x3a6   :  { %2913 = vmax.xlane.f32.xlu1 %v2912_v21 }
 0x3aa   :  { %2910 = vmax.xlane.f32.xlu1 %v2909_v46 }
 0x3bb   :  { %1613 = vrot.lane.b32.xlu1 %v12639_v11, %s12273_s23 }
 0x3c3   :  { %2919 = vmax.xlane.f32.xlu0 %v2918_v3 }
 0x3c7   :  { %2916 = vmax.xlane.f32.xlu0 %v2915_v14 }
 0x3ee   :  { %v2878_v48 = vpop.xlane.xlu1 %2877 }
 0x3ef   :  { %v2922_v44 = vsub.f32 %v10977_v17, %v2878_v48  ;;  %v2896_v12 = vpop.xlane.xlu0 %2895 }
 0x3f0   :  { %v2928_v63 = vsub.f32 %v10998_v18, %v2896_v12 }
 0x3f1   :  { %v2939_v19 = vmul.f32 1.442695, %v2922_v44 }
 0x3f2   :  { %v2951_v61 = vmul.f32 1.442695, %v2928_v63  ;;  %v2893_v62 = vpop.xlane.xlu1 %2892 }
 0x3f3   :  { %12088 = vpow2.f32 %v2939_v19  ;;  %v2927_v1 = vsub.f32 %v2515_v29, %v2893_v62  ;;  %v2875_v23 = vpop.xlane.xlu0 %2874 }
 0x3f4   :  { %v2921_v31 = vsub.f32 %v13218_v34, %v2875_v23  ;;  %12090 = vpow2.f32 %v2951_v61 }
 0x3f5   :  { %v2949_v42 = vmul.f32 1.442695, %v2927_v1 }
 0x3f6   :  { %v2937_v52 = vmul.f32 1.442695, %v2921_v31  ;;  %v13311_v63 = vpop.permute.xlu1 %1611 }
 0x3f7   :  { %v2884_v40 = vpop.xlane.xlu0 %2883 }
 0x3f8   :  { %12092 = vpow2.f32 %v2937_v52  ;;  %v2924_v55 = vsub.f32 %v10984_v25, %v2884_v40 }
 0x3f9   :  { %12094 = vpow2.f32 %v2949_v42 }
 0x3fa   :  { %v2943_v53 = vmul.f32 1.442695, %v2924_v55 }
 0x3fc   :  { %12096 = vpow2.f32 %v2943_v53 }
 0x3fd   :  { %v13279_v54 = vpop.eup %12088 }
 0x3fe   :  { %v2972_v17 = vsel %vm2872_vm2, %v13279_v54, 0.0  ;;  %v13283_v18 = vpop.eup %12090 }
 0x3ff   :  { %2973 = vadd.xlane.f32.xlu0 %v2972_v17  ;;  %v2990_v34 = vsel %vm2872_vm2, %v13283_v18, 0.0 }
 0x402   :  { %v13285_v29 = vpop.eup %12092 }
 0x403   :  { %2991 = vadd.xlane.f32.xlu0 %v2990_v34  ;;  %v2969_v24 = vsel %vm2872_vm2, %v13285_v29, 0.0  ;;  %v13291_v10 = vpop.eup %12094 }
 0x404   :  { %2970 = vadd.xlane.f32.xlu1 %v2969_v24  ;;  %v2987_v25 = vsel %vm2872_vm2, %v13291_v10, 0.0 }
 0x406   :  { %v13295_v15 = vpop.eup %12096 }
 0x407   :  { %v2978_v58 = vsel %vm2872_vm2, %v13295_v15, 0.0 }
 0x408   :  { %2988 = vadd.xlane.f32.xlu1 %v2987_v25 }
 0x40c   :  { %2979 = vadd.xlane.f32.xlu1 %v2978_v58 }
 0x40f   :  { %v2908_v41 = vpop.xlane.xlu0 %2907 }
 0x410   :  { %v2932_v16 = vsub.f32 %v13236_v13, %v2908_v41 }
 0x412   :  { %v2959_v30 = vmul.f32 1.442695, %v2932_v16 }
 0x413   :  { %v2881_v47 = vpop.xlane.xlu0 %2880 }
 0x414   :  { %12098 = vpow2.f32 %v2959_v30  ;;  %v2923_v50 = vsub.f32 %v13225_v6, %v2881_v47 }
 0x416   :  { %v2941_v27 = vmul.f32 1.442695, %v2923_v50 }
 0x417   :  { %v2905_v21 = vpop.xlane.xlu0 %2904 }
 0x418   :  { %12100 = vpow2.f32 %v2941_v27  ;;  %v2931_v46 = vsub.f32 %v13240_v28, %v2905_v21 }
 0x41a   :  { %v2957_v3 = vmul.f32 1.442695, %v2931_v46 }
 0x41b   :  { %v2890_v14 = vpop.xlane.xlu0 %2889 }
 0x41c   :  { %12102 = vpow2.f32 %v2957_v3  ;;  %v2926_v48 = vsub.f32 %v13228_v22, %v2890_v14 }
 0x41d   :  { %1625 = vrot.lane.b32.xlu1 %v12639_v11, %s12275_s25 }
 0x41e   :  { %v13305_v44 = vpop.eup %12098  ;;  %v2947_v13 = vmul.f32 1.442695, %v2926_v48 }
 0x41f   :  { %v3002_v12 = vsel %vm2872_vm2, %v13305_v44, 0.0 }
 0x420   :  { %12104 = vpow2.f32 %v2947_v13  ;;  %3003 = vadd.xlane.f32.xlu0 %v3002_v12 }
 0x422   :  { %v13309_v6 = vpop.eup %12100 }
 0x423   :  { %v2975_v28 = vsel %vm2872_vm2, %v13309_v6, 0.0 }
 0x424   :  { %2976 = vadd.xlane.f32.xlu0 %v2975_v28 }
 0x426   :  { %v13315_v22 = vpop.eup %12102 }
 0x427   :  { %v2999_v19 = vsel %vm2872_vm2, %v13315_v22, 0.0  ;;  %v2887_v61 = vpop.xlane.xlu1 %2886 }
 0x428   :  { %3000 = vadd.xlane.f32.xlu0 %v2999_v19  ;;  %v2925_v62 = vsub.f32 %v13230_v4, %v2887_v61 }
 0x42a   :  { %v13320_v1 = vpop.eup %12104  ;;  %v2945_v23 = vmul.f32 1.442695, %v2925_v62 }
 0x42b   :  { %v2984_v31 = vsel %vm2872_vm2, %v13320_v1, 0.0  ;;  %v2902_v42 = vpop.xlane.xlu1 %2901 }
 0x42c   :  { %2985 = vadd.xlane.f32.xlu0 %v2984_v31  ;;  %12106 = vpow2.f32 %v2945_v23  ;;  %v2930_v52 = vsub.f32 %v13234_v5, %v2902_v42 }
 0x42e   :  { %v2955_v40 = vmul.f32 1.442695, %v2930_v52 }
 0x42f   :  { %v2899_v55 = vpop.xlane.xlu1 %2898 }
 0x430   :  { %v2929_v53 = vsub.f32 %v13238_v39, %v2899_v55  ;;  %12108 = vpow2.f32 %v2955_v40  ;;  %v1602_v39 = vpop.permute.xlu0 %1601 }
 0x432   :  { %v2953_v17 = vmul.f32 1.442695, %v2929_v53 }
 0x433   :  { %v2914_v16 = vpop.xlane.xlu1 %2913 }
 0x434   :  { %12110 = vpow2.f32 %v2953_v17  ;;  %v2934_v50 = vsub.f32 %v13246_v33, %v2914_v16 }
 0x436   :  { %v13326_v34 = vpop.eup %12106  ;;  %v2963_v46 = vmul.f32 1.442695, %v2934_v50 }
 0x437   :  { %v2981_v4 = vsel %vm2872_vm2, %v13326_v34, 0.0  ;;  %v2911_v21 = vpop.xlane.xlu1 %2910 }
 0x438   :  { %2982 = vadd.xlane.f32.xlu0 %v2981_v4  ;;  %v2933_v3 = vsub.f32 %v13250_v45, %v2911_v21 }
 0x43a   :  { %v13330_v24 = vpop.eup %12108  ;;  %v2961_v14 = vmul.f32 1.442695, %v2933_v3 }
 0x43b   :  { %v2996_v25 = vsel %vm2872_vm2, %v13330_v24, 0.0  ;;  %v1614_v62 = vpop.permute.xlu1 %1613 }
 0x43e   :  { %v13334_v58 = vpop.eup %12110 }
 0x43f   :  { %v2993_v5 = vsel %vm2872_vm2, %v13334_v58, 0.0 }
 0x441   :  { %2997 = vadd.xlane.f32.xlu1 %v2996_v25 }
 0x445   :  { %2994 = vadd.xlane.f32.xlu1 %v2993_v5 }
 0x44e   :  { %1623 = vrot.lane.b32.xlu0 %v12714_v26, %s12275_s25 }
 0x450   :  { %v2920_v41 = vpop.xlane.xlu0 %2919 }
 0x451   :  { %v2936_v48 = vsub.f32 %v13248_v20, %v2920_v41 }
 0x453   :  { %v2967_v12 = vmul.f32 1.442695, %v2936_v48 }
 0x454   :  { %v2917_v30 = vpop.xlane.xlu0 %2916 }
 0x455   :  { %v2935_v47 = vsub.f32 %v13252_v32, %v2917_v30 }
 0x457   :  { %v2965_v27 = vmul.f32 1.442695, %v2935_v47  ;;  %v1836_v47 = vcombine.high %v12639_v11, %v1614_v62 }
 0x459   :  { %12112 = vpow2.f32 %v2965_v27  ;;  %v1850_v48 = vrot.slane %v1836_v47, %v12719_v35 }
 0x45a   :  { %12114 = vpow2.f32 %v2963_v46 }
 0x45b   :  { %12116 = vpow2.f32 %v2961_v14 }
 0x45c   :  { %12118 = vpow2.f32 %v2967_v12 }
 0x463   :  { %v13344_v13 = vpop.eup %12112 }
 0x464   :  { %v3011_v28 = vsel %vm2872_vm2, %v13344_v13, 0.0  ;;  %v13348_v33 = vpop.eup %12114 }
 0x465   :  { %3012 = vadd.xlane.f32.xlu1 %v3011_v28  ;;  %v3008_v32 = vsel %vm2872_vm2, %v13348_v33, 0.0  ;;  %v13352_v19 = vpop.eup %12116 }
 0x466   :  { %v3005_v20 = vsel %vm2872_vm2, %v13352_v19, 0.0  ;;  %v13356_v45 = vpop.eup %12118 }
 0x467   :  { %v3014_v61 = vsel %vm2872_vm2, %v13356_v45, 0.0 }
 0x46d   :  { %3009 = vadd.xlane.f32.xlu0 %v3008_v32 }
 0x471   :  { %3006 = vadd.xlane.f32.xlu0 %v3005_v20 }
 0x475   :  { %3015 = vadd.xlane.f32.xlu0 %v3014_v61 }
 0x48c   :  { %v2974_v23 = vpop.xlane.xlu0 %2973 }
 0x48d   :  { %12120 = vrcp.f32 %v2974_v23 }
 0x490   :  { %v2992_v17 = vpop.xlane.xlu0 %2991 }
 0x491   :  { %v2971_v31 = vpop.xlane.xlu1 %2970 }
 0x492   :  { %12122 = vrcp.f32 %v2971_v31 }
 0x495   :  { %v2989_v53 = vpop.xlane.xlu1 %2988 }
 0x497   :  { %v12121_v42 = vpop.eup %12120 }
 0x498   :  { %v3020_v55 = vmul.f32 %v12121_v42, %v13279_v54  ;;  %v1767_v42 = vcombine.low %v12714_v26, %v13311_v63 }
 0x499   :  { %v2980_v25 = vpop.xlane.xlu1 %2979 }
 0x49a   :  { %12124 = vrcp.f32 %v2980_v25 }
 0x49c   :  { %v12123_v52 = vpop.eup %12122 }
 0x49d   :  { %v3018_v40 = vmul.f32 %v12123_v52, %v13285_v29  ;;  %v1626_v41 = vpop.permute.xlu1 %1625  ;;  %v1835_v29 = vcombine.low %v12639_v11, %v1614_v62 }
 0x49e   :  { %v1851_v16 = vcombine.low %v1602_v39, %v1626_v41  ;;  %v1852_v54 = vcombine.high %v1602_v39, %v1626_v41 }
 0x49f   :  { %11031 = vmatprep.mubr.msk.f32.mxu1 %vm2872_vm2, %v3018_v40  ;;  %v1843_v21 = vrot.slane %v1835_v29, %v12719_v35 }
 0x4a0   :  { %11032 = vmatmul.mubr.msk.f32.vlgmr.msra.gmra.mrb[18].mxu1 %vm2872_vm2, %v3020_v55  ;;  %v1859_v50 = vrot.slane %v1851_v16, %v12719_v35  ;;  %v1866_v46 = vrot.slane %v1852_v54, %v12719_v35  ;;  %v1775_v16 = vrot.slane %v1767_v42, %v12719_v35 }
 0x4a1   :  { %11498 = vmatpush3.bf16.msra.mxu1 %v13215_v8 }
 0x4a2   :  { %11500 = vmatprep.subr.bf16.mxu1 %v13211_v2  ;;  %v1867_v12 = vcombine.low %v1843_v21, %v1859_v50  ;;  %v1868_v28 = vcombine.high %v1843_v21, %v1859_v50  ;;  %v1883_v11 = vcombine.low %v1850_v48, %v1866_v46  ;;  %v1884_v39 = vcombine.high %v1850_v48, %v1866_v46 }
 0x4a4   :  { %v12125_v30 = vpop.eup %12124  ;;  %v1875_v20 = vrot.slane %v1867_v12, %v12724_v43  ;;  %v1898_v61 = vrot.slane %v1884_v39, %v12724_v43 }
 0x4a5   :  { %v3024_v14 = vmul.f32 %v12125_v30, %v13295_v15  ;;  %v1891_v15 = vrot.slane %v1883_v11, %v12724_v43 }
 0x4a7   :  { %v2123_v52 = vcombine.low %v1891_v15, %v1898_v61  ;;  %v10121_v40 = vcombine.high %v1891_v15, %v1898_v61 }
 0x4ad   :  { %v3004_v4 = vpop.xlane.xlu0 %3003 }
 0x4b1   :  { %v2977_v5 = vpop.xlane.xlu0 %2976 }
 0x4b2   :  { %12126 = vrcp.f32 %v2977_v5 }
 0x4b5   :  { %v3001_v8 = vpop.xlane.xlu0 %3000 }
 0x4b9   :  { %v2986_v32 = vpop.xlane.xlu0 %2985 }
 0x4ba   :  { %12128 = vrcp.f32 %v2986_v32 }
 0x4bb   :  { %12130 = vrcp.f32 %v2989_v53 }
 0x4bc   :  { %v12127_v27 = vpop.eup %12126 }
 0x4bd   :  { %v3022_v3 = vmul.f32 %v12127_v27, %v13309_v6  ;;  %v1882_v6 = vrot.slane %v1868_v28, %v12724_v43 }
 0x4bf   :  { %11038 = vmatprep.mubr.msk.f32.mxu1 %vm2872_vm2, %v3022_v3  ;;  %v2107_v23 = vcombine.low %v1875_v20, %v1882_v6  ;;  %v10120_v31 = vcombine.high %v1875_v20, %v1882_v6 }
 0x4c0   :  { %11039 = vmatmul.mubr.msk.f32.vlgmr.msra.gmra.mrb[20].mxu1 %vm2872_vm2, %v3024_v14 }
 0x4c1   :  { %11502 = vmatpush3.bf16.msra.mxu1 %v13211_v2  ;;  %v1768_v2 = vcombine.high %v12714_v26, %v13311_v63  ;;  %v2114_v5 = vrot.slane %v2107_v23, %v12719_v35  ;;  %v2122_v41 = vrot.slane %v10120_v31, %v12719_v35  ;;  %v2130_v63 = vrot.slane %v2123_v52, %v12719_v35 }
 0x4c2   :  { %11504 = vmatprep.subr.bf16.mxu1 %v13213_v37 }
 0x4c3   :  { %v1782_v29 = vrot.slane %v1768_v2, %v12719_v35  ;;  %v2139_v46 = vcombine.low %v2114_v5, %v2122_v41  ;;  %v2140_v31 = vcombine.high %v2114_v5, %v2122_v41 }
 0x4c4   :  { %v12129_v30 = vpop.eup %12128 }
 0x4c5   :  { %v2983_v62 = vpop.xlane.xlu0 %2982  ;;  %v12131_v21 = vpop.eup %12130  ;;  %v3028_v39 = vmul.f32 %v12129_v30, %v13320_v1 }
 0x4c6   :  { %12132 = vrcp.f32 %v2983_v62  ;;  %v3030_v23 = vmul.f32 %v12131_v21, %v13291_v10  ;;  %v2147_v10 = vrot.slane %v2139_v46, %v12724_v43 }
 0x4c7   :  { %12134 = vrcp.f32 %v2992_v17  ;;  %v2138_v17 = vrot.slane %v10121_v40, %v12719_v35 }
 0x4c8   :  { %12136 = vrcp.f32 %v3001_v8 }
 0x4c9   :  { %v1624_v55 = vpop.permute.xlu0 %1623  ;;  %12138 = vrcp.f32 %v3004_v4  ;;  %v2155_v32 = vcombine.low %v2130_v63, %v2138_v17  ;;  %v2156_v42 = vcombine.high %v2130_v63, %v2138_v17 }
 0x4ca   :  { %v1783_v53 = vcombine.low %v13276_v38, %v1624_v55  ;;  %v1784_v25 = vcombine.high %v13276_v38, %v1624_v55 }
 0x4cc   :  { %v1791_v54 = vrot.slane %v1783_v53, %v12719_v35  ;;  %v1798_v26 = vrot.slane %v1784_v25, %v12719_v35  ;;  %v2163_v53 = vrot.slane %v2155_v32, %v12724_v43 }
 0x4ce   :  { %v1799_v47 = vcombine.low %v1775_v16, %v1791_v54  ;;  %v1800_v50 = vcombine.high %v1775_v16, %v1791_v54  ;;  %v1815_v38 = vcombine.low %v1782_v29, %v1798_v26  ;;  %v1816_v8 = vcombine.high %v1782_v29, %v1798_v26  ;;  %v2998_v27 = vpop.xlane.xlu1 %2997 }
 0x4cf   :  { %12140 = vrcp.f32 %v2998_v27  ;;  %v2154_v54 = vrot.slane %v2140_v31, %v12724_v43  ;;  %v2170_v26 = vrot.slane %v2156_v42, %v12724_v43 }
 0x4d0   :  { %v12133_v3 = vpop.eup %12132  ;;  %v1807_v14 = vrot.slane %v1799_v47, %v12724_v43  ;;  %v1814_v48 = vrot.slane %v1800_v50, %v12724_v43  ;;  %v1823_v12 = vrot.slane %v1815_v38, %v12724_v43  ;;  %v1830_v28 = vrot.slane %v1816_v8, %v12724_v43 }
 0x4d1   :  { %v3026_v11 = vmul.f32 %v12133_v3, %v13326_v34  ;;  %v12135_v20 = vpop.eup %12134  ;;  %v2171_v47 = vcombine.low %v2147_v10, %v2163_v53  ;;  %v2172_v38 = vcombine.high %v2147_v10, %v2163_v53  ;;  %v4308_v10 = vld [vmem:[%s15717_s6 + $0x28] sm:$0xff] }
 0x4d2   :  { %v2039_v6 = vcombine.low %v1807_v14, %v1814_v48  ;;  %v10118_v15 = vcombine.high %v1807_v14, %v1814_v48  ;;  %v2055_v4 = vcombine.low %v1823_v12, %v1830_v28  ;;  %v10119_v61 = vcombine.high %v1823_v12, %v1830_v28  ;;  %v2995_v62 = vpop.xlane.xlu1 %2994  ;;  %v12137_v2 = vpop.eup %12136 }
 0x4d3   :  { %12142 = vrcp.f32 %v2995_v62  ;;  %11045 = vmatprep.mubr.msk.f32.mxu1 %vm2872_vm2, %v3026_v11  ;;  %v3032_v55 = vmul.f32 %v12135_v20, %v13283_v18  ;;  %v3038_v29 = vmul.f32 %v12137_v2, %v13315_v22  ;;  %v12139_v30 = vpop.eup %12138  ;;  %v2173_v14 = vcombine.low %v2154_v54, %v2170_v26 }
 0x4d4   :  { %11046 = vmatmul.mubr.msk.f32.vlgmr.msra.gmra.mrb[22].mxu1 %vm2872_vm2, %v3028_v39  ;;  %v2046_v34 = vrot.slane %v2039_v6, %v12719_v35  ;;  %v2054_v1 = vrot.slane %v10118_v15, %v12719_v35  ;;  %v2062_v52 = vrot.slane %v2055_v4, %v12719_v35  ;;  %v2070_v40 = vrot.slane %v10119_v61, %v12719_v35 }
 0x4d5   :  { %11506 = vmatpush3.bf16.msra.mxu1 %v13213_v37  ;;  %11052 = vmatprep.mubr.msk.f32.mxu1 %vm2872_vm2, %v3030_v23  ;;  %v2174_v12 = vcombine.high %v2154_v54, %v2170_v26  ;;  %v3040_v20 = vmul.f32 %v12139_v30, %v13305_v44  ;;  %v4313_v26 = vld [vmem:[%s15717_s6 + $0x50] sm:$0xff] }
 0x4d6   :  { %v2071_v25 = vcombine.low %v2046_v34, %v2054_v1  ;;  %v2087_v5 = vcombine.low %v2062_v52, %v2070_v40  ;;  %v2072_v41 = vcombine.high %v2046_v34, %v2054_v1  ;;  %v2088_v16 = vcombine.high %v2062_v52, %v2070_v40  ;;  %v4303_v1 = vld [vmem:[%s15717_s6] sm:$0xff] }
 0x4d8   :  { %11053 = vmatmul.mubr.msk.f32.vlgmr.msra.gmra.mrb[24].mxu1 %vm2872_vm2, %v3032_v55  ;;  %v2079_v37 = vrot.slane %v2071_v25, %v12724_v43  ;;  %v2095_v18 = vrot.slane %v2087_v5, %v12724_v43  ;;  %v2086_v63 = vrot.slane %v2072_v41, %v12724_v43  ;;  %v2102_v17 = vrot.slane %v2088_v16, %v12724_v43  ;;  %v4307_v55 = vld [vmem:[%s15717_s6 + $0x20] sm:$0xff]  ;;  %v4309_v25 = vld [vmem:[%s15717_s6 + $0x30] sm:$0xff]  ;;  %v4310_v5 = vld [vmem:[%s15717_s6 + $0x38] sm:$0xff] }
 0x4d9   :  { %11066 = vmatprep.mubr.msk.f32.mxu1 %vm2872_vm2, %v3038_v29  ;;  %v12141_v27 = vpop.eup %12140  ;;  %v11531_v53 = vpack.c.bf16 %v4308_v10, %v4307_v55  ;;  %v11535_v41 = vpack.c.bf16 %v4310_v5, %v4309_v25  ;;  %v4311_v16 = vld [vmem:[%s15717_s6 + $0x40] sm:$0xff]  ;;  %v4312_v29 = vld [vmem:[%s15717_s6 + $0x48] sm:$0xff] }
 0x4da   :  { %v2103_v50 = vcombine.low %v2079_v37, %v2095_v18  ;;  %v2104_v22 = vcombine.high %v2079_v37, %v2095_v18  ;;  %v2105_v8 = vcombine.low %v2086_v63, %v2102_v17  ;;  %v2106_v21 = vcombine.high %v2086_v63, %v2102_v17  ;;  %v4314_v37 = vld [vmem:[%s15717_s6 + $0x58] sm:$0xff] }
 0x4db   :  { %v3036_v32 = vmul.f32 %v12141_v27, %v13330_v24  ;;  %v11539_v54 = vpack.c.bf16 %v4312_v29, %v4311_v16  ;;  %v11543_v18 = vpack.c.bf16 %v4314_v37, %v4313_v26 }
 0x4dc   :  { %v11507_v46 = vpack.c.bf16 %v2171_v47, %v2103_v50  ;;  %v11511_v3 = vpack.c.bf16 %v2172_v38, %v2104_v22  ;;  %v11515_v11 = vpack.c.bf16 %v2173_v14, %v2105_v8  ;;  %v11519_v39 = vpack.c.bf16 %v2174_v12, %v2106_v21 }
 0x4dd   :  { %v12143_v48 = vpop.eup %12142 }
 0x4de   :  { %11508 = vmatprep.subr.bf16.mxu0 %v11507_v46  ;;  %11512 = vmatprep.subr.bf16.mxu1 %v11511_v3  ;;  %v3034_v28 = vmul.f32 %v12143_v48, %v13334_v58 }
 0x4df   :  { %11510 = vmatpush3.bf16.msra.mxu0 %v11507_v46  ;;  %11514 = vmatpush3.bf16.msra.mxu1 %v11511_v3 }
 0x4e0   :  { %11059 = vmatprep.mubr.msk.f32.mxu0 %vm2872_vm2, %v3034_v28  ;;  %11516 = vmatprep.subr.bf16.mxu0 %v11515_v11 }
 0x4e1   :  { %11520 = vmatprep.subr.bf16.mxu1 %v11519_v39 }
 0x4e2   :  { %11060 = vmatmul.mubr.msk.f32.vlgmr.msra.gmra.mrb[14].mxu0 %vm2872_vm2, %v3036_v32  ;;  %11067 = vmatmul.mubr.msk.f32.vlgmr.msra.gmra.mrb[26].mxu1 %vm2872_vm2, %v3040_v20 }
 0x4e3   :  { %11518 = vmatpush3.bf16.msra.mxu0 %v11515_v11  ;;  %11522 = vmatpush3.bf16.msra.mxu1 %v11519_v39 }
 0x4f2   :  { %v3013_v6 = vpop.xlane.xlu1 %3012 }
 0x4f3   :  { %12144 = vrcp.f32 %v3013_v6 }
 0x4fa   :  { %v3010_v58 = vpop.xlane.xlu0 %3009 }
 0x4fb   :  { %12146 = vrcp.f32 %v3010_v58 }
 0x4fd   :  { %v12145_v15 = vpop.eup %12144 }
 0x4fe   :  { %v3046_v4 = vmul.f32 %v12145_v15, %v13344_v13  ;;  %v3007_v61 = vpop.xlane.xlu0 %3006 }
 0x4ff   :  { %12148 = vrcp.f32 %v3007_v61 }
 0x500   :  { %11080 = vmatprep.mubr.msk.f32.mxu1 %vm2872_vm2, %v3046_v4 }
 0x502   :  { %v3016_v24 = vpop.xlane.xlu0 %3015 }
 0x503   :  { %12150 = vrcp.f32 %v3016_v24 }
 0x505   :  { %v12147_v44 = vpop.eup %12146 }
 0x506   :  { %v3044_v31 = vmul.f32 %v12147_v44, %v13348_v33  ;;  %v4304_v33 = vld [vmem:[%s15717_s6 + $0x8] sm:$0xff] }
 0x507   :  { %v11523_v52 = vpack.c.bf16 %v4304_v33, %v4303_v1 }
 0x509   :  { %v12149_v62 = vpop.eup %12148  ;;  %11524 = vmatprep.subr.bf16.mxu0 %v11523_v52 }
 0x50a   :  { %v3042_v23 = vmul.f32 %v12149_v62, %v13352_v19  ;;  %v4305_v19 = vld [vmem:[%s15717_s6 + $0x10] sm:$0xff] }
 0x50c   :  { %11073 = vmatprep.mubr.msk.f32.mxu0 %vm2872_vm2, %v3042_v23 }
 0x50d   :  { %v12151_v42 = vpop.eup %12150  ;;  %11074 = vmatmul.mubr.msk.f32.vlgmr.msra.gmra.mrb[16].mxu0 %vm2872_vm2, %v3044_v31 }
 0x50e   :  { %v3048_v13 = vmul.f32 %v12151_v42, %v13356_v45  ;;  %v4306_v45 = vld [vmem:[%s15717_s6 + $0x18] sm:$0xff]  ;;  %11526 = vmatpush3.bf16.msra.mxu0 %v11523_v52 }
 0x50f   :  { %v11527_v40 = vpack.c.bf16 %v4306_v45, %v4305_v19 }
 0x510   :  { %11081 = vmatmul.mubr.msk.f32.vlgmr.msra.gmra.mrb[28].mxu1 %vm2872_vm2, %v3048_v13 }
 0x511   :  { %4632 = vmatprep.mubr.f32.mxu1 %v15734_v36  ;;  %11528 = vmatprep.subr.bf16.mxu0 %v11527_v40 }
 0x512   :  { %11530 = vmatpush3.bf16.msra.mxu0 %v11527_v40 }
 0x513   :  { %11532 = vmatprep.subr.bf16.mxu0 %v11531_v53 }
 0x516   :  { %11534 = vmatpush3.bf16.msra.mxu0 %v11531_v53 }
 0x517   :  { %11536 = vmatprep.subr.bf16.mxu0 %v11535_v41 }
 0x51a   :  { %11538 = vmatpush3.bf16.msra.mxu0 %v11535_v41 }
 0x51b   :  { %11540 = vmatprep.subr.bf16.mxu0 %v11539_v54 }
 0x51e   :  { %11542 = vmatpush3.bf16.msra.mxu0 %v11539_v54 }
 0x51f   :  { %11544 = vmatprep.subr.bf16.mxu0 %v11543_v18 }
 0x522   :  { %11546 = vmatpush3.bf16.msra.mxu0 %v11543_v18 }
 0x573   :  { %v11033_v2 = vpop.f32.mrb[18].mxu1 }
 0x574   :  { %v3121_v34 = vpop.f32.mrb[19].mxu1 }
 0x593   :  { %v11040_v63 = vpop.f32.mrb[20].mxu1 }
 0x594   :  { %v3202_v17 = vpop.f32.mrb[21].mxu1 }
 0x5a7   :  { %v11047_v30 = vpop.f32.mrb[22].mxu1 }
 0x5a8   :  { %v3765_v47 = vcombine.low %v11033_v2, %v11047_v30  ;;  %v3766_v50 = vcombine.high %v11033_v2, %v11047_v30  ;;  %v3283_v22 = vpop.f32.mrb[23].mxu1 }
 0x5a9   :  { %v3697_v38 = vcombine.low %v3121_v34, %v3283_v22  ;;  %v3698_v8 = vcombine.high %v3121_v34, %v3283_v22 }
 0x5aa   :  { %v3773_v12 = vrot.slane %v3765_v47, %v12719_v35  ;;  %v3780_v28 = vrot.slane %v3766_v50, %v12719_v35 }
 0x5ab   :  { %v11054_v27 = vpop.f32.mrb[24].mxu1  ;;  %v3705_v32 = vrot.slane %v3697_v38, %v12719_v35  ;;  %v3712_v20 = vrot.slane %v3698_v8, %v12719_v35 }
 0x5ac   :  { %v3781_v21 = vcombine.low %v11040_v63, %v11054_v27  ;;  %v3782_v46 = vcombine.high %v11040_v63, %v11054_v27  ;;  %v3364_v3 = vpop.f32.mrb[25].mxu1 }
 0x5ad   :  { %v3713_v14 = vcombine.low %v3202_v17, %v3364_v3  ;;  %v3714_v48 = vcombine.high %v3202_v17, %v3364_v3 }
 0x5ae   :  { %v3789_v11 = vrot.slane %v3781_v21, %v12719_v35  ;;  %v3796_v39 = vrot.slane %v3782_v46, %v12719_v35 }
 0x5af   :  { %v3721_v6 = vrot.slane %v3713_v14, %v12719_v35  ;;  %v3728_v58 = vrot.slane %v3714_v48, %v12719_v35 }
 0x5b0   :  { %v3797_v15 = vcombine.low %v3773_v12, %v3789_v11  ;;  %v3798_v4 = vcombine.high %v3773_v12, %v3789_v11  ;;  %v3813_v61 = vcombine.low %v3780_v28, %v3796_v39  ;;  %v3814_v24 = vcombine.high %v3780_v28, %v3796_v39 }
 0x5b1   :  { %v3729_v44 = vcombine.low %v3705_v32, %v3721_v6  ;;  %v3730_v62 = vcombine.high %v3705_v32, %v3721_v6  ;;  %v3745_v23 = vcombine.low %v3712_v20, %v3728_v58  ;;  %v3746_v31 = vcombine.high %v3712_v20, %v3728_v58 }
 0x5b2   :  { %v3805_v42 = vrot.slane %v3797_v15, %v12724_v43  ;;  %v3812_v13 = vrot.slane %v3798_v4, %v12724_v43  ;;  %v3821_v2 = vrot.slane %v3813_v61, %v12724_v43  ;;  %v3828_v34 = vrot.slane %v3814_v24, %v12724_v43  ;;  %v4315_v15 = vld [vmem:[%s15717_s6 + $0x60] sm:$0xff]  ;;  %v4316_v4 = vld [vmem:[%s15717_s6 + $0x68] sm:$0xff] }
 0x5b3   :  { %v3737_v1 = vrot.slane %v3729_v44, %v12724_v43  ;;  %v3744_v33 = vrot.slane %v3730_v62, %v12724_v43  ;;  %v3753_v19 = vrot.slane %v3745_v23, %v12724_v43  ;;  %v3760_v52 = vrot.slane %v3746_v31, %v12724_v43  ;;  %v4317_v23 = vld [vmem:[%s15717_s6 + $0x70] sm:$0xff]  ;;  %v4318_v31 = vld [vmem:[%s15717_s6 + $0x78] sm:$0xff] }
 0x5b4   :  { %v4037_v45 = vcombine.low %v3805_v42, %v3812_v13  ;;  %v10172_v40 = vcombine.high %v3805_v42, %v3812_v13  ;;  %v4053_v55 = vcombine.low %v3821_v2, %v3828_v34  ;;  %v10173_v10 = vcombine.high %v3821_v2, %v3828_v34 }
 0x5b5   :  { %v3969_v53 = vcombine.low %v3737_v1, %v3744_v33  ;;  %v10170_v25 = vcombine.high %v3737_v1, %v3744_v33  ;;  %v3985_v5 = vcombine.low %v3753_v19, %v3760_v52  ;;  %v10171_v41 = vcombine.high %v3753_v19, %v3760_v52  ;;  %v13490_v16 = vpop.f32.mrb[14].mxu0  ;;  %v13492_v29 = vpop.f32.mrb[26].mxu1 }
 0x5b6   :  { %v4044_v54 = vrot.slane %v4037_v45, %v12719_v35  ;;  %v4052_v26 = vrot.slane %v10172_v40, %v12719_v35  ;;  %v4060_v37 = vrot.slane %v4053_v55, %v12719_v35  ;;  %v4068_v18 = vrot.slane %v10173_v10, %v12719_v35  ;;  %v13498_v63 = vpop.f32.mrb[15].mxu0  ;;  %v13500_v17 = vpop.f32.mrb[27].mxu1 }
 0x5b7   :  { %v3976_v30 = vrot.slane %v3969_v53, %v12719_v35  ;;  %v3984_v47 = vrot.slane %v10170_v25, %v12719_v35  ;;  %v3992_v50 = vrot.slane %v3985_v5, %v12719_v35  ;;  %v4000_v22 = vrot.slane %v10171_v41, %v12719_v35 }
 0x5b8   :  { %v4070_v38 = vcombine.high %v4044_v54, %v4052_v26  ;;  %v4086_v8 = vcombine.high %v4060_v37, %v4068_v18  ;;  %v4069_v27 = vcombine.low %v4044_v54, %v4052_v26  ;;  %v4085_v21 = vcombine.low %v4060_v37, %v4068_v18 }
 0x5b9   :  { %v4002_v46 = vcombine.high %v3976_v30, %v3984_v47  ;;  %v4018_v3 = vcombine.high %v3992_v50, %v4000_v22  ;;  %v4001_v14 = vcombine.low %v3976_v30, %v3984_v47  ;;  %v4017_v48 = vcombine.low %v3992_v50, %v4000_v22 }
 0x5ba   :  { %v4084_v12 = vrot.slane %v4070_v38, %v12724_v43  ;;  %v4100_v28 = vrot.slane %v4086_v8, %v12724_v43  ;;  %v13509_v11 = vrot.slane %v4069_v27, %v12724_v43  ;;  %v13512_v39 = vrot.slane %v4085_v21, %v12724_v43 }
 0x5bb   :  { %v4016_v32 = vrot.slane %v4002_v46, %v12724_v43  ;;  %v4032_v20 = vrot.slane %v4018_v3, %v12724_v43  ;;  %v13517_v6 = vrot.slane %v4001_v14, %v12724_v43  ;;  %v13520_v58 = vrot.slane %v4017_v48, %v12724_v43 }
 0x5bc   :  { %v4103_v61 = vcombine.low %v4084_v12, %v4100_v28  ;;  %v4101_v24 = vcombine.low %v13509_v11, %v13512_v39  ;;  %v4102_v44 = vcombine.high %v13509_v11, %v13512_v39  ;;  %v4104_v62 = vcombine.high %v4084_v12, %v4100_v28 }
 0x5bd   :  { %v4035_v42 = vcombine.low %v4016_v32, %v4032_v20  ;;  %v4034_v13 = vcombine.high %v13517_v6, %v13520_v58  ;;  %v4033_v2 = vcombine.low %v13517_v6, %v13520_v58  ;;  %v4036_v34 = vcombine.high %v4016_v32, %v4032_v20 }
 0x5be   :  { %v11547_v1 = vpack.c.bf16 %v4316_v4, %v4315_v15  ;;  %v11551_v45 = vpack.c.bf16 %v4318_v31, %v4317_v23 }
 0x5bf   :  { %v12033_v33 = vpack.i.bf16 %v4103_v61, %v4035_v42  ;;  %v12028_v19 = vpack.i.bf16 %v4102_v44, %v4034_v13  ;;  %v12038_v52 = vpack.i.bf16 %v4104_v62, %v4036_v34 }
 0x5c0   :  { %11548 = vmatprep.subr.bf16.mxu0 %v11547_v1 }
 0x5c1   :  { %12034 = vrot.lane.b32.xlu0 %v12033_v33, %s12273_s23  ;;  %12029 = vrot.lane.b32.xlu1 %v12028_v19, %s12275_s25 }
 0x5c2   :  { %11550 = vmatpush3.bf16.msra.mxu0 %v11547_v1 }
 0x5c3   :  { %11552 = vmatprep.subr.bf16.mxu0 %v11551_v45 }
 0x5c5   :  { %12039 = vrot.lane.b32.xlu1 %v12038_v52, %s12274_s24 }
 0x5c6   :  { %11554 = vmatpush3.bf16.msra.mxu0 %v11551_v45 }
 0x5e0   :  { %v11075_v40 = vpop.f32.mrb[16].mxu0 }
 0x5e1   :  { %v3901_v55 = vcombine.low %v13490_v16, %v11075_v40  ;;  %v3902_v10 = vcombine.high %v13490_v16, %v11075_v40  ;;  %v3607_v53 = vpop.f32.mrb[17].mxu0 }
 0x5e2   :  { %v3833_v25 = vcombine.low %v13498_v63, %v3607_v53  ;;  %v3834_v5 = vcombine.high %v13498_v63, %v3607_v53 }
 0x5e3   :  { %v11082_v41 = vpop.f32.mrb[28].mxu1  ;;  %v3909_v47 = vrot.slane %v3901_v55, %v12719_v35  ;;  %v3916_v50 = vrot.slane %v3902_v10, %v12719_v35 }
 0x5e4   :  { %v3917_v54 = vcombine.low %v13492_v29, %v11082_v41  ;;  %v3918_v26 = vcombine.high %v13492_v29, %v11082_v41  ;;  %v3688_v37 = vpop.f32.mrb[29].mxu1  ;;  %v3841_v63 = vrot.slane %v3833_v25, %v12719_v35  ;;  %v3848_v38 = vrot.slane %v3834_v5, %v12719_v35 }
 0x5e5   :  { %v3849_v18 = vcombine.low %v13500_v17, %v3688_v37  ;;  %v3850_v30 = vcombine.high %v13500_v17, %v3688_v37 }
 0x5e6   :  { %v3925_v16 = vrot.slane %v3917_v54, %v12719_v35  ;;  %v3932_v22 = vrot.slane %v3918_v26, %v12719_v35 }
 0x5e7   :  { %v3857_v8 = vrot.slane %v3849_v18, %v12719_v35  ;;  %v3864_v29 = vrot.slane %v3850_v30, %v12719_v35 }
 0x5e8   :  { %v3933_v27 = vcombine.low %v3909_v47, %v3925_v16  ;;  %v3934_v21 = vcombine.high %v3909_v47, %v3925_v16  ;;  %v3949_v46 = vcombine.low %v3916_v50, %v3932_v22  ;;  %v3950_v17 = vcombine.high %v3916_v50, %v3932_v22 }
 0x5e9   :  { %v3865_v3 = vcombine.low %v3841_v63, %v3857_v8  ;;  %v3866_v14 = vcombine.high %v3841_v63, %v3857_v8  ;;  %v3881_v48 = vcombine.low %v3848_v38, %v3864_v29  ;;  %v3882_v12 = vcombine.high %v3848_v38, %v3864_v29 }
 0x5ea   :  { %v3941_v28 = vrot.slane %v3933_v27, %v12724_v43  ;;  %v3948_v32 = vrot.slane %v3934_v21, %v12724_v43  ;;  %v3957_v20 = vrot.slane %v3949_v46, %v12724_v43  ;;  %v3964_v15 = vrot.slane %v3950_v17, %v12724_v43 }
 0x5eb   :  { %v3873_v4 = vrot.slane %v3865_v3, %v12724_v43  ;;  %v3880_v61 = vrot.slane %v3866_v14, %v12724_v43  ;;  %v3889_v44 = vrot.slane %v3881_v48, %v12724_v43  ;;  %v3896_v62 = vrot.slane %v3882_v12, %v12724_v43 }
 0x5ec   :  { %v4173_v23 = vcombine.low %v3941_v28, %v3948_v32  ;;  %v10176_v31 = vcombine.high %v3941_v28, %v3948_v32  ;;  %v4189_v42 = vcombine.low %v3957_v20, %v3964_v15  ;;  %v10177_v13 = vcombine.high %v3957_v20, %v3964_v15 }
 0x5ed   :  { %v4105_v34 = vcombine.low %v3873_v4, %v3880_v61  ;;  %v10174_v1 = vcombine.high %v3873_v4, %v3880_v61  ;;  %v4121_v33 = vcombine.low %v3889_v44, %v3896_v62  ;;  %v10175_v19 = vcombine.high %v3889_v44, %v3896_v62 }
 0x5ee   :  { %v4180_v52 = vrot.slane %v4173_v23, %v12719_v35  ;;  %v4188_v45 = vrot.slane %v10176_v31, %v12719_v35  ;;  %v4196_v40 = vrot.slane %v4189_v42, %v12719_v35  ;;  %v4204_v55 = vrot.slane %v10177_v13, %v12719_v35 }
 0x5ef   :  { %v4112_v10 = vrot.slane %v4105_v34, %v12719_v35  ;;  %v4120_v53 = vrot.slane %v10174_v1, %v12719_v35  ;;  %v4128_v25 = vrot.slane %v4121_v33, %v12719_v35  ;;  %v4136_v5 = vrot.slane %v10175_v19, %v12719_v35 }
 0x5f0   :  { %v4206_v41 = vcombine.high %v4180_v52, %v4188_v45  ;;  %v4222_v54 = vcombine.high %v4196_v40, %v4204_v55  ;;  %v4205_v26 = vcombine.low %v4180_v52, %v4188_v45  ;;  %v4221_v37 = vcombine.low %v4196_v40, %v4204_v55 }
 0x5f1   :  { %v4138_v18 = vcombine.high %v4112_v10, %v4120_v53  ;;  %v4154_v30 = vcombine.high %v4128_v25, %v4136_v5  ;;  %v4137_v47 = vcombine.low %v4112_v10, %v4120_v53  ;;  %v4153_v50 = vcombine.low %v4128_v25, %v4136_v5 }
 0x5f2   :  { %v4220_v16 = vrot.slane %v4206_v41, %v12724_v43  ;;  %v4236_v22 = vrot.slane %v4222_v54, %v12724_v43  ;;  %v4213_v63 = vrot.slane %v4205_v26, %v12724_v43  ;;  %v4229_v38 = vrot.slane %v4221_v37, %v12724_v43 }
 0x5f3   :  { %v4152_v8 = vrot.slane %v4138_v18, %v12724_v43  ;;  %v4168_v29 = vrot.slane %v4154_v30, %v12724_v43  ;;  %v4145_v27 = vrot.slane %v4137_v47, %v12724_v43  ;;  %v4161_v21 = vrot.slane %v4153_v50, %v12724_v43  ;;  %v10178_v30 = vld [vmem:[%s15718_s7] ss:$0 sm:$0xff] }
 0x5f4   :  { %v4239_v46 = vcombine.low %v4220_v16, %v4236_v22  ;;  %v4237_v17 = vcombine.low %v4213_v63, %v4229_v38  ;;  %v4238_v3 = vcombine.high %v4213_v63, %v4229_v38  ;;  %v4240_v14 = vcombine.high %v4220_v16, %v4236_v22 }
 0x5f5   :  { %v4171_v48 = vcombine.low %v4152_v8, %v4168_v29  ;;  %v4170_v12 = vcombine.high %v4145_v27, %v4161_v21  ;;  %v4169_v28 = vcombine.low %v4145_v27, %v4161_v21  ;;  %v4172_v32 = vcombine.high %v4152_v8, %v4168_v29 }
 0x5f7   :  { %v12048_v20 = vpack.i.bf16 %v4239_v46, %v4171_v48  ;;  %v12043_v15 = vpack.i.bf16 %v4238_v3, %v4170_v12  ;;  %v12053_v4 = vpack.i.bf16 %v4240_v14, %v4172_v32  ;;  %v4482_v14 = vld [vmem:[%s15719_s8] sm:$0xff]  ;;  %v4484_v32 = vld [vmem:[%s15719_s8 + $0x10] sm:$0xff] }
 0x5f8   :  { %v4486_v48 = vld [vmem:[%s15719_s8 + $0x20] sm:$0xff] }
 0x5f9   :  { %12049 = vrot.lane.b32.xlu0 %v12048_v20, %s12273_s23  ;;  %12044 = vrot.lane.b32.xlu1 %v12043_v15, %s12275_s25  ;;  %v4488_v20 = vld [vmem:[%s15719_s8 + $0x30] sm:$0xff]  ;;  %v4491_v15 = vld [vmem:[%s15719_s8 + $0x48] sm:$0xff] }
 0x5fd   :  { %12054 = vrot.lane.b32.xlu1 %v12053_v4, %s12274_s24  ;;  %v11589_v4 = vpack.c.bf16 %v4488_v20, %v4484_v32  ;;  %v4518_v32 = vld [vmem:[%s15719_s8 + $0x120] sm:$0xff]  ;;  %v4516_v20 = vld [vmem:[%s15719_s8 + $0x110] sm:$0xff] }
 0x633   :  { %v12030_v61 = vpop.permute.xlu1 %12029  ;;  %v12035_v44 = vpop.permute.xlu0 %12034 }
 0x634   :  { %v12032_v62 = vunpack.i.h.bf16 %v12030_v61  ;;  %v12031_v23 = vunpack.i.l.bf16 %v12030_v61  ;;  %v12037_v31 = vunpack.i.h.bf16 %v12035_v44  ;;  %v12036_v42 = vunpack.i.l.bf16 %v12035_v44  ;;  %v4495_v61 = vld [vmem:[%s15719_s8 + $0x68] sm:$0xff]  ;;  %v4493_v44 = vld [vmem:[%s15719_s8 + $0x58] sm:$0xff] }
 0x636   :  { %v4289_v13 = vsel %vm2175_vm0, %v4033_v2, %v12031_v23  ;;  %v4290_v34 = vsel %vm2175_vm0, %v4101_v24, %v12032_v62  ;;  %v4497_v62 = vld [vmem:[%s15719_s8 + $0x78] sm:$0xff]  ;;  %v11559_v23 = vpack.c.bf16 %v4495_v61, %v4491_v15  ;;  %v4523_v61 = vld [vmem:[%s15719_s8 + $0x148] sm:$0xff] }
 0x637   :  { %v12040_v1 = vpop.permute.xlu1 %12039  ;;  %v4294_v52 = vsel %vm4293_vm3, %v4289_v13, %v12036_v42  ;;  %v4295_v45 = vsel %vm4293_vm3, %v4290_v34, %v12037_v31  ;;  %v11591_v31 = vpack.c.bf16 %v4497_v62, %v4493_v44  ;;  %v4490_v42 = vld [vmem:[%s15719_s8 + $0x40] sm:$0xff]  ;;  %v4492_v34 = vld [vmem:[%s15719_s8 + $0x50] sm:$0xff]  ;;  %v4527_v44 = vld [vmem:[%s15719_s8 + $0x168] sm:$0xff] }
 0x638   :  { %v12042_v33 = vunpack.i.h.bf16 %v12040_v1  ;;  %v12041_v19 = vunpack.i.l.bf16 %v12040_v1  ;;  %v4494_v13 = vld [vmem:[%s15719_s8 + $0x60] sm:$0xff] }
 0x639   :  { %v11561_v1 = vpack.c.bf16 %v4494_v13, %v4490_v42  ;;  %v4529_v42 = vld [vmem:[%s15719_s8 + $0x178] sm:$0xff]  ;;  %v4522_v13 = vld [vmem:[%s15719_s8 + $0x140] sm:$0xff] }
 0x63a   :  { %v4299_v40 = vsel %vm4298_vm4, %v4294_v52, %v12041_v19  ;;  %v4300_v6 = vsel %vm4298_vm4, %v4295_v45, %v12042_v33  ;;  %v4496_v33 = vld [vmem:[%s15719_s8 + $0x70] sm:$0xff]  ;;  %v4499_v19 = vld [vmem:[%s15719_s8 + $0x88] sm:$0xff] }
 0x63b   :  { %11115 = vmatprep.mubr.f32.mxu0 %v4299_v40  ;;  %v4503_v52 = vld [vmem:[%s15719_s8 + $0xa8] sm:$0xff]  ;;  %v11593_v45 = vpack.c.bf16 %v4496_v33, %v4492_v34  ;;  %v4524_v33 = vld [vmem:[%s15719_s8 + $0x150] sm:$0xff] }
 0x63c   :  { %11116 = vmatmul.mubr.f32.vlgmr.msra.gmra.mrb[18].mxu0 %v4300_v6  ;;  %v11563_v40 = vpack.c.bf16 %v4503_v52, %v4499_v19  ;;  %v4501_v6 = vld [vmem:[%s15719_s8 + $0x98] sm:$0xff]  ;;  %v4528_v19 = vld [vmem:[%s15719_s8 + $0x170] sm:$0xff] }
 0x66b   :  { %v12045_v58 = vpop.permute.xlu1 %12044  ;;  %v12050_v2 = vpop.permute.xlu0 %12049 }
 0x66c   :  { %v12047_v55 = vunpack.i.h.bf16 %v12045_v58  ;;  %v12046_v11 = vunpack.i.l.bf16 %v12045_v58  ;;  %v12052_v39 = vunpack.i.h.bf16 %v12050_v2  ;;  %v12051_v24 = vunpack.i.l.bf16 %v12050_v2  ;;  %v4505_v58 = vld [vmem:[%s15719_s8 + $0xb8] sm:$0xff]  ;;  %v4498_v2 = vld [vmem:[%s15719_s8 + $0x80] sm:$0xff] }
 0x66e   :  { %v4291_v10 = vsel %vm2175_vm0, %v4169_v28, %v12046_v11  ;;  %v4292_v53 = vsel %vm2175_vm0, %v4237_v17, %v12047_v55  ;;  %v11557_v28 = vpack.c.bf16 %v4486_v48, %v4482_v14  ;;  %v11595_v55 = vpack.c.bf16 %v4505_v58, %v4501_v6  ;;  %v4502_v11 = vld [vmem:[%s15719_s8 + $0xa0] sm:$0xff]  ;;  %v4521_v14 = vld [vmem:[%s15719_s8 + $0x138] sm:$0xff] }
 0x66f   :  { %v12055_v25 = vpop.permute.xlu1 %12054  ;;  %v4296_v54 = vsel %vm4293_vm3, %v4291_v10, %v12051_v24  ;;  %v4297_v26 = vsel %vm4293_vm3, %v4292_v53, %v12052_v39  ;;  %v4500_v39 = vld [vmem:[%s15719_s8 + $0x90] sm:$0xff]  ;;  %v11565_v10 = vpack.c.bf16 %v4502_v11, %v4498_v2  ;;  %v4533_v6 = vld [vmem:[%s15719_s8 + $0x198] sm:$0xff]  ;;  %v11609_v58 = vpack.c.bf16 %v4528_v19, %v4524_v33  ;;  %v4530_v11 = vld [vmem:[%s15719_s8 + $0x180] sm:$0xff] }
 0x670   :  { %v12057_v5 = vunpack.i.h.bf16 %v12055_v25  ;;  %v12056_v41 = vunpack.i.l.bf16 %v12055_v25  ;;  %v4504_v24 = vld [vmem:[%s15719_s8 + $0xb0] sm:$0xff]  ;;  %v4762_v33 = vld [vmem:[%s15721_s10] sm:$0xff]  ;;  %v4763_v19 = vld [vmem:[%s15721_s10 + $0x8] sm:$0xff] }
 0x671   :  { %v11597_v53 = vpack.c.bf16 %v4504_v24, %v4500_v39  ;;  %v4534_v39 = vld [vmem:[%s15719_s8 + $0x1a0] sm:$0xff] }
 0x672   :  { %v4301_v37 = vsel %vm4298_vm4, %v4296_v54, %v12056_v41  ;;  %v4302_v18 = vsel %vm4298_vm4, %v4297_v26, %v12057_v5 }
 0x673   :  { %11118 = vmatprep.mubr.f32.mxu0 %v4301_v37 }
 0x674   :  { %11119 = vmatmul.mubr.f32.gmra.mrb[20].mxu0 %v4302_v18 }
 0x675   :  { %4721 = vmatprep.mubr.f32.mxu0 %v15734_v36 }
 0x70f   :  { %v11117_v47 = vpop.f32.mrb[18].mxu0 }
 0x710   :  { %v4398_v50 = vadd.f32 %v11117_v47, %v10178_v30  ;;  %v4392_v16 = vpop.f32.mrb[19].mxu0  ;;  %v4507_v47 = vld [vmem:[%s15719_s8 + $0xc8] sm:$0xff] }
 0x711   :  { %v4393_v22 = vadd.f32 %v10178_v30, %v4392_v16  ;;  %v4509_v16 = vld [vmem:[%s15719_s8 + $0xd8] sm:$0xff] }
 0x712   :  { %v13611_v63 = vadd.f32 %v4398_v50, %v12592_v51  ;;  %v4487_v51 = vld [vmem:[%s15719_s8 + $0x28] sm:$0xff] }
 0x713   :  { %v13614_v38 = vadd.f32 %v4393_v22, %v12590_v49  ;;  %v4483_v49 = vld [vmem:[%s15719_s8 + $0x8] sm:$0xff] }
 0x714   :  { %4419 = vadd.xlane.f32.xlu1 %v13611_v63  ;;  %v11555_v3 = vpack.c.bf16 %v4487_v51, %v4483_v49  ;;  %v4511_v50 = vld [vmem:[%s15719_s8 + $0xe8] sm:$0xff]  ;;  %v4512_v49 = vld [vmem:[%s15719_s8 + $0xf0] sm:$0xff] }
 0x715   :  { %4417 = vadd.xlane.f32.xlu0 %v13614_v38  ;;  %v11567_v22 = vpack.c.bf16 %v4511_v50, %v4507_v47  ;;  %v4515_v51 = vld [vmem:[%s15719_s8 + $0x108] sm:$0xff]  ;;  %v4538_v50 = vld [vmem:[%s15719_s8 + $0x1c0] sm:$0xff] }
 0x716   :  { %11556 = vmatprep.subr.bf16.mxu1 %v11555_v3  ;;  %v4519_v3 = vld [vmem:[%s15719_s8 + $0x128] sm:$0xff] }
 0x717   :  { %11558 = vmatpush1.bf16.msra.mxu1 %v11557_v28  ;;  %v11571_v48 = vpack.c.bf16 %v4519_v3, %v4515_v51  ;;  %v4514_v28 = vld [vmem:[%s15719_s8 + $0x100] sm:$0xff] }
 0x718   :  { %11560 = vmatprep.subr.bf16.mxu1 %v11559_v23  ;;  %v11573_v15 = vpack.c.bf16 %v4518_v32, %v4514_v28  ;;  %v11575_v23 = vpack.c.bf16 %v4527_v44, %v4523_v61 }
 0x71b   :  { %11562 = vmatpush1.bf16.msra.mxu1 %v11561_v1  ;;  %v4526_v1 = vld [vmem:[%s15719_s8 + $0x160] sm:$0xff] }
 0x71c   :  { %11564 = vmatprep.subr.bf16.mxu1 %v11563_v40  ;;  %v11577_v52 = vpack.c.bf16 %v4526_v1, %v4522_v13  ;;  %v4535_v40 = vld [vmem:[%s15719_s8 + $0x1a8] sm:$0xff]  ;;  %v13858_v13 = vld [vmem:[%s15724_s13] ss:$0 sm:$0xff] }
 0x71f   :  { %11566 = vmatpush1.bf16.msra.mxu1 %v11565_v10  ;;  %v4532_v10 = vld [vmem:[%s15719_s8 + $0x190] sm:$0xff] }
 0x720   :  { %11568 = vmatprep.subr.bf16.mxu1 %v11567_v22 }
 0x747   :  { %v11120_v8 = vpop.f32.mrb[20].mxu0 }
 0x748   :  { %v4402_v29 = vpop.f32.mrb[21].mxu0  ;;  %v4408_v21 = vadd.f32 %v11120_v8, %v10178_v30  ;;  %v4510_v8 = vld [vmem:[%s15719_s8 + $0xe0] sm:$0xff] }
 0x749   :  { %v4403_v27 = vadd.f32 %v10178_v30, %v4402_v29 }
 0x74a   :  { %v13623_v17 = vadd.f32 %v4408_v21, %v12606_v57  ;;  %v4489_v57 = vld [vmem:[%s15719_s8 + $0x38] sm:$0xff]  ;;  %v4508_v21 = vld [vmem:[%s15719_s8 + $0xd0] sm:$0xff] }
 0x74b   :  { %v13619_v46 = vadd.f32 %v4403_v27, %v12604_v56  ;;  %v4485_v56 = vld [vmem:[%s15719_s8 + $0x18] sm:$0xff] }
 0x74c   :  { %v11587_v12 = vpack.c.bf16 %v4489_v57, %v4485_v56  ;;  %v11601_v56 = vpack.c.bf16 %v4512_v49, %v4508_v21  ;;  %v4517_v57 = vld [vmem:[%s15719_s8 + $0x118] sm:$0xff] }
 0x74d   :  { %4421 = vadd.xlane.f32.xlu0 %v13619_v46 }
 0x74e   :  { %11588 = vmatprep.subr.bf16.mxu0 %v11587_v12  ;;  %v11603_v12 = vpack.c.bf16 %v4521_v14, %v4517_v57 }
 0x74f   :  { %11590 = vmatpush1.bf16.msra.mxu0 %v11589_v4  ;;  %v4520_v4 = vld [vmem:[%s15719_s8 + $0x130] sm:$0xff] }
 0x750   :  { %11592 = vmatprep.subr.bf16.mxu0 %v11591_v31  ;;  %v11605_v62 = vpack.c.bf16 %v4520_v4, %v4516_v20  ;;  %v4525_v31 = vld [vmem:[%s15719_s8 + $0x158] sm:$0xff] }
 0x751   :  { %4423 = vadd.xlane.f32.xlu0 %v13623_v17  ;;  %v11607_v34 = vpack.c.bf16 %v4529_v42, %v4525_v31  ;;  %v13853_v42 = vld [vmem:[%s15723_s12] ss:$0 sm:$0xff] }
 0x753   :  { %11594 = vmatpush1.bf16.msra.mxu0 %v11593_v45  ;;  %v4531_v45 = vld [vmem:[%s15719_s8 + $0x188] sm:$0xff] }
 0x754   :  { %11596 = vmatprep.subr.bf16.mxu0 %v11595_v55  ;;  %v11579_v2 = vpack.c.bf16 %v4535_v40, %v4531_v45  ;;  %v4537_v55 = vld [vmem:[%s15719_s8 + $0x1b8] sm:$0xff]  ;;  %v4795_v45 = vld [vmem:[%s15721_s10 + $0x108] sm:$0xff] }
 0x755   :  { %v11611_v24 = vpack.c.bf16 %v4537_v55, %v4533_v6  ;;  %v4781_v40 = vld [vmem:[%s15721_s10 + $0x98] sm:$0xff]  ;;  %v4812_v6 = vld [vmem:[%s15721_s10 + $0x190] sm:$0xff] }
 0x757   :  { %11598 = vmatpush1.bf16.msra.mxu0 %v11597_v53  ;;  %v4536_v53 = vld [vmem:[%s15719_s8 + $0x1b0] sm:$0xff] }
 0x7a1   :  { %v4420_v25 = vpop.xlane.xlu1 %4419 }
 0x7a2   :  { %v4427_v5 = vmul.f32 0.0078125, %v4420_v25  ;;  %v4418_v41 = vpop.xlane.xlu0 %4417  ;;  %v4539_v25 = vld [vmem:[%s15719_s8 + $0x1c8] sm:$0xff] }
 0x7a3   :  { %v4426_v54 = vmul.f32 0.0078125, %v4418_v41  ;;  %v4541_v41 = vld [vmem:[%s15719_s8 + $0x1d8] sm:$0xff] }
 0x7a4   :  { %v13699_v26 = vsub.f32 %v13611_v63, %v4427_v5  ;;  %v4513_v63 = vld [vmem:[%s15719_s8 + $0xf8] sm:$0xff]  ;;  %v4543_v5 = vld [vmem:[%s15719_s8 + $0x1e8] sm:$0xff] }
 0x7a5   :  { %v13702_v37 = vsub.f32 %v13614_v38, %v4426_v54  ;;  %v4506_v38 = vld [vmem:[%s15719_s8 + $0xc0] sm:$0xff]  ;;  %v11599_v29 = vpack.c.bf16 %v4513_v63, %v4509_v16  ;;  %v4545_v54 = vld [vmem:[%s15719_s8 + $0x1f8] sm:$0xff]  ;;  %v11583_v47 = vpack.c.bf16 %v4543_v5, %v4539_v25  ;;  %v4540_v63 = vld [vmem:[%s15719_s8 + $0x1d0] sm:$0xff] }
 0x7a6   :  { %v4435_v18 = vmul.f32 %v13699_v26, %v13699_v26  ;;  %v11569_v27 = vpack.c.bf16 %v4510_v8, %v4506_v38  ;;  %v4542_v16 = vld [vmem:[%s15719_s8 + $0x1e0] sm:$0xff]  ;;  %v11615_v22 = vpack.c.bf16 %v4545_v54, %v4541_v41  ;;  %v4544_v38 = vld [vmem:[%s15719_s8 + $0x1f0] sm:$0xff]  ;;  %v4797_v41 = vld [vmem:[%s15721_s10 + $0x118] sm:$0xff] }
 0x7a7   :  { %v4434_v30 = vmul.f32 %v13702_v37, %v13702_v37  ;;  %11600 = vmatprep.subr.bf16.mxu0 %v11599_v29  ;;  %v11585_v8 = vpack.c.bf16 %v4542_v16, %v4538_v50  ;;  %v11617_v29 = vpack.c.bf16 %v4544_v38, %v4540_v63  ;;  %v4796_v5 = vld [vmem:[%s15721_s10 + $0x110] sm:$0xff]  ;;  %v4782_v54 = vld [vmem:[%s15721_s10 + $0xa0] sm:$0xff]  ;;  %v4767_v38 = vld [vmem:[%s15721_s10 + $0x28] sm:$0xff] }
 0x7a8   :  { %4440 = vadd.xlane.f32.xlu0 %v4435_v18  ;;  %11570 = vmatpush1.bf16.msra.mxu1 %v11569_v27  ;;  %v11581_v18 = vpack.c.bf16 %v4534_v39, %v4530_v11  ;;  %v11621_v11 = vpack.c.bf16 %v4763_v19, %v4762_v33  ;;  %v4766_v63 = vld [vmem:[%s15721_s10 + $0x20] sm:$0xff] }
 0x7a9   :  { %4438 = vadd.xlane.f32.xlu1 %v4434_v30  ;;  %11602 = vmatpush1.bf16.msra.mxu0 %v11601_v56  ;;  %v11613_v30 = vpack.c.bf16 %v4536_v53, %v4532_v10  ;;  %v4765_v10 = vld [vmem:[%s15721_s10 + $0x18] sm:$0xff] }
 0x7aa   :  { %11572 = vmatprep.subr.bf16.mxu1 %v11571_v48  ;;  %11604 = vmatprep.subr.bf16.mxu0 %v11603_v12  ;;  %v4778_v48 = vld [vmem:[%s15721_s10 + $0x80] sm:$0xff] }
 0x7ab   :  { %v4810_v12 = vld [vmem:[%s15721_s10 + $0x180] sm:$0xff] }
 0x7ac   :  { %11574 = vmatpush1.bf16.msra.mxu1 %v11573_v15 }
 0x7ad   :  { %11606 = vmatpush1.bf16.msra.mxu0 %v11605_v62  ;;  %11576 = vmatprep.subr.bf16.mxu1 %v11575_v23 }
 0x7ae   :  { %11608 = vmatprep.subr.bf16.mxu0 %v11607_v34 }
 0x7b0   :  { %11578 = vmatpush1.bf16.msra.mxu1 %v11577_v52  ;;  %v4794_v52 = vld [vmem:[%s15721_s10 + $0x100] sm:$0xff] }
 0x7b1   :  { %11610 = vmatpush1.bf16.msra.mxu0 %v11609_v58  ;;  %11580 = vmatprep.subr.bf16.mxu1 %v11579_v2  ;;  %v4813_v58 = vld [vmem:[%s15721_s10 + $0x198] sm:$0xff]  ;;  %v11653_v39 = vpack.c.bf16 %v4795_v45, %v4794_v52  ;;  %v4802_v52 = vld [vmem:[%s15721_s10 + $0x140] sm:$0xff]  ;;  %v4803_v45 = vld [vmem:[%s15721_s10 + $0x148] sm:$0xff] }
 0x7b2   :  { %11612 = vmatprep.subr.bf16.mxu0 %v11611_v24  ;;  %v4764_v24 = vld [vmem:[%s15721_s10 + $0x10] sm:$0xff]  ;;  %v11655_v25 = vpack.c.bf16 %v4813_v58, %v4812_v6  ;;  %v4821_v6 = vld [vmem:[%s15721_s10 + $0x1d8] sm:$0xff] }
 0x7b3   :  { %v11625_v16 = vpack.c.bf16 %v4765_v10, %v4764_v24 }
 0x7b4   :  { %11582 = vmatpush1.bf16.msra.mxu1 %v11581_v18  ;;  %v4783_v18 = vld [vmem:[%s15721_s10 + $0xa8] sm:$0xff] }
 0x7b5   :  { %11614 = vmatpush1.bf16.msra.mxu0 %v11613_v30  ;;  %11584 = vmatprep.subr.bf16.mxu1 %v11583_v47  ;;  %v4814_v30 = vld [vmem:[%s15721_s10 + $0x1a0] sm:$0xff]  ;;  %v4815_v47 = vld [vmem:[%s15721_s10 + $0x1a8] sm:$0xff] }
 0x7b6   :  { %11616 = vmatprep.subr.bf16.mxu0 %v11615_v22  ;;  %v11657_v22 = vpack.c.bf16 %v4797_v41, %v4796_v5  ;;  %v4790_v5 = vld [vmem:[%s15721_s10 + $0xe0] sm:$0xff]  ;;  %v4791_v41 = vld [vmem:[%s15721_s10 + $0xe8] sm:$0xff] }
 0x7b8   :  { %11586 = vmatpush1.bf16.msra.mxu1 %v11585_v8  ;;  %v11627_v8 = vpack.c.bf16 %v4783_v18, %v4782_v54  ;;  %v4822_v54 = vld [vmem:[%s15721_s10 + $0x1e0] sm:$0xff]  ;;  %v4823_v18 = vld [vmem:[%s15721_s10 + $0x1e8] sm:$0xff] }
 0x7b9   :  { %11618 = vmatpush1.bf16.msra.mxu0 %v11617_v29  ;;  %v11659_v29 = vpack.c.bf16 %v4815_v47, %v4814_v30 }
 0x7da   :  { %v4422_v27 = vpop.xlane.xlu0 %4421 }
 0x7db   :  { %v4428_v21 = vmul.f32 0.0078125, %v4422_v27  ;;  %v4798_v27 = vld [vmem:[%s15721_s10 + $0x120] sm:$0xff] }
 0x7dd   :  { %v13829_v49 = vsub.f32 %v13619_v46, %v4428_v21  ;;  %v4779_v46 = vld [vmem:[%s15721_s10 + $0x88] sm:$0xff] }
 0x7de   :  { %v4424_v51 = vpop.xlane.xlu0 %4423  ;;  %v11619_v28 = vpack.c.bf16 %v4779_v46, %v4778_v48  ;;  %v4799_v21 = vld [vmem:[%s15721_s10 + $0x128] sm:$0xff]  ;;  %v11629_v48 = vpack.c.bf16 %v4767_v38, %v4766_v63 }
 0x7df   :  { %v4429_v56 = vmul.f32 0.0078125, %v4424_v51  ;;  %v4436_v3 = vmul.f32 %v13829_v49, %v13829_v49  ;;  %v4784_v51 = vld [vmem:[%s15721_s10 + $0xb0] sm:$0xff]  ;;  %v11661_v46 = vpack.c.bf16 %v4799_v21, %v4798_v27 }
 0x7e0   :  { %11620 = vmatprep.subr.bf16.mxu1 %v11619_v28  ;;  %v4769_v28 = vld [vmem:[%s15721_s10 + $0x38] sm:$0xff] }
 0x7e1   :  { %4442 = vadd.xlane.f32.xlu1 %v4436_v3  ;;  %v13834_v57 = vsub.f32 %v13623_v17, %v4429_v56  ;;  %v4811_v17 = vld [vmem:[%s15721_s10 + $0x188] sm:$0xff]  ;;  %v4785_v56 = vld [vmem:[%s15721_s10 + $0xb8] sm:$0xff]  ;;  %v4816_v3 = vld [vmem:[%s15721_s10 + $0x1b0] sm:$0xff] }
 0x7e2   :  { %v11651_v32 = vpack.c.bf16 %v4811_v17, %v4810_v12  ;;  %v4768_v12 = vld [vmem:[%s15721_s10 + $0x30] sm:$0xff]  ;;  %v11631_v17 = vpack.c.bf16 %v4785_v56, %v4784_v51 }
 0x7e3   :  { %v4437_v14 = vmul.f32 %v13834_v57, %v13834_v57 }
 0x7e4   :  { %11652 = vmatprep.subr.bf16.mxu0 %v11651_v32 }
 0x7e5   :  { %4444 = vadd.xlane.f32.xlu0 %v4437_v14  ;;  %v4817_v14 = vld [vmem:[%s15721_s10 + $0x1b8] sm:$0xff] }
 0x7e6   :  { %v11663_v32 = vpack.c.bf16 %v4817_v14, %v4816_v3 }
 0x835   :  { %v4441_v20 = vpop.xlane.xlu0 %4440 }
 0x836   :  { %v4447_v15 = vmul.f32 0.0078125, %v4441_v20  ;;  %v4439_v4 = vpop.xlane.xlu1 %4438  ;;  %v4800_v20 = vld [vmem:[%s15721_s10 + $0x130] sm:$0xff] }
 0x837   :  { %v4446_v61 = vmul.f32 0.0078125, %v4439_v4  ;;  %v4786_v4 = vld [vmem:[%s15721_s10 + $0xc0] sm:$0xff] }
 0x838   :  { %v4451_v44 = vadd.f32 1e-05, %v4447_v15  ;;  %v4801_v15 = vld [vmem:[%s15721_s10 + $0x138] sm:$0xff] }
 0x839   :  { %v4450_v62 = vadd.f32 1e-05, %v4446_v61  ;;  %v4787_v61 = vld [vmem:[%s15721_s10 + $0xc8] sm:$0xff] }
 0x83a   :  { %12152 = vrsqrt.f32 %v4451_v44  ;;  %v4818_v44 = vld [vmem:[%s15721_s10 + $0x1c0] sm:$0xff]  ;;  %v11635_v33 = vpack.c.bf16 %v4787_v61, %v4786_v4  ;;  %v4824_v61 = vld [vmem:[%s15721_s10 + $0x1f0] sm:$0xff] }
 0x83b   :  { %12154 = vrsqrt.f32 %v4450_v62  ;;  %v4819_v62 = vld [vmem:[%s15721_s10 + $0x1c8] sm:$0xff] }
 0x83c   :  { %v11667_v19 = vpack.c.bf16 %v4819_v62, %v4818_v44  ;;  %v4825_v44 = vld [vmem:[%s15721_s10 + $0x1f8] sm:$0xff] }
 0x83d   :  { %v11679_v62 = vpack.c.bf16 %v4825_v44, %v4824_v61 }
 0x844   :  { %v12153_v23 = vpop.eup %12152 }
 0x845   :  { %v12155_v31 = vpop.eup %12154  ;;  %v4459_v1 = vmul.f32 %v12153_v23, %v13699_v26  ;;  %v4780_v26 = vld [vmem:[%s15721_s10 + $0x90] sm:$0xff]  ;;  %v11633_v23 = vpack.c.bf16 %v4769_v28, %v4768_v12  ;;  %v4775_v28 = vld [vmem:[%s15721_s10 + $0x68] sm:$0xff] }
 0x846   :  { %v4458_v34 = vmul.f32 %v12155_v31, %v13702_v37  ;;  %v11623_v53 = vpack.c.bf16 %v4781_v40, %v4780_v26  ;;  %v11665_v31 = vpack.c.bf16 %v4801_v15, %v4800_v20  ;;  %v4788_v26 = vld [vmem:[%s15721_s10 + $0xd0] sm:$0xff]  ;;  %v4793_v20 = vld [vmem:[%s15721_s10 + $0xf8] sm:$0xff] }
 0x847   :  { %v4469_v55 = vmul.f32 %v13853_v42, %v4459_v1  ;;  %v4771_v1 = vld [vmem:[%s15721_s10 + $0x48] sm:$0xff]  ;;  %v4820_v40 = vld [vmem:[%s15721_s10 + $0x1d0] sm:$0xff] }
 0x848   :  { %v4468_v37 = vmul.f32 %v13853_v42, %v4458_v34  ;;  %v4770_v34 = vld [vmem:[%s15721_s10 + $0x40] sm:$0xff]  ;;  %v11671_v10 = vpack.c.bf16 %v4821_v6, %v4820_v40 }
 0x849   :  { %v13920_v50 = vadd.f32 %v13858_v13, %v4469_v55  ;;  %v11637_v58 = vpack.c.bf16 %v4771_v1, %v4770_v34  ;;  %v11669_v55 = vpack.c.bf16 %v4803_v45, %v4802_v52  ;;  %v4808_v34 = vld [vmem:[%s15721_s10 + $0x170] sm:$0xff]  ;;  %v4546_v52 = vld [vmem:[%s15720_s9] sm:$0xf]  ;;  %v15733_v45 = vsub.s32 3, %v12615_v59 }
 0x84a   :  { %v13888_v2 = vadd.f32 %v13858_v13, %v4468_v37  ;;  %v4789_v37 = vld [vmem:[%s15721_s10 + $0xd8] sm:$0xff]  ;;  %v4555_v40 = vrot.slane %v4546_v52, %v12618_v60 }
 0x84b   :  { %v11639_v24 = vpack.c.bf16 %v4789_v37, %v4788_v26  ;;  %v4551_v26 = vrot.slane %v4546_v52, %v12635_v9  ;;  %v4559_v37 = vrot.slane %v4546_v52, %v12625_v0  ;;  %v4563_v6 = vrot.slane %v4546_v52, %v15733_v45 }
 0x84c   :  { %4633 = vmatmul.mubr.f32.vlgmr.msra.gmra.mrb[30].mxu1 %v13888_v2  ;;  %4722 = vmatmul.mubr.f32.vlgmr.msra.gmra.mrb[22].mxu0 %v13888_v2 }
 0x84d   :  { %4638 = vmatprep.mubr.f32.mxu1 %v15734_v36  ;;  %4727 = vmatprep.mubr.f32.mxu0 %v15734_v36 }
 0x84e   :  { %11622 = vmatpush3.bf16.msra.mxu1 %v11621_v11  ;;  %11654 = vmatpush3.bf16.msra.mxu0 %v11653_v39  ;;  %v4772_v11 = vld [vmem:[%s15721_s10 + $0x50] sm:$0xff]  ;;  %v4773_v39 = vld [vmem:[%s15721_s10 + $0x58] sm:$0xff] }
 0x84f   :  { %11624 = vmatprep.subr.bf16.mxu1 %v11623_v53  ;;  %11656 = vmatprep.subr.bf16.mxu0 %v11655_v25  ;;  %v4804_v53 = vld [vmem:[%s15721_s10 + $0x150] sm:$0xff]  ;;  %v4805_v25 = vld [vmem:[%s15721_s10 + $0x158] sm:$0xff]  ;;  %v11641_v30 = vpack.c.bf16 %v4773_v39, %v4772_v11 }
 0x850   :  { %4639 = vmatmul.mubr.f32.gmra.mrb[32].mxu1 %v13920_v50  ;;  %4728 = vmatmul.mubr.f32.gmra.mrb[24].mxu0 %v13920_v50  ;;  %v11673_v47 = vpack.c.bf16 %v4805_v25, %v4804_v53 }
 0x851   :  { %4644 = vmatprep.mubr.f32.mxu1 %v15734_v36  ;;  %4733 = vmatprep.mubr.f32.mxu0 %v15734_v36 }
 0x852   :  { %11626 = vmatpush3.bf16.msra.mxu1 %v11625_v16  ;;  %11658 = vmatpush3.bf16.msra.mxu0 %v11657_v22  ;;  %v11643_v16 = vpack.c.bf16 %v4791_v41, %v4790_v5  ;;  %v11675_v22 = vpack.c.bf16 %v4823_v18, %v4822_v54 }
 0x853   :  { %11628 = vmatprep.subr.bf16.mxu1 %v11627_v8  ;;  %11660 = vmatprep.subr.bf16.mxu0 %v11659_v29 }
 0x856   :  { %11630 = vmatpush3.bf16.msra.mxu1 %v11629_v48  ;;  %11662 = vmatpush3.bf16.msra.mxu0 %v11661_v46 }
 0x857   :  { %11632 = vmatprep.subr.bf16.mxu1 %v11631_v17  ;;  %11664 = vmatprep.subr.bf16.mxu0 %v11663_v32  ;;  %v4792_v32 = vld [vmem:[%s15721_s10 + $0xf0] sm:$0xff] }
 0x858   :  { %v11647_v4 = vpack.c.bf16 %v4793_v20, %v4792_v32 }
 0x85a   :  { %11634 = vmatpush3.bf16.msra.mxu1 %v11633_v23  ;;  %11666 = vmatpush3.bf16.msra.mxu0 %v11665_v31  ;;  %v4776_v23 = vld [vmem:[%s15721_s10 + $0x70] sm:$0xff]  ;;  %v4777_v31 = vld [vmem:[%s15721_s10 + $0x78] sm:$0xff] }
 0x85b   :  { %11636 = vmatprep.subr.bf16.mxu1 %v11635_v33  ;;  %11668 = vmatprep.subr.bf16.mxu0 %v11667_v19  ;;  %v11649_v1 = vpack.c.bf16 %v4777_v31, %v4776_v23  ;;  %v4809_v33 = vld [vmem:[%s15721_s10 + $0x178] sm:$0xff] }
 0x85c   :  { %v11681_v19 = vpack.c.bf16 %v4809_v33, %v4808_v34 }
 0x85e   :  { %11638 = vmatpush3.bf16.msra.mxu1 %v11637_v58  ;;  %11670 = vmatpush3.bf16.msra.mxu0 %v11669_v55 }
 0x85f   :  { %11640 = vmatprep.subr.bf16.mxu1 %v11639_v24  ;;  %11672 = vmatprep.subr.bf16.mxu0 %v11671_v10 }
 0x862   :  { %11642 = vmatpush3.bf16.msra.mxu1 %v11641_v30  ;;  %11674 = vmatpush3.bf16.msra.mxu0 %v11673_v47 }
 0x863   :  { %11644 = vmatprep.subr.bf16.mxu1 %v11643_v16  ;;  %11676 = vmatprep.subr.bf16.mxu0 %v11675_v22 }
 0x86e   :  { %v4443_v63 = vpop.xlane.xlu1 %4442 }
 0x86f   :  { %v4448_v38 = vmul.f32 0.0078125, %v4443_v63 }
 0x871   :  { %v4452_v8 = vadd.f32 1e-05, %v4448_v38 }
 0x872   :  { %v4445_v29 = vpop.xlane.xlu0 %4444 }
 0x873   :  { %12156 = vrsqrt.f32 %v4452_v8  ;;  %v4449_v27 = vmul.f32 0.0078125, %v4445_v29 }
 0x875   :  { %v4453_v21 = vadd.f32 1e-05, %v4449_v27 }
 0x877   :  { %12158 = vrsqrt.f32 %v4453_v21 }
 0x87d   :  { %v12157_v51 = vpop.eup %12156 }
 0x87e   :  { %v4460_v56 = vmul.f32 %v12157_v51, %v13829_v49 }
 0x880   :  { %v4470_v3 = vmul.f32 %v13853_v42, %v4460_v56 }
 0x881   :  { %v12159_v14 = vpop.eup %12158 }
 0x882   :  { %v14025_v48 = vadd.f32 %v13858_v13, %v4470_v3  ;;  %v4461_v46 = vmul.f32 %v12159_v14, %v13834_v57  ;;  %v4774_v57 = vld [vmem:[%s15721_s10 + $0x60] sm:$0xff] }
 0x883   :  { %v11645_v17 = vpack.c.bf16 %v4775_v28, %v4774_v57 }
 0x884   :  { %4645 = vmatmul.mubr.f32.gmra.mrb[34].mxu1 %v14025_v48  ;;  %4734 = vmatmul.mubr.f32.gmra.mrb[26].mxu0 %v14025_v48  ;;  %v4471_v12 = vmul.f32 %v13853_v42, %v4461_v46  ;;  %v4806_v42 = vld [vmem:[%s15721_s10 + $0x160] sm:$0xff] }
 0x885   :  { %4650 = vmatprep.mubr.f32.mxu1 %v15734_v36  ;;  %4739 = vmatprep.mubr.f32.mxu0 %v15734_v36 }
 0x886   :  { %v14034_v49 = vadd.f32 %v13858_v13, %v4471_v12  ;;  %v4807_v13 = vld [vmem:[%s15721_s10 + $0x168] sm:$0xff]  ;;  %11646 = vmatpush3.bf16.msra.mxu1 %v11645_v17 }
 0x887   :  { %v11677_v15 = vpack.c.bf16 %v4807_v13, %v4806_v42  ;;  %11648 = vmatprep.subr.bf16.mxu1 %v11647_v4 }
 0x888   :  { %4651 = vmatmul.mubr.f32.gmra.mrb[36].mxu1 %v14034_v49  ;;  %4740 = vmatmul.mubr.f32.gmra.mrb[28].mxu0 %v14034_v49 }
 0x889   :  { %11678 = vmatpush3.bf16.msra.mxu0 %v11677_v15 }
 0x88a   :  { %11680 = vmatprep.subr.bf16.mxu0 %v11679_v62  ;;  %11650 = vmatpush3.bf16.msra.mxu1 %v11649_v1 }
 0x88d   :  { %11682 = vmatpush3.bf16.msra.mxu0 %v11681_v19 }
 0x91f   :  { %v4634_v58 = vpop.f32.mrb[30].mxu1  ;;  %v4723_v55 = vpop.f32.mrb[22].mxu0 }
 0x920   :  { %v4635_v11 = vadd.f32 %v4634_v58, %v4551_v26  ;;  %v4724_v39 = vadd.f32 %v4723_v55, %v4559_v37  ;;  %v4636_v24 = vpop.f32.mrb[31].mxu1  ;;  %v4725_v10 = vpop.f32.mrb[23].mxu0 }
 0x921   :  { %v4637_v53 = vadd.f32 %v4636_v24, %v4555_v40  ;;  %v4726_v25 = vadd.f32 %v4725_v10, %v4563_v6 }
 0x922   :  { %v4746_v30 = vmax.f32 %v4635_v11, 0.0  ;;  %v4748_v47 = vmax.f32 %v4724_v39, 0.0 }
 0x923   :  { %v4747_v5 = vmax.f32 %v4637_v53, 0.0  ;;  %v4749_v41 = vmax.f32 %v4726_v25, 0.0  ;;  %v4640_v54 = vpop.f32.mrb[32].mxu1  ;;  %v4729_v18 = vpop.f32.mrb[24].mxu0 }
 0x924   :  { %v4641_v16 = vadd.f32 %v4640_v54, %v4551_v26  ;;  %v4730_v22 = vadd.f32 %v4729_v18, %v4559_v37  ;;  %v4642_v63 = vpop.f32.mrb[33].mxu1  ;;  %v4731_v38 = vpop.f32.mrb[25].mxu0 }
 0x925   :  { %v4643_v8 = vadd.f32 %v4642_v63, %v4555_v40  ;;  %v4732_v29 = vadd.f32 %v4731_v38, %v4563_v6  ;;  %4897 = vmatprep.mubr.f32.mxu1 %v4747_v5  ;;  %4982 = vmatprep.mubr.f32.mxu0 %v4749_v41 }
 0x926   :  { %4898 = vmatmul.mubr.f32.vlgmr.msra.gmra.mrb[38].mxu1 %v4746_v30  ;;  %4983 = vmatmul.mubr.f32.vlgmr.msra.gmra.mrb[30].mxu0 %v4748_v47  ;;  %v4750_v51 = vmax.f32 %v4641_v16, 0.0  ;;  %v4752_v56 = vmax.f32 %v4730_v22, 0.0 }
 0x927   :  { %v4751_v27 = vmax.f32 %v4643_v8, 0.0  ;;  %v4753_v21 = vmax.f32 %v4732_v29, 0.0 }
 0x929   :  { %4902 = vmatprep.mubr.f32.mxu1 %v4751_v27  ;;  %4987 = vmatprep.mubr.f32.mxu0 %v4753_v21 }
 0x92a   :  { %4903 = vmatmul.mubr.f32.gmra.mrb[40].mxu1 %v4750_v51  ;;  %4988 = vmatmul.mubr.f32.gmra.mrb[32].mxu0 %v4752_v56 }
 0x957   :  { %v4646_v3 = vpop.f32.mrb[34].mxu1  ;;  %v4735_v14 = vpop.f32.mrb[26].mxu0 }
 0x958   :  { %v4647_v46 = vadd.f32 %v4646_v3, %v4551_v26  ;;  %v4736_v12 = vadd.f32 %v4735_v14, %v4559_v37  ;;  %v4648_v57 = vpop.f32.mrb[35].mxu1  ;;  %v4737_v28 = vpop.f32.mrb[27].mxu0 }
 0x959   :  { %v4649_v42 = vadd.f32 %v4648_v57, %v4555_v40  ;;  %v4738_v17 = vadd.f32 %v4737_v28, %v4563_v6 }
 0x95a   :  { %v4754_v4 = vmax.f32 %v4647_v46, 0.0  ;;  %v4756_v61 = vmax.f32 %v4736_v12, 0.0 }
 0x95b   :  { %v4755_v13 = vmax.f32 %v4649_v42, 0.0  ;;  %v4757_v32 = vmax.f32 %v4738_v17, 0.0  ;;  %v4652_v20 = vpop.f32.mrb[36].mxu1  ;;  %v4741_v15 = vpop.f32.mrb[28].mxu0 }
 0x95c   :  { %v4653_v44 = vadd.f32 %v4652_v20, %v4551_v26  ;;  %v4742_v62 = vadd.f32 %v4741_v15, %v4559_v37  ;;  %v4654_v23 = vpop.f32.mrb[37].mxu1  ;;  %v4743_v31 = vpop.f32.mrb[29].mxu0  ;;  %v10191_v15 = vld [vmem:[%s15715_s4 + $0x1b8] sm:$0xff] }
 0x95d   :  { %v4655_v34 = vadd.f32 %v4654_v23, %v4555_v40  ;;  %v4744_v1 = vadd.f32 %v4743_v31, %v4563_v6  ;;  %4907 = vmatprep.mubr.f32.mxu1 %v4755_v13  ;;  %4992 = vmatprep.mubr.f32.mxu0 %v4757_v32  ;;  %v10181_v40 = vld [vmem:[%s15722_s11] ss:$0 sm:$0xff]  ;;  %v10185_v13 = vld [vmem:[%s15715_s4 + $0x188] sm:$0xff]  ;;  %v10190_v31 = vld [vmem:[%s15715_s4 + $0x1b0] sm:$0xff] }
 0x95e   :  { %4908 = vmatmul.mubr.f32.gmra.mrb[42].mxu1 %v4754_v4  ;;  %4993 = vmatmul.mubr.f32.gmra.mrb[34].mxu0 %v4756_v61  ;;  %v4758_v52 = vmax.f32 %v4653_v44, 0.0  ;;  %v4760_v58 = vmax.f32 %v4742_v62, 0.0  ;;  %v10188_v32 = vld [vmem:[%s15715_s4 + $0x1a0] sm:$0xff]  ;;  %v10194_v4 = vld [vmem:[%s15715_s4 + $0x1d0] sm:$0xff]  ;;  %v10189_v23 = vld [vmem:[%s15715_s4 + $0x1a8] sm:$0xff] }
 0x95f   :  { %v4759_v33 = vmax.f32 %v4655_v34, 0.0  ;;  %v4761_v19 = vmax.f32 %v4744_v1, 0.0  ;;  %v11683_v20 = vpack.c.bf16 %v10188_v32, %v10185_v13  ;;  %v11687_v44 = vpack.c.bf16 %v10194_v4, %v10191_v15  ;;  %v10186_v62 = vld [vmem:[%s15715_s4 + $0x190] sm:$0xff]  ;;  %v10193_v1 = vld [vmem:[%s15715_s4 + $0x1c8] sm:$0xff]  ;;  %v10224_v4 = vld [vmem:[%s15715_s4 + $0x2c0] sm:$0xff] }
 0x960   :  { %v11715_v34 = vpack.c.bf16 %v10189_v23, %v10186_v62  ;;  %v10213_v32 = vld [vmem:[%s15715_s4 + $0x268] sm:$0xff] }
 0x961   :  { %4912 = vmatprep.mubr.f32.mxu1 %v4759_v33  ;;  %4997 = vmatprep.mubr.f32.mxu0 %v4761_v19  ;;  %v10197_v33 = vld [vmem:[%s15715_s4 + $0x1e8] sm:$0xff]  ;;  %v10200_v19 = vld [vmem:[%s15715_s4 + $0x200] sm:$0xff] }
 0x962   :  { %4913 = vmatmul.mubr.f32.gmra.mrb[44].mxu1 %v4758_v52  ;;  %4998 = vmatmul.mubr.f32.gmra.mrb[36].mxu0 %v4760_v58  ;;  %v11689_v52 = vpack.c.bf16 %v10193_v1, %v10190_v31  ;;  %v10192_v58 = vld [vmem:[%s15715_s4 + $0x1c0] sm:$0xff]  ;;  %v10221_v15 = vld [vmem:[%s15715_s4 + $0x2a8] sm:$0xff] }
 0x963   :  { %5204 = vmatprep.mubr.f32.mxu1 %v15734_v36  ;;  %11684 = vmatprep.subr.bf16.mxu1 %v11683_v20  ;;  %v10217_v20 = vld [vmem:[%s15715_s4 + $0x288] sm:$0xff]  ;;  %v11707_v23 = vpack.c.bf16 %v10224_v4, %v10221_v15  ;;  %v10220_v31 = vld [vmem:[%s15715_s4 + $0x2a0] sm:$0xff] }
 0x964   :  { %11716 = vmatprep.subr.bf16.mxu0 %v11715_v34 }
 0x965   :  { %11718 = vmatpush3.bf16.msra.mxu0 %v11715_v34  ;;  %v10223_v34 = vld [vmem:[%s15715_s4 + $0x2b8] sm:$0xff] }
 0x9f9   :  { %v10627_v26 = vpop.f32.mrb[38].mxu1  ;;  %v10671_v37 = vpop.f32.mrb[30].mxu0 }
 0x9fa   :  { %v10628_v6 = vpop.f32.mrb[39].mxu1  ;;  %v10672_v55 = vpop.f32.mrb[31].mxu0 }
 0x9fb   :  { %v10629_v11 = vadd.f32 %v10628_v6, %v10627_v26  ;;  %v10673_v39 = vadd.f32 %v10672_v55, %v10671_v37  ;;  %v10195_v26 = vld [vmem:[%s15715_s4 + $0x1d8] sm:$0xff]  ;;  %v11691_v37 = vpack.c.bf16 %v10200_v19, %v10197_v33  ;;  %v10196_v6 = vld [vmem:[%s15715_s4 + $0x1e0] sm:$0xff]  ;;  %v10230_v19 = vld [vmem:[%s15715_s4 + $0x2f0] sm:$0xff] }
 0x9fc   :  { %v10199_v55 = vld [vmem:[%s15715_s4 + $0x1f8] sm:$0xff] }
 0x9fd   :  { %v4900_v24 = vadd.f32 %v10629_v11, %v10181_v40  ;;  %v10630_v10 = vpop.f32.mrb[40].mxu1  ;;  %v10674_v53 = vpop.f32.mrb[32].mxu0  ;;  %v11693_v11 = vpack.c.bf16 %v10199_v55, %v10196_v6  ;;  %v10227_v33 = vld [vmem:[%s15715_s4 + $0x2d8] sm:$0xff]  ;;  %v10229_v6 = vld [vmem:[%s15715_s4 + $0x2e8] sm:$0xff] }
 0x9fe   :  { %v10631_v25 = vpop.f32.mrb[41].mxu1  ;;  %v10675_v5 = vpop.f32.mrb[33].mxu0 }
 0x9ff   :  { %v4985_v41 = vadd.f32 %v10673_v39, %v4900_v24  ;;  %v10632_v54 = vadd.f32 %v10631_v25, %v10630_v10  ;;  %v10676_v18 = vadd.f32 %v10675_v5, %v10674_v53 }
 0xa01   :  { %v4905_v30 = vadd.f32 %v10632_v54, %v10181_v40  ;;  %v5003_v47 = vadd.f32 %v4985_v41, %v13888_v2 }
 0xa03   :  { %v4990_v16 = vadd.f32 %v10676_v18, %v4905_v30  ;;  %5009 = vadd.xlane.f32.xlu1 %v5003_v47  ;;  %v10203_v18 = vld [vmem:[%s15715_s4 + $0x218] sm:$0xff]  ;;  %v10206_v30 = vld [vmem:[%s15715_s4 + $0x230] sm:$0xff] }
 0xa05   :  { %v5004_v22 = vadd.f32 %v4990_v16, %v13920_v50  ;;  %v11695_v16 = vpack.c.bf16 %v10206_v30, %v10203_v18 }
 0xa07   :  { %5011 = vadd.xlane.f32.xlu0 %v5004_v22 }
 0xa31   :  { %v10633_v63 = vpop.f32.mrb[42].mxu1  ;;  %v10677_v38 = vpop.f32.mrb[34].mxu0 }
 0xa32   :  { %v10634_v8 = vpop.f32.mrb[43].mxu1  ;;  %v10678_v29 = vpop.f32.mrb[35].mxu0 }
 0xa33   :  { %v10635_v27 = vadd.f32 %v10634_v8, %v10633_v63  ;;  %v10679_v21 = vadd.f32 %v10678_v29, %v10677_v38  ;;  %v10202_v63 = vld [vmem:[%s15715_s4 + $0x210] sm:$0xff]  ;;  %v10205_v38 = vld [vmem:[%s15715_s4 + $0x228] sm:$0xff] }
 0xa34   :  { %v11697_v29 = vpack.c.bf16 %v10205_v38, %v10202_v63 }
 0xa35   :  { %v4910_v51 = vadd.f32 %v10635_v27, %v10181_v40  ;;  %v10636_v56 = vpop.f32.mrb[44].mxu1  ;;  %v10680_v3 = vpop.f32.mrb[36].mxu0  ;;  %v10209_v27 = vld [vmem:[%s15715_s4 + $0x248] sm:$0xff] }
 0xa36   :  { %v10637_v14 = vpop.f32.mrb[45].mxu1  ;;  %v10681_v46 = vpop.f32.mrb[37].mxu0 }
 0xa37   :  { %v4995_v12 = vadd.f32 %v10679_v21, %v4910_v51  ;;  %v10638_v57 = vadd.f32 %v10637_v14, %v10636_v56  ;;  %v10682_v28 = vadd.f32 %v10681_v46, %v10680_v3  ;;  %v10212_v21 = vld [vmem:[%s15715_s4 + $0x260] sm:$0xff]  ;;  %v10207_v3 = vld [vmem:[%s15715_s4 + $0x238] sm:$0xff] }
 0xa38   :  { %v10204_v51 = vld [vmem:[%s15715_s4 + $0x220] sm:$0xff]  ;;  %v11699_v56 = vpack.c.bf16 %v10212_v21, %v10209_v27  ;;  %v10211_v46 = vld [vmem:[%s15715_s4 + $0x258] sm:$0xff] }
 0xa39   :  { %v4915_v2 = vadd.f32 %v10638_v57, %v10181_v40  ;;  %v14090_v42 = vadd.f32 %v4995_v12, %v14025_v48  ;;  %v10184_v48 = vld [vmem:[%s15715_s4 + $0x180] sm:$0xff]  ;;  %v11719_v40 = vpack.c.bf16 %v10195_v26, %v10192_v58  ;;  %v11727_v12 = vpack.c.bf16 %v10207_v3, %v10204_v51  ;;  %v10225_v58 = vld [vmem:[%s15715_s4 + $0x2c8] sm:$0xff] }
 0xa3a   :  { %v10208_v14 = vld [vmem:[%s15715_s4 + $0x240] sm:$0xff]  ;;  %v11709_v26 = vpack.c.bf16 %v10223_v34, %v10220_v31 }
 0xa3b   :  { %v5000_v50 = vadd.f32 %v10682_v28, %v4915_v2  ;;  %5013 = vadd.xlane.f32.xlu1 %v14090_v42  ;;  %11720 = vmatprep.subr.bf16.mxu0 %v11719_v40  ;;  %v11701_v57 = vpack.c.bf16 %v10211_v46, %v10208_v14  ;;  %v10215_v28 = vld [vmem:[%s15715_s4 + $0x278] sm:$0xff]  ;;  %v10218_v2 = vld [vmem:[%s15715_s4 + $0x290] sm:$0xff] }
 0xa3c   :  { %11722 = vmatpush3.bf16.msra.mxu0 %v11719_v40  ;;  %v11703_v13 = vpack.c.bf16 %v10218_v2, %v10215_v28  ;;  %v10226_v40 = vld [vmem:[%s15715_s4 + $0x2d0] sm:$0xff] }
 0xa3d   :  { %v14094_v17 = vadd.f32 %v5000_v50, %v14034_v49  ;;  %v10187_v49 = vld [vmem:[%s15715_s4 + $0x198] sm:$0xff]  ;;  %v10210_v50 = vld [vmem:[%s15715_s4 + $0x250] sm:$0xff] }
 0xa3e   :  { %v11685_v61 = vpack.c.bf16 %v10187_v49, %v10184_v48  ;;  %v10214_v48 = vld [vmem:[%s15715_s4 + $0x270] sm:$0xff]  ;;  %v11731_v49 = vpack.c.bf16 %v10213_v32, %v10210_v50 }
 0xa3f   :  { %5015 = vadd.xlane.f32.xlu0 %v14094_v17  ;;  %v11705_v62 = vpack.c.bf16 %v10217_v20, %v10214_v48 }
 0xa40   :  { %11686 = vmatpush1.bf16.msra.mxu1 %v11685_v61  ;;  %v10216_v61 = vld [vmem:[%s15715_s4 + $0x280] sm:$0xff] }
 0xa41   :  { %11688 = vmatprep.subr.bf16.mxu1 %v11687_v44  ;;  %v10219_v44 = vld [vmem:[%s15715_s4 + $0x298] sm:$0xff] }
 0xa42   :  { %v11735_v1 = vpack.c.bf16 %v10219_v44, %v10216_v61 }
 0xa44   :  { %11690 = vmatpush1.bf16.msra.mxu1 %v11689_v52  ;;  %v10222_v52 = vld [vmem:[%s15715_s4 + $0x2b0] sm:$0xff] }
 0xa45   :  { %11692 = vmatprep.subr.bf16.mxu1 %v11691_v37  ;;  %v11711_v37 = vpack.c.bf16 %v10230_v19, %v10227_v33  ;;  %v11739_v55 = vpack.c.bf16 %v10225_v58, %v10222_v52 }
 0xa48   :  { %11694 = vmatpush1.bf16.msra.mxu1 %v11693_v11  ;;  %v10228_v11 = vld [vmem:[%s15715_s4 + $0x2e0] sm:$0xff] }
 0xa49   :  { %11696 = vmatprep.subr.bf16.mxu1 %v11695_v16 }
 0xa4c   :  { %11698 = vmatpush1.bf16.msra.mxu1 %v11697_v29 }
 0xa4d   :  { %11700 = vmatprep.subr.bf16.mxu1 %v11699_v56 }
 0xa50   :  { %11702 = vmatpush1.bf16.msra.mxu1 %v11701_v57 }
 0xa51   :  { %11704 = vmatprep.subr.bf16.mxu1 %v11703_v13 }
 0xa54   :  { %11706 = vmatpush1.bf16.msra.mxu1 %v11705_v62 }
 0xa55   :  { %11708 = vmatprep.subr.bf16.mxu1 %v11707_v23  ;;  %v10232_v23 = vld [vmem:[%s15716_s5 + $0x3] sm:$0x7] }
 0xa56   :  { %v5132_v31 = vrot.slane %v10232_v23, %v12618_v60 }
 0xa58   :  { %11710 = vmatpush1.bf16.msra.mxu1 %v11709_v26 }
 0xa59   :  { %11712 = vmatprep.subr.bf16.mxu1 %v11711_v37  ;;  %v5128_v37 = vrot.slane %v10232_v23, %v12635_v9 }
 0xa90   :  { %v5010_v39 = vpop.xlane.xlu1 %5009 }
 0xa91   :  { %v5017_v24 = vmul.f32 0.0078125, %v5010_v39  ;;  %v10231_v39 = vld [vmem:[%s15715_s4 + $0x2f8] sm:$0xff] }
 0xa93   :  { %v14145_v10 = vsub.f32 %v5003_v47, %v5017_v24  ;;  %v10198_v47 = vld [vmem:[%s15715_s4 + $0x1f0] sm:$0xff]  ;;  %v11713_v24 = vpack.c.bf16 %v10229_v6, %v10226_v40 }
 0xa94   :  { %v5012_v53 = vpop.xlane.xlu0 %5011 }
 0xa95   :  { %v5018_v25 = vmul.f32 0.0078125, %v5012_v53  ;;  %v5025_v5 = vmul.f32 %v14145_v10, %v14145_v10  ;;  %v11743_v53 = vpack.c.bf16 %v10231_v39, %v10228_v11  ;;  %11714 = vmatpush1.bf16.msra.mxu1 %v11713_v24 }
 0xa97   :  { %v14149_v41 = vsub.f32 %v5004_v22, %v5018_v25  ;;  %5029 = vadd.xlane.f32.xlu1 %v5025_v5  ;;  %v10201_v22 = vld [vmem:[%s15715_s4 + $0x208] sm:$0xff] }
 0xa98   :  { %v11723_v8 = vpack.c.bf16 %v10201_v22, %v10198_v47 }
 0xa99   :  { %v5026_v54 = vmul.f32 %v14149_v41, %v14149_v41 }
 0xa9a   :  { %11724 = vmatprep.subr.bf16.mxu0 %v11723_v8 }
 0xa9b   :  { %5031 = vadd.xlane.f32.xlu0 %v5026_v54  ;;  %11726 = vmatpush3.bf16.msra.mxu0 %v11723_v8 }
 0xa9c   :  { %11728 = vmatprep.subr.bf16.mxu0 %v11727_v12 }
 0xa9f   :  { %11730 = vmatpush3.bf16.msra.mxu0 %v11727_v12 }
 0xaa0   :  { %11732 = vmatprep.subr.bf16.mxu0 %v11731_v49 }
 0xaa3   :  { %11734 = vmatpush3.bf16.msra.mxu0 %v11731_v49 }
 0xaa4   :  { %11736 = vmatprep.subr.bf16.mxu0 %v11735_v1 }
 0xaa7   :  { %11738 = vmatpush3.bf16.msra.mxu0 %v11735_v1 }
 0xaa8   :  { %11740 = vmatprep.subr.bf16.mxu0 %v11739_v55 }
 0xaab   :  { %11742 = vmatpush3.bf16.msra.mxu0 %v11739_v55 }
 0xaac   :  { %11744 = vmatprep.subr.bf16.mxu0 %v11743_v53 }
 0xaaf   :  { %11746 = vmatpush3.bf16.msra.mxu0 %v11743_v53  ;;  %v5136_v53 = vrot.slane %v10232_v23, %v12625_v0 }
 0xac8   :  { %v5014_v25 = vpop.xlane.xlu1 %5013 }
 0xac9   :  { %v5019_v5 = vmul.f32 0.0078125, %v5014_v25 }
 0xacb   :  { %v5023_v54 = vsub.f32 %v14090_v42, %v5019_v5  ;;  %v10182_v42 = vld [vmem:[%s15725_s14] ss:$0 sm:$0xff] }
 0xacc   :  { %v5016_v18 = vpop.xlane.xlu0 %5015 }
 0xacd   :  { %v5020_v30 = vmul.f32 0.0078125, %v5016_v18  ;;  %v5027_v47 = vmul.f32 %v5023_v54, %v5023_v54 }
 0xacf   :  { %v5024_v16 = vsub.f32 %v14094_v17, %v5020_v30  ;;  %5033 = vadd.xlane.f32.xlu1 %v5027_v47  ;;  %v10183_v17 = vld [vmem:[%s15726_s15] ss:$0 sm:$0xff] }
 0xad1   :  { %v5028_v22 = vmul.f32 %v5024_v16, %v5024_v16 }
 0xad3   :  { %5035 = vadd.xlane.f32.xlu0 %v5028_v22 }
 0xb24   :  { %v5030_v63 = vpop.xlane.xlu1 %5029 }
 0xb25   :  { %v5037_v38 = vmul.f32 0.0078125, %v5030_v63 }
 0xb27   :  { %v5041_v8 = vadd.f32 1e-05, %v5037_v38 }
 0xb28   :  { %v5032_v29 = vpop.xlane.xlu0 %5031 }
 0xb29   :  { %12160 = vrsqrt.f32 %v5041_v8  ;;  %v5038_v27 = vmul.f32 0.0078125, %v5032_v29 }
 0xb2b   :  { %v5042_v21 = vadd.f32 1e-05, %v5038_v27 }
 0xb2d   :  { %12162 = vrsqrt.f32 %v5042_v21 }
 0xb33   :  { %v12161_v51 = vpop.eup %12160 }
 0xb34   :  { %v5049_v56 = vmul.f32 %v12161_v51, %v14145_v10 }
 0xb36   :  { %v5059_v3 = vmul.f32 %v10182_v42, %v5049_v56 }
 0xb37   :  { %v12163_v14 = vpop.eup %12162 }
 0xb38   :  { %v14258_v46 = vadd.f32 %v10183_v17, %v5059_v3  ;;  %v5050_v12 = vmul.f32 %v12163_v14, %v14149_v41 }
 0xb3a   :  { %5205 = vmatmul.mubr.f32.vlgmr.msra.gmra.mrb[46].mxu1 %v14258_v46  ;;  %11153 = vmatprep.mubr.f32.mxu0 %v14258_v46  ;;  %v5060_v57 = vmul.f32 %v10182_v42, %v5050_v12 }
 0xb3b   :  { %5210 = vmatprep.mubr.f32.mxu1 %v15734_v36 }
 0xb3c   :  { %v14264_v28 = vadd.f32 %v10183_v17, %v5060_v57 }
 0xb3e   :  { %5211 = vmatmul.mubr.f32.gmra.mrb[48].mxu1 %v14264_v28  ;;  %11154 = vmatmul.mubr.f32.vlgmr.msra.gmra.mrb[38].mxu0 %v14264_v28 }
 0xb3f   :  { %5216 = vmatprep.mubr.f32.mxu1 %v15734_v36 }
 0xb5c   :  { %v5034_v10 = vpop.xlane.xlu1 %5033 }
 0xb5d   :  { %v5039_v2 = vmul.f32 0.0078125, %v5034_v10 }
 0xb5f   :  { %v5043_v50 = vadd.f32 1e-05, %v5039_v2 }
 0xb60   :  { %v5036_v13 = vpop.xlane.xlu0 %5035 }
 0xb61   :  { %12164 = vrsqrt.f32 %v5043_v50  ;;  %v5040_v41 = vmul.f32 0.0078125, %v5036_v13 }
 0xb63   :  { %v5044_v32 = vadd.f32 1e-05, %v5040_v41 }
 0xb65   :  { %12166 = vrsqrt.f32 %v5044_v32 }
 0xb6b   :  { %v12165_v48 = vpop.eup %12164 }
 0xb6c   :  { %v5051_v20 = vmul.f32 %v12165_v48, %v5023_v54 }
 0xb6e   :  { %v5061_v49 = vmul.f32 %v10182_v42, %v5051_v20 }
 0xb6f   :  { %v12167_v15 = vpop.eup %12166 }
 0xb70   :  { %v14269_v4 = vadd.f32 %v10183_v17, %v5061_v49  ;;  %v5052_v61 = vmul.f32 %v12167_v15, %v5024_v16 }
 0xb72   :  { %5217 = vmatmul.mubr.f32.gmra.mrb[50].mxu1 %v14269_v4  ;;  %11156 = vmatprep.mubr.f32.mxu0 %v14269_v4  ;;  %v5062_v44 = vmul.f32 %v10182_v42, %v5052_v61 }
 0xb73   :  { %5222 = vmatprep.mubr.f32.mxu1 %v15734_v36 }
 0xb74   :  { %v14274_v62 = vadd.f32 %v10183_v17, %v5062_v44 }
 0xb76   :  { %5223 = vmatmul.mubr.f32.gmra.mrb[52].mxu1 %v14274_v62  ;;  %11157 = vmatmul.mubr.f32.gmra.mrb[40].mxu0 %v14274_v62 }
 0xc0d   :  { %v5206_v34 = vpop.f32.mrb[46].mxu1 }
 0xc0e   :  { %v5208_v1 = vpop.f32.mrb[47].mxu1  ;;  %v14295_v6 = vadd.f32 %v5206_v34, %v5128_v37 }
 0xc0f   :  { %v14282_v33 = vadd.f32 %v5208_v1, %v5132_v31 }
 0xc11   :  { %5902 = vrot.lane.b32.xlu1 %v14282_v33, %s12274_s24  ;;  %5926 = vrot.lane.b32.xlu0 %v14282_v33, %s12275_s25  ;;  %v5212_v19 = vpop.f32.mrb[48].mxu1  ;;  %v11155_v52 = vpop.f32.mrb[38].mxu0 }
 0xc12   :  { %v5214_v58 = vpop.f32.mrb[49].mxu1  ;;  %v5295_v26 = vpop.f32.mrb[39].mxu0  ;;  %v14305_v55 = vadd.f32 %v5212_v19, %v5128_v37  ;;  %v14350_v38 = vadd.f32 %v11155_v52, %v5136_v53 }
 0xc13   :  { %v14289_v40 = vadd.f32 %v5214_v58, %v5132_v31  ;;  %v14356_v8 = vadd.f32 %v5295_v26, %v5136_v53 }
 0xc15   :  { %5914 = vrot.lane.b32.xlu1 %v14282_v33, %s12273_s23  ;;  %5904 = vrot.lane.b32.xlu0 %v14289_v40, %s12274_s24 }
 0xc19   :  { %5916 = vrot.lane.b32.xlu1 %v14289_v40, %s12273_s23  ;;  %5318 = vrot.lane.b32.xlu0 %v14295_v6, %s12274_s24 }
 0xc1d   :  { %5928 = vrot.lane.b32.xlu1 %v14289_v40, %s12275_s25  ;;  %5342 = vrot.lane.b32.xlu0 %v14295_v6, %s12275_s25 }
 0xc21   :  { %5330 = vrot.lane.b32.xlu1 %v14295_v6, %s12273_s23  ;;  %5332 = vrot.lane.b32.xlu0 %v14305_v55, %s12273_s23 }
 0xc25   :  { %5320 = vrot.lane.b32.xlu1 %v14305_v55, %s12274_s24 }
 0xc29   :  { %5344 = vrot.lane.b32.xlu1 %v14305_v55, %s12275_s25 }
 0xc45   :  { %v5218_v11 = vpop.f32.mrb[50].mxu1 }
 0xc46   :  { %v5220_v39 = vpop.f32.mrb[51].mxu1  ;;  %v14336_v63 = vadd.f32 %v5218_v11, %v5128_v37 }
 0xc47   :  { %v14315_v24 = vadd.f32 %v5220_v39, %v5132_v31 }
 0xc49   :  { %5906 = vrot.lane.b32.xlu0 %v14315_v24, %s12274_s24  ;;  %v5224_v25 = vpop.f32.mrb[52].mxu1  ;;  %v11158_v5 = vpop.f32.mrb[40].mxu0 }
 0xc4a   :  { %v14320_v54 = vadd.f32 %v5224_v25, %v5128_v37  ;;  %v14322_v18 = vadd.f32 %v11158_v5, %v5136_v53  ;;  %v5226_v30 = vpop.f32.mrb[53].mxu1  ;;  %v5305_v47 = vpop.f32.mrb[41].mxu0 }
 0xc4b   :  { %v14324_v16 = vadd.f32 %v5226_v30, %v5132_v31  ;;  %v14326_v22 = vadd.f32 %v5305_v47, %v5136_v53 }
 0xc4d   :  { %5918 = vrot.lane.b32.xlu0 %v14315_v24, %s12273_s23  ;;  %5908 = vrot.lane.b32.xlu1 %v14324_v16, %s12274_s24 }
 0xc51   :  { %5930 = vrot.lane.b32.xlu0 %v14315_v24, %s12275_s25  ;;  %5920 = vrot.lane.b32.xlu1 %v14324_v16, %s12273_s23 }
 0xc55   :  { %5322 = vrot.lane.b32.xlu0 %v14336_v63, %s12274_s24  ;;  %5932 = vrot.lane.b32.xlu1 %v14324_v16, %s12275_s25 }
 0xc59   :  { %5346 = vrot.lane.b32.xlu0 %v14336_v63, %s12275_s25  ;;  %5334 = vrot.lane.b32.xlu1 %v14336_v63, %s12273_s23 }
 0xc5d   :  { %5336 = vrot.lane.b32.xlu0 %v14320_v54, %s12273_s23  ;;  %5324 = vrot.lane.b32.xlu1 %v14320_v54, %s12274_s24 }
 0xc61   :  { %6488 = vrot.lane.b32.xlu0 %v14350_v38, %s12274_s24  ;;  %5348 = vrot.lane.b32.xlu1 %v14320_v54, %s12275_s25 }
 0xc65   :  { %6510 = vrot.lane.b32.xlu0 %v14356_v8, %s12275_s25  ;;  %6486 = vrot.lane.b32.xlu1 %v14356_v8, %s12274_s24 }
 0xc69   :  { %6498 = vrot.lane.b32.xlu1 %v14356_v8, %s12273_s23 }
 0xc6d   :  { %6500 = vrot.lane.b32.xlu1 %v14350_v38, %s12273_s23 }
 0xc83   :  { %v5903_v29 = vpop.permute.xlu1 %5902  ;;  %v5927_v27 = vpop.permute.xlu0 %5926 }
 0xc84   :  { %v5954_v21 = vcombine.low %v5903_v29, %v5927_v27  ;;  %v5955_v51 = vcombine.high %v5903_v29, %v5927_v27 }
 0xc86   :  { %v5962_v14 = vrot.slane %v5954_v21, %v12719_v35  ;;  %v5969_v12 = vrot.slane %v5955_v51, %v12719_v35 }
 0xc87   :  { %v5915_v42 = vpop.permute.xlu1 %5914  ;;  %v5905_v56 = vpop.permute.xlu0 %5904 }
 0xc88   :  { %v5938_v17 = vcombine.low %v14282_v33, %v5915_v42  ;;  %v5939_v3 = vcombine.high %v14282_v33, %v5915_v42 }
 0xc8a   :  { %v5946_v57 = vrot.slane %v5938_v17, %v12719_v35  ;;  %v5953_v10 = vrot.slane %v5939_v3, %v12719_v35 }
 0xc8b   :  { %v5917_v2 = vpop.permute.xlu1 %5916  ;;  %v5319_v50 = vpop.permute.xlu0 %5318 }
 0xc8c   :  { %v5970_v13 = vcombine.low %v5946_v57, %v5962_v14  ;;  %v5971_v41 = vcombine.high %v5946_v57, %v5962_v14  ;;  %v5986_v32 = vcombine.low %v5953_v10, %v5969_v12  ;;  %v5987_v48 = vcombine.high %v5953_v10, %v5969_v12 }
 0xc8d   :  { %v6006_v20 = vcombine.low %v14289_v40, %v5917_v2  ;;  %v6007_v49 = vcombine.high %v14289_v40, %v5917_v2 }
 0xc8e   :  { %v5978_v15 = vrot.slane %v5970_v13, %v12724_v43  ;;  %v5985_v61 = vrot.slane %v5971_v41, %v12724_v43  ;;  %v5994_v44 = vrot.slane %v5986_v32, %v12724_v43  ;;  %v6001_v23 = vrot.slane %v5987_v48, %v12724_v43 }
 0xc8f   :  { %v6014_v31 = vrot.slane %v6006_v20, %v12719_v35  ;;  %v6021_v34 = vrot.slane %v6007_v49, %v12719_v35  ;;  %v5929_v1 = vpop.permute.xlu1 %5928  ;;  %v5343_v33 = vpop.permute.xlu0 %5342 }
 0xc90   :  { %v6210_v19 = vcombine.low %v5978_v15, %v5985_v61  ;;  %v10241_v52 = vcombine.high %v5978_v15, %v5985_v61  ;;  %v6226_v58 = vcombine.low %v5994_v44, %v6001_v23  ;;  %v10242_v26 = vcombine.high %v5994_v44, %v6001_v23 }
 0xc91   :  { %v6022_v37 = vcombine.low %v5905_v56, %v5929_v1  ;;  %v6023_v40 = vcombine.high %v5905_v56, %v5929_v1  ;;  %v5370_v11 = vcombine.low %v5319_v50, %v5343_v33  ;;  %v5371_v39 = vcombine.high %v5319_v50, %v5343_v33 }
 0xc92   :  { %v14381_v53 = vrot.slane %v6210_v19, %v12719_v35  ;;  %v14384_v25 = vrot.slane %v10241_v52, %v12719_v35  ;;  %v14387_v5 = vrot.slane %v6226_v58, %v12719_v35  ;;  %v14390_v30 = vrot.slane %v10242_v26, %v12719_v35 }
 0xc93   :  { %v6030_v47 = vrot.slane %v6022_v37, %v12719_v35  ;;  %v6037_v29 = vrot.slane %v6023_v40, %v12719_v35  ;;  %v5378_v27 = vrot.slane %v5370_v11, %v12719_v35  ;;  %v5385_v21 = vrot.slane %v5371_v39, %v12719_v35  ;;  %v5331_v51 = vpop.permute.xlu1 %5330  ;;  %v5333_v42 = vpop.permute.xlu0 %5332 }
 0xc94   :  { %v5354_v56 = vcombine.low %v14295_v6, %v5331_v51  ;;  %v5355_v17 = vcombine.high %v14295_v6, %v5331_v51  ;;  %v5422_v3 = vcombine.low %v14305_v55, %v5333_v42  ;;  %v5423_v14 = vcombine.high %v14305_v55, %v5333_v42 }
 0xc95   :  { %v6038_v12 = vcombine.low %v6014_v31, %v6030_v47  ;;  %v6039_v57 = vcombine.high %v6014_v31, %v6030_v47  ;;  %v6054_v10 = vcombine.low %v6021_v34, %v6037_v29  ;;  %v6055_v2 = vcombine.high %v6021_v34, %v6037_v29 }
 0xc96   :  { %v5362_v50 = vrot.slane %v5354_v56, %v12719_v35  ;;  %v5369_v13 = vrot.slane %v5355_v17, %v12719_v35  ;;  %v5430_v41 = vrot.slane %v5422_v3, %v12719_v35  ;;  %v5437_v32 = vrot.slane %v5423_v14, %v12719_v35 }
 0xc97   :  { %v6046_v48 = vrot.slane %v6038_v12, %v12724_v43  ;;  %v6053_v6 = vrot.slane %v6039_v57, %v12724_v43  ;;  %v6062_v20 = vrot.slane %v6054_v10, %v12724_v43  ;;  %v6069_v55 = vrot.slane %v6055_v2, %v12724_v43  ;;  %v5321_v49 = vpop.permute.xlu1 %5320 }
 0xc98   :  { %v5386_v15 = vcombine.low %v5362_v50, %v5378_v27  ;;  %v5387_v61 = vcombine.high %v5362_v50, %v5378_v27  ;;  %v5402_v44 = vcombine.low %v5369_v13, %v5385_v21  ;;  %v5403_v23 = vcombine.high %v5369_v13, %v5385_v21 }
 0xc99   :  { %v6278_v31 = vcombine.low %v6046_v48, %v6053_v6  ;;  %v10243_v34 = vcombine.high %v6046_v48, %v6053_v6  ;;  %v6294_v1 = vcombine.low %v6062_v20, %v6069_v55  ;;  %v10244_v33 = vcombine.high %v6062_v20, %v6069_v55 }
 0xc9a   :  { %v5394_v19 = vrot.slane %v5386_v15, %v12724_v43  ;;  %v5401_v52 = vrot.slane %v5387_v61, %v12724_v43  ;;  %v5410_v58 = vrot.slane %v5402_v44, %v12724_v43  ;;  %v5417_v26 = vrot.slane %v5403_v23, %v12724_v43 }
 0xc9b   :  { %v6285_v37 = vrot.slane %v6278_v31, %v12719_v35  ;;  %v6293_v40 = vrot.slane %v10243_v34, %v12719_v35  ;;  %v6301_v11 = vrot.slane %v6294_v1, %v12719_v35  ;;  %v6309_v39 = vrot.slane %v10244_v33, %v12719_v35  ;;  %v5345_v47 = vpop.permute.xlu1 %5344 }
 0xc9c   :  { %v5626_v29 = vcombine.low %v5394_v19, %v5401_v52  ;;  %v10233_v27 = vcombine.high %v5394_v19, %v5401_v52  ;;  %v5642_v21 = vcombine.low %v5410_v58, %v5417_v26  ;;  %v10234_v51 = vcombine.high %v5410_v58, %v5417_v26 }
 0xc9d   :  { %v5438_v42 = vcombine.low %v5321_v49, %v5345_v47  ;;  %v5439_v56 = vcombine.high %v5321_v49, %v5345_v47  ;;  %v6242_v17 = vcombine.low %v14381_v53, %v14384_v25  ;;  %v6258_v3 = vcombine.low %v14387_v5, %v14390_v30 }
 0xc9e   :  { %v14421_v14 = vrot.slane %v5626_v29, %v12719_v35  ;;  %v14424_v12 = vrot.slane %v10233_v27, %v12719_v35  ;;  %v14427_v57 = vrot.slane %v5642_v21, %v12719_v35  ;;  %v14430_v10 = vrot.slane %v10234_v51, %v12719_v35 }
 0xc9f   :  { %v5446_v2 = vrot.slane %v5438_v42, %v12719_v35  ;;  %v5453_v50 = vrot.slane %v5439_v56, %v12719_v35  ;;  %v6250_v13 = vrot.slane %v6242_v17, %v12724_v43  ;;  %v6266_v48 = vrot.slane %v6258_v3, %v12724_v43 }
 0xca0   :  { %v6310_v6 = vcombine.low %v6285_v37, %v6293_v40  ;;  %v6326_v20 = vcombine.low %v6301_v11, %v6309_v39  ;;  %v6243_v55 = vcombine.high %v14381_v53, %v14384_v25  ;;  %v6259_v49 = vcombine.high %v14387_v5, %v14390_v30 }
 0xca1   :  { %v5454_v15 = vcombine.low %v5430_v41, %v5446_v2  ;;  %v5455_v61 = vcombine.high %v5430_v41, %v5446_v2  ;;  %v5470_v44 = vcombine.low %v5437_v32, %v5453_v50  ;;  %v5471_v23 = vcombine.high %v5437_v32, %v5453_v50 }
 0xca2   :  { %v6274_v31 = vcombine.low %v6250_v13, %v6266_v48  ;;  %v6318_v34 = vrot.slane %v6310_v6, %v12724_v43  ;;  %v6334_v1 = vrot.slane %v6326_v20, %v12724_v43  ;;  %v6257_v33 = vrot.slane %v6243_v55, %v12724_v43 }
 0xca3   :  { %v5462_v19 = vrot.slane %v5454_v15, %v12724_v43  ;;  %v5469_v52 = vrot.slane %v5455_v61, %v12724_v43  ;;  %v5478_v53 = vrot.slane %v5470_v44, %v12724_v43  ;;  %v5485_v25 = vrot.slane %v5471_v23, %v12724_v43 }
 0xca4   :  { %v6342_v5 = vcombine.low %v6318_v34, %v6334_v1  ;;  %v6273_v30 = vrot.slane %v6259_v49, %v12724_v43  ;;  %v6311_v41 = vcombine.high %v6285_v37, %v6293_v40  ;;  %v6327_v32 = vcombine.high %v6301_v11, %v6309_v39 }
 0xca5   :  { %v5694_v58 = vcombine.low %v5462_v19, %v5469_v52  ;;  %v10235_v26 = vcombine.high %v5462_v19, %v5469_v52  ;;  %v5710_v47 = vcombine.low %v5478_v53, %v5485_v25  ;;  %v10236_v29 = vcombine.high %v5478_v53, %v5485_v25 }
 0xca6   :  { %v11747_v27 = vpack.c.bf16 %v6342_v5, %v6274_v31  ;;  %v6277_v21 = vcombine.high %v6257_v33, %v6273_v30  ;;  %v6325_v51 = vrot.slane %v6311_v41, %v12724_v43  ;;  %v6341_v42 = vrot.slane %v6327_v32, %v12724_v43 }
 0xca7   :  { %v5701_v56 = vrot.slane %v5694_v58, %v12719_v35  ;;  %v5709_v17 = vrot.slane %v10235_v26, %v12719_v35  ;;  %v5717_v3 = vrot.slane %v5710_v47, %v12719_v35  ;;  %v5725_v2 = vrot.slane %v10236_v29, %v12719_v35 }
 0xca8   :  { %11749 = vmatprep.subr.msk.bf16.mxu1 %vm12858_vm1, %v11747_v27  ;;  %v6345_v37 = vcombine.high %v6325_v51, %v6341_v42  ;;  %v5658_v40 = vcombine.low %v14421_v14, %v14424_v12  ;;  %v5674_v11 = vcombine.low %v14427_v57, %v14430_v10  ;;  %v6275_v39 = vcombine.high %v6250_v13, %v6266_v48 }
 0xca9   :  { %v5726_v50 = vcombine.low %v5701_v56, %v5709_v17  ;;  %v5727_v6 = vcombine.high %v5701_v56, %v5709_v17  ;;  %v5742_v20 = vcombine.low %v5717_v3, %v5725_v2  ;;  %v5743_v55 = vcombine.high %v5717_v3, %v5725_v2  ;;  %11752 = vmatpush3.bf16.xpose.msk.msra.mxu1 %vm12858_vm1, %v11747_v27 }
 0xcaa   :  { %v11765_v49 = vpack.c.bf16 %v6345_v37, %v6277_v21  ;;  %v5666_v15 = vrot.slane %v5658_v40, %v12724_v43  ;;  %v5682_v61 = vrot.slane %v5674_v11, %v12724_v43  ;;  %v6343_v44 = vcombine.high %v6318_v34, %v6334_v1 }
 0xcab   :  { %v5734_v23 = vrot.slane %v5726_v50, %v12724_v43  ;;  %v5741_v31 = vrot.slane %v5727_v6, %v12724_v43  ;;  %v5750_v19 = vrot.slane %v5742_v20, %v12724_v43  ;;  %v5757_v13 = vrot.slane %v5743_v55, %v12724_v43 }
 0xcac   :  { %11767 = vmatprep.subr.msk.bf16.mxu0 %vm12858_vm1, %v11765_v49  ;;  %v5690_v48 = vcombine.low %v5666_v15, %v5682_v61  ;;  %v11753_v52 = vpack.c.bf16 %v6343_v44, %v6275_v39  ;;  %v5659_v53 = vcombine.high %v14421_v14, %v14424_v12  ;;  %v5675_v25 = vcombine.high %v14427_v57, %v14430_v10 }
 0xcad   :  { %11770 = vmatpush3.bf16.xpose.msk.msra.mxu0 %vm12858_vm1, %v11765_v49  ;;  %v5758_v34 = vcombine.low %v5734_v23, %v5750_v19  ;;  %v6276_v1 = vcombine.low %v6257_v33, %v6273_v30  ;;  %v6344_v32 = vcombine.low %v6325_v51, %v6341_v42  ;;  %v5691_v58 = vcombine.high %v5666_v15, %v5682_v61 }
 0xcae   :  { %11163 = vmatprep.mubr.msk.f32.mxu1 %vm2175_vm0, %v5690_v48  ;;  %11755 = vmatprep.subr.msk.bf16.mxu1 %vm12858_vm1, %v11753_v52  ;;  %v5673_v5 = vrot.slane %v5659_v53, %v12724_v43  ;;  %v5689_v41 = vrot.slane %v5675_v25, %v12724_v43  ;;  %v5761_v12 = vcombine.high %v5741_v31, %v5757_v13 }
 0xcaf   :  { %v11759_v57 = vpack.c.bf16 %v6344_v32, %v6276_v1  ;;  %v5759_v10 = vcombine.high %v5734_v23, %v5750_v19  ;;  %v5760_v26 = vcombine.low %v5741_v31, %v5757_v13 }
 0xcb0   :  { %v5693_v14 = vcombine.high %v5673_v5, %v5689_v41  ;;  %11164 = vmatmul.mubr.msk.f32.vlgmr.msra.gmra.mrb[54].mxu1 %vm2175_vm0, %v5758_v34  ;;  %v5692_v33 = vcombine.low %v5673_v5, %v5689_v41 }
 0xcb1   :  { %11758 = vmatpush3.bf16.xpose.msk.msra.mxu1 %vm12858_vm1, %v11753_v52  ;;  %11170 = vmatprep.mubr.msk.f32.mxu1 %vm2175_vm0, %v5691_v58 }
 0xcb2   :  { %11184 = vmatprep.mubr.msk.f32.mxu0 %vm2175_vm0, %v5693_v14  ;;  %11761 = vmatprep.subr.msk.bf16.mxu1 %vm12858_vm1, %v11759_v57 }
 0xcb4   :  { %11185 = vmatmul.mubr.msk.f32.vlgmr.msra.gmra.mrb[42].mxu0 %vm2175_vm0, %v5761_v12 }
 0xcb8   :  { %11171 = vmatmul.mubr.msk.f32.vlgmr.msra.gmra.mrb[56].mxu1 %vm2175_vm0, %v5759_v10 }
 0xcb9   :  { %11764 = vmatpush3.bf16.xpose.msk.msra.mxu1 %vm12858_vm1, %v11759_v57  ;;  %11177 = vmatprep.mubr.msk.f32.mxu1 %vm2175_vm0, %v5692_v33 }
 0xcbb   :  { %v5907_v30 = vpop.permute.xlu0 %5906 }
 0xcbf   :  { %v5909_v47 = vpop.permute.xlu1 %5908  ;;  %v5919_v29 = vpop.permute.xlu0 %5918 }
 0xcc0   :  { %11178 = vmatmul.mubr.msk.f32.vlgmr.msra.gmra.mrb[58].mxu1 %vm2175_vm0, %v5760_v26  ;;  %v6074_v27 = vcombine.low %v14315_v24, %v5919_v29  ;;  %v6075_v21 = vcombine.high %v14315_v24, %v5919_v29 }
 0xcc2   :  { %v6082_v3 = vrot.slane %v6074_v27, %v12719_v35  ;;  %v6089_v2 = vrot.slane %v6075_v21, %v12719_v35 }
 0xcc3   :  { %v5921_v51 = vpop.permute.xlu1 %5920  ;;  %v5931_v42 = vpop.permute.xlu0 %5930 }
 0xcc4   :  { %v6090_v56 = vcombine.low %v5907_v30, %v5931_v42  ;;  %v6091_v17 = vcombine.high %v5907_v30, %v5931_v42  ;;  %v6142_v11 = vcombine.low %v14324_v16, %v5921_v51  ;;  %v6143_v39 = vcombine.high %v14324_v16, %v5921_v51 }
 0xcc6   :  { %v6098_v37 = vrot.slane %v6090_v56, %v12719_v35  ;;  %v6105_v40 = vrot.slane %v6091_v17, %v12719_v35  ;;  %v6150_v13 = vrot.slane %v6142_v11, %v12719_v35  ;;  %v6157_v16 = vrot.slane %v6143_v39, %v12719_v35 }
 0xcc7   :  { %v5933_v50 = vpop.permute.xlu1 %5932  ;;  %v5323_v6 = vpop.permute.xlu0 %5322 }
 0xcc8   :  { %v6106_v20 = vcombine.low %v6082_v3, %v6098_v37  ;;  %v6107_v24 = vcombine.high %v6082_v3, %v6098_v37  ;;  %v6122_v55 = vcombine.low %v6089_v2, %v6105_v40  ;;  %v6123_v49 = vcombine.high %v6089_v2, %v6105_v40 }
 0xcc9   :  { %v6158_v15 = vcombine.low %v5909_v47, %v5933_v50  ;;  %v6159_v61 = vcombine.high %v5909_v47, %v5933_v50 }
 0xcca   :  { %v6114_v44 = vrot.slane %v6106_v20, %v12724_v43  ;;  %v6121_v23 = vrot.slane %v6107_v24, %v12724_v43  ;;  %v6130_v31 = vrot.slane %v6122_v55, %v12724_v43  ;;  %v6137_v19 = vrot.slane %v6123_v49, %v12724_v43 }
 0xccb   :  { %v6166_v48 = vrot.slane %v6158_v15, %v12719_v35  ;;  %v6173_v52 = vrot.slane %v6159_v61, %v12719_v35  ;;  %v5335_v53 = vpop.permute.xlu1 %5334  ;;  %v5347_v25 = vpop.permute.xlu0 %5346 }
 0xccc   :  { %v6346_v34 = vcombine.low %v6114_v44, %v6121_v23  ;;  %v10245_v1 = vcombine.high %v6114_v44, %v6121_v23  ;;  %v6362_v5 = vcombine.low %v6130_v31, %v6137_v19  ;;  %v10246_v41 = vcombine.high %v6130_v31, %v6137_v19 }
 0xccd   :  { %v6174_v32 = vcombine.low %v6150_v13, %v6166_v48  ;;  %v6175_v58 = vcombine.high %v6150_v13, %v6166_v48  ;;  %v6190_v14 = vcombine.low %v6157_v16, %v6173_v52  ;;  %v6191_v12 = vcombine.high %v6157_v16, %v6173_v52 }
 0xcce   :  { %v5490_v29 = vcombine.low %v14336_v63, %v5335_v53  ;;  %v5491_v27 = vcombine.high %v14336_v63, %v5335_v53  ;;  %v5506_v21 = vcombine.low %v5323_v6, %v5347_v25  ;;  %v5507_v51 = vcombine.high %v5323_v6, %v5347_v25 }
 0xccf   :  { %v6182_v57 = vrot.slane %v6174_v32, %v12724_v43  ;;  %v6189_v10 = vrot.slane %v6175_v58, %v12724_v43  ;;  %v6198_v33 = vrot.slane %v6190_v14, %v12724_v43  ;;  %v6205_v30 = vrot.slane %v6191_v12, %v12724_v43  ;;  %v5325_v26 = vpop.permute.xlu1 %5324  ;;  %v5337_v47 = vpop.permute.xlu0 %5336 }
 0xcd0   :  { %v14517_v42 = vrot.slane %v6346_v34, %v12719_v35  ;;  %v14520_v56 = vrot.slane %v10245_v1, %v12719_v35  ;;  %v14523_v17 = vrot.slane %v6362_v5, %v12719_v35  ;;  %v14526_v3 = vrot.slane %v10246_v41, %v12719_v35 }
 0xcd1   :  { %v5498_v2 = vrot.slane %v5490_v29, %v12719_v35  ;;  %v5505_v37 = vrot.slane %v5491_v27, %v12719_v35  ;;  %v5514_v63 = vrot.slane %v5506_v21, %v12719_v35  ;;  %v5521_v40 = vrot.slane %v5507_v51, %v12719_v35 }
 0xcd2   :  { %v6414_v11 = vcombine.low %v6182_v57, %v6189_v10  ;;  %v10247_v39 = vcombine.high %v6182_v57, %v6189_v10  ;;  %v6430_v50 = vcombine.low %v6198_v33, %v6205_v30  ;;  %v10248_v6 = vcombine.high %v6198_v33, %v6205_v30 }
 0xcd3   :  { %v5349_v20 = vpop.permute.xlu1 %5348  ;;  %v14532_v24 = vpop.permute.xlu0 %6488  ;;  %v5522_v55 = vcombine.low %v5498_v2, %v5514_v63  ;;  %v5523_v49 = vcombine.high %v5498_v2, %v5514_v63  ;;  %v5538_v15 = vcombine.low %v5505_v37, %v5521_v40  ;;  %v5539_v61 = vcombine.high %v5505_v37, %v5521_v40 }
 0xcd4   :  { %v5558_v44 = vcombine.low %v14320_v54, %v5337_v47  ;;  %v5559_v23 = vcombine.high %v14320_v54, %v5337_v47  ;;  %v5574_v31 = vcombine.low %v5325_v26, %v5349_v20  ;;  %v5575_v19 = vcombine.high %v5325_v26, %v5349_v20 }
 0xcd5   :  { %v5530_v13 = vrot.slane %v5522_v55, %v12724_v43  ;;  %v5537_v16 = vrot.slane %v5523_v49, %v12724_v43  ;;  %v5546_v48 = vrot.slane %v5538_v15, %v12724_v43  ;;  %v5553_v52 = vrot.slane %v5539_v61, %v12724_v43 }
 0xcd6   :  { %v5566_v53 = vrot.slane %v5558_v44, %v12719_v35  ;;  %v5573_v25 = vrot.slane %v5559_v23, %v12719_v35  ;;  %v5582_v34 = vrot.slane %v5574_v31, %v12719_v35  ;;  %v5589_v1 = vrot.slane %v5575_v19, %v12719_v35 }
 0xcd7   :  { %v6487_v5 = vpop.permute.xlu1 %6486  ;;  %v14545_v54 = vrot.slane %v6414_v11, %v12719_v35  ;;  %v14548_v41 = vrot.slane %v10247_v39, %v12719_v35  ;;  %v14551_v32 = vrot.slane %v6430_v50, %v12719_v35  ;;  %v14554_v58 = vrot.slane %v10248_v6, %v12719_v35  ;;  %v6511_v33 = vpop.permute.xlu0 %6510 }
 0xcd8   :  { %v5590_v14 = vcombine.low %v5566_v53, %v5582_v34  ;;  %v5591_v12 = vcombine.high %v5566_v53, %v5582_v34  ;;  %v5606_v57 = vcombine.low %v5573_v25, %v5589_v1  ;;  %v5607_v10 = vcombine.high %v5573_v25, %v5589_v1 }
 0xcd9   :  { %v5762_v30 = vcombine.low %v5530_v13, %v5537_v16  ;;  %v10237_v26 = vcombine.high %v5530_v13, %v5537_v16  ;;  %v5778_v47 = vcombine.low %v5546_v48, %v5553_v52  ;;  %v10238_v29 = vcombine.high %v5546_v48, %v5553_v52 }
 0xcda   :  { %v5598_v27 = vrot.slane %v5590_v14, %v12724_v43  ;;  %v5605_v21 = vrot.slane %v5591_v12, %v12724_v43  ;;  %v5614_v51 = vrot.slane %v5606_v57, %v12724_v43  ;;  %v5621_v2 = vrot.slane %v5607_v10, %v12724_v43 }
 0xcdb   :  { %v6499_v37 = vpop.permute.xlu1 %6498  ;;  %v6538_v63 = vcombine.low %v6487_v5, %v6511_v33  ;;  %v6539_v40 = vcombine.high %v6487_v5, %v6511_v33  ;;  %v14567_v23 = vrot.slane %v5762_v30, %v12719_v35  ;;  %v14570_v31 = vrot.slane %v10237_v26, %v12719_v35 }
 0xcdc   :  { %v6522_v11 = vcombine.low %v14356_v8, %v6499_v37  ;;  %v6523_v39 = vcombine.high %v14356_v8, %v6499_v37  ;;  %v5830_v50 = vcombine.low %v5598_v27, %v5605_v21  ;;  %v10239_v6 = vcombine.high %v5598_v27, %v5605_v21 }
 0xcdd   :  { %v5846_v20 = vcombine.low %v5614_v51, %v5621_v2  ;;  %v10240_v55 = vcombine.high %v5614_v51, %v5621_v2  ;;  %v6546_v49 = vrot.slane %v6538_v63, %v12719_v35  ;;  %v6553_v15 = vrot.slane %v6539_v40, %v12719_v35 }
 0xcde   :  { %v6530_v61 = vrot.slane %v6522_v11, %v12719_v35  ;;  %v6537_v44 = vrot.slane %v6523_v39, %v12719_v35  ;;  %v14573_v8 = vrot.slane %v5778_v47, %v12719_v35  ;;  %v14576_v19 = vrot.slane %v10238_v29, %v12719_v35 }
 0xcdf   :  { %v14579_v53 = vrot.slane %v5830_v50, %v12719_v35  ;;  %v14582_v25 = vrot.slane %v10239_v6, %v12719_v35  ;;  %v14585_v34 = vrot.slane %v5846_v20, %v12719_v35  ;;  %v14588_v1 = vrot.slane %v10240_v55, %v12719_v35 }
 0xce0   :  { %v6554_v13 = vcombine.low %v6530_v61, %v6546_v49  ;;  %v6555_v16 = vcombine.high %v6530_v61, %v6546_v49  ;;  %v6570_v48 = vcombine.low %v6537_v44, %v6553_v15  ;;  %v6571_v52 = vcombine.high %v6537_v44, %v6553_v15 }
 0xce1   :  { %v6378_v10 = vcombine.low %v14517_v42, %v14520_v56  ;;  %v6394_v33 = vcombine.low %v14523_v17, %v14526_v3  ;;  %v6446_v30 = vcombine.low %v14545_v54, %v14548_v41  ;;  %v6462_v26 = vcombine.low %v14551_v32, %v14554_v58 }
 0xce2   :  { %v6562_v5 = vrot.slane %v6554_v13, %v12724_v43  ;;  %v6569_v14 = vrot.slane %v6555_v16, %v12724_v43  ;;  %v6578_v12 = vrot.slane %v6570_v48, %v12724_v43  ;;  %v6585_v57 = vrot.slane %v6571_v52, %v12724_v43 }
 0xce3   :  { %v6386_v51 = vrot.slane %v6378_v10, %v12724_v43  ;;  %v6402_v2 = vrot.slane %v6394_v33, %v12724_v43  ;;  %v6454_v37 = vrot.slane %v6446_v30, %v12724_v43  ;;  %v6470_v63 = vrot.slane %v6462_v26, %v12724_v43 }
 0xce4   :  { %v6794_v47 = vcombine.low %v6562_v5, %v6569_v14  ;;  %v10249_v29 = vcombine.high %v6562_v5, %v6569_v14  ;;  %v6810_v27 = vcombine.low %v6578_v12, %v6585_v57  ;;  %v10250_v21 = vcombine.high %v6578_v12, %v6585_v57 }
 0xce5   :  { %v5862_v40 = vcombine.low %v14579_v53, %v14582_v25  ;;  %v5878_v11 = vcombine.low %v14585_v34, %v14588_v1  ;;  %v6410_v50 = vcombine.low %v6386_v51, %v6402_v2  ;;  %v6478_v6 = vcombine.low %v6454_v37, %v6470_v63 }
 0xce6   :  { %v14611_v39 = vrot.slane %v6794_v47, %v12719_v35  ;;  %v6411_v20 = vcombine.high %v6386_v51, %v6402_v2  ;;  %v6479_v55 = vcombine.high %v6454_v37, %v6470_v63  ;;  %v5794_v49 = vcombine.low %v14567_v23, %v14570_v31 }
 0xce7   :  { %v5810_v15 = vcombine.low %v14573_v8, %v14576_v19  ;;  %v6379_v61 = vcombine.high %v14517_v42, %v14520_v56  ;;  %v6395_v44 = vcombine.high %v14523_v17, %v14526_v3  ;;  %v11771_v13 = vpack.c.bf16 %v6478_v6, %v6410_v50 }
 0xce8   :  { %v11777_v16 = vpack.c.bf16 %v6479_v55, %v6411_v20  ;;  %v6447_v48 = vcombine.high %v14545_v54, %v14548_v41  ;;  %v6463_v52 = vcombine.high %v14551_v32, %v14554_v58  ;;  %v5802_v5 = vrot.slane %v5794_v49, %v12724_v43 }
 0xce9   :  { %v5818_v14 = vrot.slane %v5810_v15, %v12724_v43  ;;  %v6393_v12 = vrot.slane %v6379_v61, %v12724_v43  ;;  %v6409_v57 = vrot.slane %v6395_v44, %v12724_v43  ;;  %v6809_v42 = vrot.slane %v10249_v29, %v12719_v35  ;;  %11773 = vmatprep.subr.msk.bf16.mxu1 %vm12858_vm1, %v11771_v13 }
 0xcea   :  { %11779 = vmatprep.subr.msk.bf16.mxu0 %vm12858_vm1, %v11777_v16  ;;  %v6461_v56 = vrot.slane %v6447_v48, %v12724_v43  ;;  %v6477_v17 = vrot.slane %v6463_v52, %v12724_v43  ;;  %v6817_v3 = vrot.slane %v6810_v27, %v12719_v35  ;;  %11776 = vmatpush3.bf16.xpose.msk.msra.mxu1 %vm12858_vm1, %v11771_v13 }
 0xceb   :  { %11782 = vmatpush3.bf16.xpose.msk.msra.mxu0 %vm12858_vm1, %v11777_v16  ;;  %v5826_v54 = vcombine.low %v5802_v5, %v5818_v14  ;;  %v5827_v41 = vcombine.high %v5802_v5, %v5818_v14  ;;  %v6412_v32 = vcombine.low %v6393_v12, %v6409_v57  ;;  %v6413_v10 = vcombine.high %v6393_v12, %v6409_v57 }
 0xcec   :  { %v6480_v58 = vcombine.low %v6461_v56, %v6477_v17  ;;  %v6481_v33 = vcombine.high %v6461_v56, %v6477_v17  ;;  %v6825_v30 = vrot.slane %v10250_v21, %v12719_v35  ;;  %v5870_v26 = vrot.slane %v5862_v40, %v12724_v43 }
 0xced   :  { %11191 = vmatprep.mubr.msk.f32.mxu1 %vm2175_vm0, %v5826_v54  ;;  %11198 = vmatprep.mubr.msk.f32.mxu0 %vm2175_vm0, %v5827_v41  ;;  %v5886_v47 = vrot.slane %v5878_v11, %v12724_v43  ;;  %v5795_v51 = vcombine.high %v14567_v23, %v14570_v31  ;;  %v5863_v2 = vcombine.high %v14579_v53, %v14582_v25 }
 0xcee   :  { %v11783_v29 = vpack.c.bf16 %v6480_v58, %v6412_v32  ;;  %v11789_v27 = vpack.c.bf16 %v6481_v33, %v6413_v10  ;;  %v5811_v21 = vcombine.high %v14573_v8, %v14576_v19  ;;  %v5879_v50 = vcombine.high %v14585_v34, %v14588_v1 }
 0xcef   :  { %v5894_v37 = vcombine.low %v5870_v26, %v5886_v47  ;;  %v5895_v63 = vcombine.high %v5870_v26, %v5886_v47  ;;  %v5809_v40 = vrot.slane %v5795_v51, %v12724_v43  ;;  %v6826_v23 = vcombine.low %v14611_v39, %v6809_v42 }
 0xcf0   :  { %11785 = vmatprep.subr.msk.bf16.mxu1 %vm12858_vm1, %v11783_v29  ;;  %11791 = vmatprep.subr.msk.bf16.mxu0 %vm12858_vm1, %v11789_v27  ;;  %v5825_v31 = vrot.slane %v5811_v21, %v12724_v43  ;;  %v6842_v53 = vcombine.low %v6817_v3, %v6825_v30  ;;  %v6827_v25 = vcombine.high %v14611_v39, %v6809_v42 }
 0xcf1   :  { %v6843_v11 = vcombine.high %v6817_v3, %v6825_v30  ;;  %11192 = vmatmul.mubr.msk.f32.vlgmr.msra.gmra.mrb[60].mxu1 %vm2175_vm0, %v5894_v37  ;;  %v14665_v8 = vrot.slane %v6826_v23, %v12724_v43  ;;  %v5877_v39 = vrot.slane %v5863_v2, %v12724_v43  ;;  %v5893_v6 = vrot.slane %v5879_v50, %v12724_v43 }
 0xcf2   :  { %11199 = vmatmul.mubr.msk.f32.vlgmr.msra.gmra.mrb[44].mxu0 %vm2175_vm0, %v5895_v63  ;;  %11788 = vmatpush3.bf16.xpose.msk.msra.mxu1 %vm12858_vm1, %v11783_v29  ;;  %v5828_v19 = vcombine.low %v5809_v40, %v5825_v31  ;;  %v5829_v34 = vcombine.high %v5809_v40, %v5825_v31  ;;  %v14672_v1 = vrot.slane %v6842_v53, %v12724_v43 }
 0xcf3   :  { %11794 = vmatpush3.bf16.xpose.msk.msra.mxu0 %vm12858_vm1, %v11789_v27  ;;  %v14677_v20 = vrot.slane %v6827_v25, %v12724_v43  ;;  %v14680_v55 = vrot.slane %v6843_v11, %v12724_v43  ;;  %v5896_v44 = vcombine.low %v5877_v39, %v5893_v6  ;;  %v5897_v13 = vcombine.high %v5877_v39, %v5893_v6  ;;  %v14766_v25 = vpop.permute.xlu1 %6500 }
 0xcf4   :  { %11205 = vmatprep.mubr.msk.f32.mxu1 %vm2175_vm0, %v5828_v19  ;;  %11212 = vmatprep.mubr.msk.f32.mxu0 %vm2175_vm0, %v5829_v34  ;;  %v6858_v7 = vcombine.low %v14665_v8, %v14672_v1  ;;  %v6859_v49 = vcombine.high %v14665_v8, %v14672_v1 }
 0xcf5   :  { %v6860_v15 = vcombine.low %v14677_v20, %v14680_v55  ;;  %v6861_v61 = vcombine.high %v14677_v20, %v14680_v55 }
 0xcf9   :  { %11206 = vmatmul.mubr.msk.f32.vlgmr.msra.gmra.mrb[62].mxu1 %vm2175_vm0, %v5896_v44 }
 0xcfa   :  { %11213 = vmatmul.mubr.msk.f32.vlgmr.msra.gmra.mrb[46].mxu0 %vm2175_vm0, %v5897_v13 }
 0xd83   :  { %v11165_v16 = vpop.f32.mrb[54].mxu1 }
 0xd84   :  { %v14694_v48 = vpop.f32.mrb[55].mxu1  ;;  %v7765_v52 = vsel %vm2872_vm2, %v11165_v16, -inf }
 0xd85   :  { %7766 = vmax.xlane.f32.xlu1 %v7765_v52  ;;  %v7762_v42 = vsel %vm2872_vm2, %v14694_v48, -inf }
 0xd87   :  { %v11186_v5 = vpop.f32.mrb[42].mxu0 }
 0xd88   :  { %v14697_v14 = vpop.f32.mrb[43].mxu0  ;;  %v7783_v12 = vsel %vm2872_vm2, %v11186_v5, -inf }
 0xd89   :  { %7784 = vmax.xlane.f32.xlu0 %v7783_v12  ;;  %v7780_v17 = vsel %vm2872_vm2, %v14697_v14, -inf }
 0xd8b   :  { %v14700_v57 = vpop.f32.mrb[56].mxu1 }
 0xd8c   :  { %v14704_v56 = vpop.f32.mrb[57].mxu1  ;;  %v7771_v54 = vsel %vm2872_vm2, %v14700_v57, -inf }
 0xd8d   :  { %7763 = vmax.xlane.f32.xlu0 %v7762_v42  ;;  %v7768_v58 = vsel %vm2872_vm2, %v14704_v56, -inf }
 0xd91   :  { %7781 = vmax.xlane.f32.xlu0 %v7780_v17 }
 0xd93   :  { %v14708_v3 = vpop.f32.mrb[58].mxu1 }
 0xd94   :  { %v14712_v41 = vpop.f32.mrb[59].mxu1  ;;  %v7777_v32 = vsel %vm2872_vm2, %v14708_v3, -inf }
 0xd95   :  { %7772 = vmax.xlane.f32.xlu0 %v7771_v54  ;;  %7778 = vmax.xlane.f32.xlu1 %v7777_v32  ;;  %v7774_v10 = vsel %vm2872_vm2, %v14712_v41, -inf }
 0xd99   :  { %7769 = vmax.xlane.f32.xlu0 %v7768_v58  ;;  %7775 = vmax.xlane.f32.xlu1 %v7774_v10 }
 0xdc4   :  { %v14720_v33 = vpop.f32.mrb[60].mxu1 }
 0xdc5   :  { %v14722_v30 = vpop.f32.mrb[44].mxu0  ;;  %v14724_v26 = vpop.f32.mrb[61].mxu1  ;;  %v7789_v27 = vsel %vm2872_vm2, %v14720_v33, -inf }
 0xdc6   :  { %v14726_v47 = vpop.f32.mrb[45].mxu0  ;;  %v7795_v29 = vsel %vm2872_vm2, %v14722_v30, -inf  ;;  %7790 = vmax.xlane.f32.xlu1 %v7789_v27  ;;  %v7786_v2 = vsel %vm2872_vm2, %v14724_v26, -inf }
 0xdc7   :  { %7796 = vmax.xlane.f32.xlu0 %v7795_v29  ;;  %v7792_v51 = vsel %vm2872_vm2, %v14726_v47, -inf }
 0xdca   :  { %7787 = vmax.xlane.f32.xlu1 %v7786_v2 }
 0xdcb   :  { %7793 = vmax.xlane.f32.xlu0 %v7792_v51 }
 0xdcc   :  { %v14736_v37 = vpop.f32.mrb[62].mxu1 }
 0xdcd   :  { %v14738_v63 = vpop.f32.mrb[46].mxu0  ;;  %v14740_v21 = vpop.f32.mrb[63].mxu1  ;;  %v7801_v23 = vsel %vm2872_vm2, %v14736_v37, -inf }
 0xdce   :  { %v14742_v50 = vpop.f32.mrb[47].mxu0  ;;  %v7807_v40 = vsel %vm2872_vm2, %v14738_v63, -inf  ;;  %7802 = vmax.xlane.f32.xlu1 %v7801_v23  ;;  %v7798_v53 = vsel %vm2872_vm2, %v14740_v21, -inf }
 0xdcf   :  { %7808 = vmax.xlane.f32.xlu0 %v7807_v40  ;;  %v7804_v31 = vsel %vm2872_vm2, %v14742_v50, -inf }
 0xdd2   :  { %7799 = vmax.xlane.f32.xlu1 %v7798_v53 }
 0xdd3   :  { %7805 = vmax.xlane.f32.xlu0 %v7804_v31 }
 0xde3   :  { %6512 = vrot.lane.b32.xlu1 %v14350_v38, %s12275_s25 }
 0xde7   :  { %6490 = vrot.lane.b32.xlu1 %v14326_v22, %s12274_s24 }
 0xde9   :  { %6492 = vrot.lane.b32.xlu0 %v14322_v18, %s12274_s24 }
 0xdeb   :  { %6502 = vrot.lane.b32.xlu1 %v14326_v22, %s12273_s23 }
 0xded   :  { %6514 = vrot.lane.b32.xlu0 %v14326_v22, %s12275_s25 }
 0xdef   :  { %6504 = vrot.lane.b32.xlu1 %v14322_v18, %s12273_s23 }
 0xdf3   :  { %6516 = vrot.lane.b32.xlu1 %v14322_v18, %s12275_s25 }
 0xe12   :  { %v7767_v11 = vpop.xlane.xlu1 %7766 }
 0xe13   :  { %v7811_v19 = vsub.f32 %v11165_v16, %v7767_v11 }
 0xe15   :  { %v7828_v34 = vmul.f32 1.442695, %v7811_v19 }
 0xe16   :  { %v7785_v39 = vpop.xlane.xlu0 %7784 }
 0xe17   :  { %12168 = vpow2.f32 %v7828_v34  ;;  %v7817_v6 = vsub.f32 %v11186_v5, %v7785_v39 }
 0xe19   :  { %v7840_v44 = vmul.f32 1.442695, %v7817_v6 }
 0xe1a   :  { %v7764_v13 = vpop.xlane.xlu0 %7763 }
 0xe1b   :  { %12170 = vpow2.f32 %v7840_v44  ;;  %v7810_v52 = vsub.f32 %v14694_v48, %v7764_v13 }
 0xe1d   :  { %v7826_v12 = vmul.f32 1.442695, %v7810_v52 }
 0xe1e   :  { %v7782_v42 = vpop.xlane.xlu0 %7781 }
 0xe1f   :  { %12172 = vpow2.f32 %v7826_v12  ;;  %v7816_v17 = vsub.f32 %v14697_v14, %v7782_v42 }
 0xe21   :  { %v14770_v54 = vpop.eup %12168  ;;  %v7838_v32 = vmul.f32 1.442695, %v7816_v17 }
 0xe22   :  { %v7773_v58 = vpop.xlane.xlu0 %7772  ;;  %v7779_v10 = vpop.xlane.xlu1 %7778  ;;  %v7861_v16 = vsel %vm2872_vm2, %v14770_v54, 0.0 }
 0xe23   :  { %12174 = vpow2.f32 %v7838_v32  ;;  %v7813_v5 = vsub.f32 %v14700_v57, %v7773_v58  ;;  %v7815_v29 = vsub.f32 %v14708_v3, %v7779_v10  ;;  %7862 = vadd.xlane.f32.xlu0 %v7861_v16 }
 0xe25   :  { %v14776_v48 = vpop.eup %12170  ;;  %v7832_v27 = vmul.f32 1.442695, %v7813_v5  ;;  %v7836_v51 = vmul.f32 1.442695, %v7815_v29 }
 0xe26   :  { %v7770_v2 = vpop.xlane.xlu0 %7769  ;;  %v7879_v14 = vsel %vm2872_vm2, %v14776_v48, 0.0  ;;  %v7776_v44 = vpop.xlane.xlu1 %7775 }
 0xe27   :  { %12176 = vpow2.f32 %v7832_v27  ;;  %v7812_v40 = vsub.f32 %v14704_v56, %v7770_v2  ;;  %7880 = vadd.xlane.f32.xlu0 %v7879_v14  ;;  %v7814_v17 = vsub.f32 %v14712_v41, %v7776_v44 }
 0xe28   :  { %12178 = vpow2.f32 %v7836_v51 }
 0xe29   :  { %v14781_v23 = vpop.eup %12172  ;;  %v7830_v31 = vmul.f32 1.442695, %v7812_v40  ;;  %v7834_v27 = vmul.f32 1.442695, %v7814_v17 }
 0xe2a   :  { %v7858_v57 = vsel %vm2872_vm2, %v14781_v23, 0.0 }
 0xe2b   :  { %12180 = vpow2.f32 %v7830_v31  ;;  %7859 = vadd.xlane.f32.xlu1 %v7858_v57 }
 0xe2d   :  { %v14785_v3 = vpop.eup %12174 }
 0xe2e   :  { %v7876_v53 = vsel %vm2872_vm2, %v14785_v3, 0.0 }
 0xe2f   :  { %7877 = vadd.xlane.f32.xlu0 %v7876_v53 }
 0xe31   :  { %v14789_v11 = vpop.eup %12176 }
 0xe32   :  { %v14791_v19 = vpop.eup %12178  ;;  %v7867_v56 = vsel %vm2872_vm2, %v14789_v11, 0.0 }
 0xe33   :  { %7868 = vadd.xlane.f32.xlu1 %v7867_v56  ;;  %v7873_v34 = vsel %vm2872_vm2, %v14791_v19, 0.0  ;;  %v6590_v56 = vcombine.low %v14350_v38, %v14766_v25 }
 0xe35   :  { %v14797_v39 = vpop.eup %12180 }
 0xe36   :  { %v7864_v6 = vsel %vm2872_vm2, %v14797_v39, 0.0 }
 0xe37   :  { %7874 = vadd.xlane.f32.xlu1 %v7873_v34  ;;  %7865 = vadd.xlane.f32.xlu0 %v7864_v6 }
 0xe53   :  { %v7791_v13 = vpop.xlane.xlu1 %7790 }
 0xe54   :  { %v7797_v52 = vpop.xlane.xlu0 %7796  ;;  %v7819_v12 = vsub.f32 %v14720_v33, %v7791_v13 }
 0xe55   :  { %v7821_v42 = vsub.f32 %v14722_v30, %v7797_v52 }
 0xe56   :  { %v7844_v32 = vmul.f32 1.442695, %v7819_v12 }
 0xe57   :  { %v7848_v58 = vmul.f32 1.442695, %v7821_v42  ;;  %v7788_v10 = vpop.xlane.xlu1 %7787  ;;  %v6598_v42 = vrot.slane %v6590_v56, %v12719_v35 }
 0xe58   :  { %v7794_v16 = vpop.xlane.xlu0 %7793  ;;  %12182 = vpow2.f32 %v7844_v32  ;;  %v7818_v5 = vsub.f32 %v14724_v26, %v7788_v10 }
 0xe59   :  { %v7820_v29 = vsub.f32 %v14726_v47, %v7794_v16  ;;  %12184 = vpow2.f32 %v7848_v58 }
 0xe5a   :  { %v7842_v51 = vmul.f32 1.442695, %v7818_v5 }
 0xe5b   :  { %v7846_v2 = vmul.f32 1.442695, %v7820_v29  ;;  %v7803_v14 = vpop.xlane.xlu1 %7802 }
 0xe5c   :  { %v7809_v40 = vpop.xlane.xlu0 %7808  ;;  %12186 = vpow2.f32 %v7842_v51  ;;  %v7823_v33 = vsub.f32 %v14736_v37, %v7803_v14  ;;  %v6591_v37 = vcombine.high %v14350_v38, %v14766_v25 }
 0xe5d   :  { %v7825_v41 = vsub.f32 %v14738_v63, %v7809_v40  ;;  %12188 = vpow2.f32 %v7846_v2 }
 0xe5e   :  { %12190 = vpow2.f32 %v7834_v27  ;;  %v7852_v30 = vmul.f32 1.442695, %v7823_v33  ;;  %v6605_v17 = vrot.slane %v6591_v37, %v12719_v35 }
 0xe5f   :  { %v7856_v31 = vmul.f32 1.442695, %v7825_v41  ;;  %v7800_v57 = vpop.xlane.xlu1 %7799 }
 0xe60   :  { %v7806_v53 = vpop.xlane.xlu0 %7805  ;;  %12192 = vpow2.f32 %v7852_v30  ;;  %v7822_v26 = vsub.f32 %v14740_v21, %v7800_v57 }
 0xe61   :  { %v7824_v47 = vsub.f32 %v14742_v50, %v7806_v53  ;;  %12194 = vpow2.f32 %v7856_v31 }
 0xe62   :  { %v14812_v34 = vpop.eup %12182  ;;  %v7850_v63 = vmul.f32 1.442695, %v7822_v26 }
 0xe63   :  { %v7854_v6 = vmul.f32 1.442695, %v7824_v47  ;;  %v14816_v44 = vpop.eup %12184  ;;  %v6513_v13 = vpop.permute.xlu1 %6512  ;;  %v7885_v21 = vsel %vm2872_vm2, %v14812_v34, 0.0 }
 0xe64   :  { %v14818_v52 = vpop.permute.xlu0 %6492  ;;  %12196 = vpow2.f32 %v7850_v63  ;;  %v6606_v50 = vcombine.low %v14532_v24, %v6513_v13  ;;  %v6607_v12 = vcombine.high %v14532_v24, %v6513_v13  ;;  %7886 = vadd.xlane.f32.xlu1 %v7885_v21  ;;  %v7891_v38 = vsel %vm2872_vm2, %v14816_v44, 0.0 }
 0xe65   :  { %12198 = vpow2.f32 %v7854_v6  ;;  %7892 = vadd.xlane.f32.xlu0 %v7891_v38 }
 0xe66   :  { %v14826_v25 = vpop.eup %12186  ;;  %v6614_v32 = vrot.slane %v6606_v50, %v12719_v35  ;;  %v6621_v58 = vrot.slane %v6607_v12, %v12719_v35 }
 0xe67   :  { %v14832_v10 = vpop.eup %12188  ;;  %v6491_v16 = vpop.permute.xlu1 %6490  ;;  %v7882_v5 = vsel %vm2872_vm2, %v14826_v25, 0.0 }
 0xe68   :  { %v6515_v24 = vpop.permute.xlu0 %6514  ;;  %v14836_v29 = vpop.eup %12190  ;;  %v6622_v27 = vcombine.low %v6598_v42, %v6614_v32  ;;  %v6623_v51 = vcombine.high %v6598_v42, %v6614_v32  ;;  %v6638_v2 = vcombine.low %v6605_v17, %v6621_v58  ;;  %v6639_v14 = vcombine.high %v6605_v17, %v6621_v58  ;;  %7883 = vadd.xlane.f32.xlu1 %v7882_v5 }
 0xe69   :  { %v6674_v40 = vcombine.low %v6491_v16, %v6515_v24  ;;  %v6675_v33 = vcombine.high %v6491_v16, %v6515_v24  ;;  %v7888_v41 = vsel %vm2872_vm2, %v14832_v10, 0.0  ;;  %v7870_v37 = vsel %vm2872_vm2, %v14836_v29, 0.0 }
 0xe6a   :  { %v14840_v30 = vpop.eup %12192  ;;  %v6630_v31 = vrot.slane %v6622_v27, %v12724_v43  ;;  %v6637_v57 = vrot.slane %v6623_v51, %v12724_v43  ;;  %v6646_v53 = vrot.slane %v6638_v2, %v12724_v43  ;;  %v6653_v26 = vrot.slane %v6639_v14, %v12724_v43  ;;  %7889 = vadd.xlane.f32.xlu0 %v7888_v41 }
 0xe6b   :  { %v6682_v47 = vrot.slane %v6674_v40, %v12719_v35  ;;  %v6503_v56 = vpop.permute.xlu1 %6502  ;;  %v14849_v63 = vpop.eup %12194  ;;  %v6689_v12 = vrot.slane %v6675_v33, %v12719_v35  ;;  %v7897_v17 = vsel %vm2872_vm2, %v14840_v30, 0.0 }
 0xe6c   :  { %v6862_v6 = vcombine.low %v6630_v31, %v6637_v57  ;;  %v10251_v13 = vcombine.high %v6630_v31, %v6637_v57  ;;  %v6878_v21 = vcombine.low %v6646_v53, %v6653_v26  ;;  %v10252_v50 = vcombine.high %v6646_v53, %v6653_v26 }
 0xe6d   :  { %v6658_v38 = vcombine.low %v14326_v22, %v6503_v56  ;;  %v6659_v42 = vcombine.high %v14326_v22, %v6503_v56  ;;  %v7903_v40 = vsel %vm2872_vm2, %v14849_v63, 0.0 }
 0xe6e   :  { %v14856_v32 = vpop.eup %12196  ;;  %v6869_v58 = vrot.slane %v6862_v6, %v12719_v35  ;;  %v6877_v16 = vrot.slane %v10251_v13, %v12719_v35  ;;  %v6885_v24 = vrot.slane %v6878_v21, %v12719_v35  ;;  %v6893_v5 = vrot.slane %v10252_v50, %v12719_v35  ;;  %7871 = vadd.xlane.f32.xlu0 %v7870_v37 }
 0xe6f   :  { %v14862_v27 = vpop.eup %12198  ;;  %v6666_v51 = vrot.slane %v6658_v38, %v12719_v35  ;;  %v6673_v22 = vrot.slane %v6659_v42, %v12719_v35  ;;  %v6505_v2 = vpop.permute.xlu1 %6504  ;;  %v7894_v14 = vsel %vm2872_vm2, %v14856_v32, 0.0 }
 0xe70   :  { %v6726_v33 = vcombine.low %v14322_v18, %v6505_v2  ;;  %v6727_v41 = vcombine.high %v14322_v18, %v6505_v2  ;;  %v7900_v31 = vsel %vm2872_vm2, %v14862_v27, 0.0  ;;  %v6894_v57 = vcombine.low %v6869_v58, %v6877_v16 }
 0xe71   :  { %v6690_v53 = vcombine.low %v6666_v51, %v6682_v47  ;;  %v6691_v26 = vcombine.high %v6666_v51, %v6682_v47  ;;  %v6706_v56 = vcombine.low %v6673_v22, %v6689_v12  ;;  %v6707_v37 = vcombine.high %v6673_v22, %v6689_v12  ;;  %7901 = vadd.xlane.f32.xlu1 %v7900_v31 }
 0xe72   :  { %v6734_v6 = vrot.slane %v6726_v33, %v12719_v35  ;;  %v6741_v13 = vrot.slane %v6727_v41, %v12719_v35  ;;  %7898 = vadd.xlane.f32.xlu0 %v7897_v17  ;;  %v6902_v21 = vrot.slane %v6894_v57, %v12724_v43  ;;  %v6910_v50 = vcombine.low %v6885_v24, %v6893_v5 }
 0xe73   :  { %v6698_v38 = vrot.slane %v6690_v53, %v12724_v43  ;;  %v6705_v18 = vrot.slane %v6691_v26, %v12724_v43  ;;  %v6714_v42 = vrot.slane %v6706_v56, %v12724_v43  ;;  %v6721_v2 = vrot.slane %v6707_v37, %v12724_v43  ;;  %v6517_v47 = vpop.permute.xlu1 %6516 }
 0xe74   :  { %v6742_v12 = vcombine.low %v14818_v52, %v6517_v47  ;;  %v6743_v51 = vcombine.high %v14818_v52, %v6517_v47  ;;  %v6918_v22 = vrot.slane %v6910_v50, %v12724_v43  ;;  %v6895_v33 = vcombine.high %v6869_v58, %v6877_v16 }
 0xe75   :  { %v6930_v17 = vcombine.low %v6698_v38, %v6705_v18  ;;  %v10253_v41 = vcombine.high %v6698_v38, %v6705_v18  ;;  %v6946_v31 = vcombine.low %v6714_v42, %v6721_v2  ;;  %v10254_v57 = vcombine.high %v6714_v42, %v6721_v2 }
 0xe76   :  { %v6750_v53 = vrot.slane %v6742_v12, %v12719_v35  ;;  %v6757_v26 = vrot.slane %v6743_v51, %v12719_v35  ;;  %7895 = vadd.xlane.f32.xlu0 %v7894_v14  ;;  %v6926_v56 = vcombine.low %v6902_v21, %v6918_v22  ;;  %v6909_v37 = vrot.slane %v6895_v33, %v12724_v43 }
 0xe77   :  { %v6937_v45 = vrot.slane %v6930_v17, %v12719_v35  ;;  %v6945_v36 = vrot.slane %v10253_v41, %v12719_v35  ;;  %v6953_v52 = vrot.slane %v6946_v31, %v12719_v35  ;;  %v6961_v58 = vrot.slane %v10254_v57, %v12719_v35 }
 0xe78   :  { %v6758_v16 = vcombine.low %v6734_v6, %v6750_v53  ;;  %v6759_v50 = vcombine.high %v6734_v6, %v6750_v53  ;;  %v6774_v38 = vcombine.low %v6741_v13, %v6757_v26  ;;  %v6775_v18 = vcombine.high %v6741_v13, %v6757_v26 }
 0xe79   :  { %v11795_v42 = vpack.c.bf16 %v6926_v56, %v6858_v7  ;;  %v6911_v14 = vcombine.high %v6885_v24, %v6893_v5  ;;  %v6927_v2 = vcombine.high %v6902_v21, %v6918_v22  ;;  %v6962_v47 = vcombine.low %v6937_v45, %v6945_v36 }
 0xe7a   :  { %v6766_v12 = vrot.slane %v6758_v16, %v12724_v43  ;;  %v6773_v51 = vrot.slane %v6759_v50, %v12724_v43  ;;  %v6782_v33 = vrot.slane %v6774_v38, %v12724_v43  ;;  %v6789_v17 = vrot.slane %v6775_v18, %v12724_v43  ;;  %7904 = vadd.xlane.f32.xlu0 %v7903_v40 }
 0xe7b   :  { %11796 = vmatprep.subr.bf16.mxu1 %v11795_v42  ;;  %v6925_v6 = vrot.slane %v6911_v14, %v12724_v43  ;;  %v11799_v13 = vpack.c.bf16 %v6927_v2, %v6859_v49  ;;  %v6970_v7 = vrot.slane %v6962_v47, %v12724_v43  ;;  %v6978_v24 = vcombine.low %v6953_v52, %v6961_v58 }
 0xe7c   :  { %v6998_v5 = vcombine.low %v6766_v12, %v6773_v51  ;;  %v10255_v21 = vcombine.high %v6766_v12, %v6773_v51  ;;  %v7014_v22 = vcombine.low %v6782_v33, %v6789_v17  ;;  %v10256_v41 = vcombine.high %v6782_v33, %v6789_v17  ;;  %11798 = vmatpush3.bf16.msra.mxu1 %v11795_v42 }
 0xe7d   :  { %v6928_v31 = vcombine.low %v6909_v37, %v6925_v6  ;;  %11800 = vmatprep.subr.bf16.mxu1 %v11799_v13  ;;  %v6986_v57 = vrot.slane %v6978_v24, %v12724_v43  ;;  %v6929_v40 = vcombine.high %v6909_v37, %v6925_v6  ;;  %v6963_v53 = vcombine.high %v6937_v45, %v6945_v36 }
 0xe7e   :  { %v7005_v26 = vrot.slane %v6998_v5, %v12719_v35  ;;  %v7013_v56 = vrot.slane %v10255_v21, %v12719_v35  ;;  %v7021_v8 = vrot.slane %v7014_v22, %v12719_v35  ;;  %v7029_v1 = vrot.slane %v10256_v41, %v12719_v35 }
 0xe7f   :  { %v11803_v49 = vpack.c.bf16 %v6928_v31, %v6860_v15  ;;  %v11807_v16 = vpack.c.bf16 %v6929_v40, %v6861_v61  ;;  %v6995_v50 = vcombine.high %v6970_v7, %v6986_v57  ;;  %v6977_v36 = vrot.slane %v6963_v53, %v12724_v43 }
 0xe80   :  { %v7030_v38 = vcombine.low %v7005_v26, %v7013_v56  ;;  %v7046_v37 = vcombine.low %v7021_v8, %v7029_v1  ;;  %v6979_v45 = vcombine.high %v6953_v52, %v6961_v58  ;;  %v7031_v18 = vcombine.high %v7005_v26, %v7013_v56 }
 0xe81   :  { %11804 = vmatprep.subr.bf16.mxu0 %v11803_v49  ;;  %v7047_v42 = vcombine.high %v7021_v8, %v7029_v1  ;;  %v6994_v47 = vcombine.low %v6970_v7, %v6986_v57 }
 0xe82   :  { %11806 = vmatpush3.bf16.msra.mxu0 %v11803_v49  ;;  %v7038_v14 = vrot.slane %v7030_v38, %v12724_v43  ;;  %v7054_v2 = vrot.slane %v7046_v37, %v12724_v43  ;;  %v6993_v15 = vrot.slane %v6979_v45, %v12724_v43  ;;  %v7045_v20 = vrot.slane %v7031_v18, %v12724_v43 }
 0xe83   :  { %v7061_v55 = vrot.slane %v7047_v42, %v12724_v43 }
 0xe84   :  { %v7062_v61 = vcombine.low %v7038_v14, %v7054_v2  ;;  %v7063_v12 = vcombine.high %v7038_v14, %v7054_v2  ;;  %v6997_v51 = vcombine.high %v6977_v36, %v6993_v15  ;;  %v6996_v33 = vcombine.low %v6977_v36, %v6993_v15 }
 0xe85   :  { %v7065_v52 = vcombine.high %v7045_v20, %v7061_v55  ;;  %v7064_v58 = vcombine.low %v7045_v20, %v7061_v55 }
 0xe86   :  { %v14920_v17 = vpack.c.bf16 %v7062_v61, %v6994_v47  ;;  %v11815_v6 = vpack.c.bf16 %v7063_v12, %v6995_v50 }
 0xe87   :  { %v14922_v24 = vpack.c.bf16 %v7065_v52, %v6997_v51  ;;  %v14924_v5 = vpack.c.bf16 %v7064_v58, %v6996_v33 }
 0xe88   :  { %11812 = vmatprep.subr.bf16.mxu0 %v14920_v17 }
 0xeb0   :  { %v7863_v7 = vpop.xlane.xlu0 %7862 }
 0xeb1   :  { %12200 = vrcp.f32 %v7863_v7 }
 0xeb4   :  { %v7881_v22 = vpop.xlane.xlu0 %7880 }
 0xeb8   :  { %v7860_v21 = vpop.xlane.xlu1 %7859 }
 0xeb9   :  { %12202 = vrcp.f32 %v7860_v21  ;;  %v10317_v21 = vld [vmem:[%s15717_s6 + $0xa0] sm:$0xff] }
 0xebb   :  { %v12201_v31 = vpop.eup %12200 }
 0xebc   :  { %v7878_v41 = vpop.xlane.xlu0 %7877  ;;  %v7909_v56 = vmul.f32 %v12201_v31, %v14770_v54  ;;  %v10319_v31 = vld [vmem:[%s15717_s6 + $0xb0] sm:$0xff] }
 0xebd   :  { %12204 = vrcp.f32 %v7878_v41 }
 0xec0   :  { %v7869_v57 = vpop.xlane.xlu1 %7868 }
 0xec1   :  { %12206 = vrcp.f32 %v7869_v57  ;;  %v10320_v57 = vld [vmem:[%s15717_s6 + $0xb8] sm:$0xff] }
 0xec3   :  { %v12203_v40 = vpop.eup %12202 }
 0xec4   :  { %v7866_v53 = vpop.xlane.xlu0 %7865  ;;  %v7907_v26 = vmul.f32 %v12203_v40, %v14781_v23  ;;  %v11839_v40 = vpack.c.bf16 %v10320_v57, %v10319_v31 }
 0xec5   :  { %12208 = vrcp.f32 %v7866_v53  ;;  %v10321_v53 = vld [vmem:[%s15717_s6 + $0xc0] sm:$0xff] }
 0xec6   :  { %11219 = vmatprep.mubr.msk.f32.mxu1 %vm2872_vm2, %v7907_v26  ;;  %12210 = vrcp.f32 %v7881_v22  ;;  %v10318_v22 = vld [vmem:[%s15717_s6 + $0xa8] sm:$0xff] }
 0xec7   :  { %11220 = vmatmul.mubr.msk.f32.vlgmr.msra.gmra.mrb[64].mxu1 %vm2872_vm2, %v7909_v56  ;;  %v12205_v8 = vpop.eup %12204  ;;  %v11835_v41 = vpack.c.bf16 %v10318_v22, %v10317_v21  ;;  %v10322_v26 = vld [vmem:[%s15717_s6 + $0xc8] sm:$0xff] }
 0xec8   :  { %11802 = vmatpush3.bf16.msra.mxu1 %v11799_v13  ;;  %v7919_v54 = vmul.f32 %v12205_v8, %v14785_v3 }
 0xec9   :  { %11808 = vmatprep.subr.bf16.mxu1 %v11807_v16 }
 0xecb   :  { %v12207_v1 = vpop.eup %12206 }
 0xecc   :  { %v7913_v38 = vmul.f32 %v12207_v1, %v14789_v11  ;;  %v11843_v1 = vpack.c.bf16 %v10322_v26, %v10321_v53 }
 0xecf   :  { %v12209_v49 = vpop.eup %12208 }
 0xed0   :  { %v7911_v50 = vmul.f32 %v12209_v49, %v14797_v39  ;;  %v12211_v37 = vpop.eup %12210  ;;  %v7875_v39 = vpop.xlane.xlu1 %7874  ;;  %v10323_v49 = vld [vmem:[%s15717_s6 + $0xd0] sm:$0xff] }
 0xed1   :  { %v7921_v23 = vmul.f32 %v12211_v37, %v14776_v48 }
 0xed2   :  { %11226 = vmatprep.mubr.msk.f32.mxu1 %vm2872_vm2, %v7911_v50  ;;  %v10324_v50 = vld [vmem:[%s15717_s6 + $0xd8] sm:$0xff] }
 0xed3   :  { %11227 = vmatmul.mubr.msk.f32.vlgmr.msra.gmra.mrb[66].mxu1 %vm2872_vm2, %v7913_v38  ;;  %v11847_v38 = vpack.c.bf16 %v10324_v50, %v10323_v49 }
 0xed4   :  { %11810 = vmatpush3.bf16.msra.mxu1 %v11807_v16  ;;  %11240 = vmatprep.mubr.msk.f32.mxu1 %vm2872_vm2, %v7919_v54 }
 0xed5   :  { %11816 = vmatprep.subr.bf16.mxu1 %v11815_v6 }
 0xed7   :  { %11241 = vmatmul.mubr.msk.f32.vlgmr.msra.gmra.mrb[68].mxu1 %vm2872_vm2, %v7921_v23 }
 0xed8   :  { %11818 = vmatpush3.bf16.msra.mxu1 %v11815_v6  ;;  %v15744_v6 = vmov 0.0  }
 0xed9   :  { %11824 = vmatprep.subr.bf16.mxu1 %v14922_v24 }
 0xef1   :  { %v7887_v11 = vpop.xlane.xlu1 %7886 }
 0xef2   :  { %v7893_v13 = vpop.xlane.xlu0 %7892 }
 0xef3   :  { %12212 = vrcp.f32 %v7893_v13 }
 0xef5   :  { %v7884_v45 = vpop.xlane.xlu1 %7883 }
 0xef7   :  { %v7890_v36 = vpop.xlane.xlu0 %7889 }
 0xef8   :  { %12214 = vrcp.f32 %v7890_v36 }
 0xef9   :  { %12216 = vrcp.f32 %v7875_v39 }
 0xefa   :  { %12218 = vrcp.f32 %v7884_v45 }
 0xefb   :  { %v7872_v3 = vpop.xlane.xlu0 %7871 }
 0xefc   :  { %12220 = vrcp.f32 %v7872_v3 }
 0xefd   :  { %12222 = vrcp.f32 %v7887_v11  ;;  %v12213_v18 = vpop.eup %12212 }
 0xefe   :  { %v7902_v16 = vpop.xlane.xlu1 %7901  ;;  %v7929_v47 = vmul.f32 %v12213_v18, %v14816_v44 }
 0xeff   :  { %12224 = vrcp.f32 %v7902_v16  ;;  %v7899_v48 = vpop.xlane.xlu0 %7898 }
 0xf00   :  { %12226 = vrcp.f32 %v7899_v48 }
 0xf02   :  { %v12215_v42 = vpop.eup %12214 }
 0xf03   :  { %v7896_v14 = vpop.xlane.xlu0 %7895  ;;  %v7927_v2 = vmul.f32 %v12215_v42, %v14832_v10  ;;  %v12217_v15 = vpop.eup %12216 }
 0xf04   :  { %12228 = vrcp.f32 %v7896_v14  ;;  %v12219_v20 = vpop.eup %12218  ;;  %v7917_v33 = vmul.f32 %v12217_v15, %v14791_v19 }
 0xf05   :  { %11254 = vmatprep.mubr.msk.f32.mxu1 %vm2872_vm2, %v7927_v2  ;;  %v7923_v44 = vmul.f32 %v12219_v20, %v14826_v25 }
 0xf06   :  { %v12221_v55 = vpop.eup %12220  ;;  %11255 = vmatmul.mubr.msk.f32.vlgmr.msra.gmra.mrb[70].mxu1 %vm2872_vm2, %v7929_v47 }
 0xf07   :  { %11826 = vmatpush3.bf16.msra.mxu1 %v14922_v24  ;;  %v7905_v61 = vpop.xlane.xlu0 %7904  ;;  %v7915_v12 = vmul.f32 %v12221_v55, %v14836_v29  ;;  %v12223_v51 = vpop.eup %12222  ;;  %v10313_v24 = vld [vmem:[%s15717_s6 + $0x80] sm:$0xff] }
 0xf08   :  { %12230 = vrcp.f32 %v7905_v61  ;;  %v7925_v58 = vmul.f32 %v12223_v51, %v14812_v34 }
 0xf09   :  { %v12225_v10 = vpop.eup %12224  ;;  %11233 = vmatprep.mubr.msk.f32.mxu0 %vm2872_vm2, %v7915_v12 }
 0xf0a   :  { %11234 = vmatmul.mubr.msk.f32.vlgmr.msra.gmra.mrb[48].mxu0 %vm2872_vm2, %v7917_v33  ;;  %v7935_v52 = vmul.f32 %v12225_v10, %v14862_v27  ;;  %v12227_v19 = vpop.eup %12226 }
 0xf0b   :  { %11814 = vmatpush3.bf16.msra.mxu0 %v14920_v17  ;;  %11247 = vmatprep.mubr.msk.f32.mxu0 %vm2872_vm2, %v7923_v44  ;;  %v7933_v27 = vmul.f32 %v12227_v19, %v14840_v30  ;;  %v10315_v30 = vld [vmem:[%s15717_s6 + $0x90] sm:$0xff] }
 0xf0c   :  { %11820 = vmatprep.subr.bf16.mxu0 %v14924_v5  ;;  %11268 = vmatprep.mubr.msk.f32.mxu1 %vm2872_vm2, %v7935_v52 }
 0xf0e   :  { %v12229_v29 = vpop.eup %12228  ;;  %11248 = vmatmul.mubr.msk.f32.vlgmr.msra.gmra.mrb[50].mxu0 %vm2872_vm2, %v7925_v58 }
 0xf0f   :  { %11822 = vmatpush3.bf16.msra.mxu0 %v14924_v5  ;;  %v7931_v25 = vmul.f32 %v12229_v29, %v14856_v32  ;;  %v10314_v32 = vld [vmem:[%s15717_s6 + $0x88] sm:$0xff] }
 0xf10   :  { %v11827_v5 = vpack.c.bf16 %v10314_v32, %v10313_v24 }
 0xf11   :  { %11261 = vmatprep.mubr.msk.f32.mxu0 %vm2872_vm2, %v7931_v25 }
 0xf12   :  { %v12231_v17 = vpop.eup %12230  ;;  %11262 = vmatmul.mubr.msk.f32.vlgmr.msra.gmra.mrb[52].mxu0 %vm2872_vm2, %v7933_v27  ;;  %11828 = vmatprep.subr.bf16.mxu0 %v11827_v5 }
 0xf13   :  { %v7937_v34 = vmul.f32 %v12231_v17, %v14849_v63  ;;  %v10316_v63 = vld [vmem:[%s15717_s6 + $0x98] sm:$0xff]  ;;  %11830 = vmatpush3.bf16.msra.mxu0 %v11827_v5 }
 0xf14   :  { %v11831_v7 = vpack.c.bf16 %v10316_v63, %v10315_v30 }
 0xf15   :  { %11269 = vmatmul.mubr.msk.f32.vlgmr.msra.gmra.mrb[72].mxu1 %vm2872_vm2, %v7937_v34 }
 0xf16   :  { %9524 = vmatprep.mubr.f32.mxu1 %v15744_v6  ;;  %11832 = vmatprep.subr.bf16.mxu0 %v11831_v7 }
 0xf17   :  { %11834 = vmatpush3.bf16.msra.mxu0 %v11831_v7 }
 0xf18   :  { %11836 = vmatprep.subr.bf16.mxu0 %v11835_v41 }
 0xf1b   :  { %11838 = vmatpush3.bf16.msra.mxu0 %v11835_v41 }
 0xf1c   :  { %11840 = vmatprep.subr.bf16.mxu0 %v11839_v40 }
 0xf1f   :  { %11842 = vmatpush3.bf16.msra.mxu0 %v11839_v40 }
 0xf20   :  { %11844 = vmatprep.subr.bf16.mxu0 %v11843_v1 }
 0xf23   :  { %11846 = vmatpush3.bf16.msra.mxu0 %v11843_v1 }
 0xf24   :  { %11848 = vmatprep.subr.bf16.mxu0 %v11847_v38 }
 0xf27   :  { %11850 = vmatpush3.bf16.msra.mxu0 %v11847_v38 }
 0xf9a   :  { %v11221_v56 = vpop.f32.mrb[64].mxu1 }
 0xf9b   :  { %v8010_v8 = vpop.f32.mrb[65].mxu1 }
 0xfa6   :  { %v11228_v37 = vpop.f32.mrb[66].mxu1 }
 0xfa7   :  { %v8091_v54 = vpop.f32.mrb[67].mxu1 }
 0xfaa   :  { %v11242_v23 = vpop.f32.mrb[68].mxu1 }
 0xfab   :  { %v8670_v39 = vcombine.low %v11228_v37, %v11242_v23  ;;  %v8671_v11 = vcombine.high %v11228_v37, %v11242_v23  ;;  %v8253_v13 = vpop.f32.mrb[69].mxu1 }
 0xfac   :  { %v8602_v36 = vcombine.low %v8091_v54, %v8253_v13  ;;  %v8603_v45 = vcombine.high %v8091_v54, %v8253_v13 }
 0xfad   :  { %v8678_v47 = vrot.slane %v8670_v39, %v12719_v35  ;;  %v8685_v20 = vrot.slane %v8671_v11, %v12719_v35 }
 0xfae   :  { %v8610_v12 = vrot.slane %v8602_v36, %v12719_v35  ;;  %v8617_v51 = vrot.slane %v8603_v45, %v12719_v35 }
 0xfd9   :  { %v15001_v3 = vpop.f32.mrb[70].mxu1 }
 0xfda   :  { %v15003_v16 = vpop.f32.mrb[71].mxu1 }
 0xfdd   :  { %v11235_v48 = vpop.f32.mrb[48].mxu0 }
 0xfde   :  { %v8654_v18 = vcombine.low %v11221_v56, %v11235_v48  ;;  %v8655_v42 = vcombine.high %v11221_v56, %v11235_v48  ;;  %v8172_v14 = vpop.f32.mrb[49].mxu0 }
 0xfdf   :  { %v8586_v2 = vcombine.low %v8010_v8, %v8172_v14  ;;  %v8587_v15 = vcombine.high %v8010_v8, %v8172_v14 }
 0xfe0   :  { %v8662_v55 = vrot.slane %v8654_v18, %v12719_v35  ;;  %v8669_v61 = vrot.slane %v8655_v42, %v12719_v35 }
 0xfe1   :  { %v8594_v33 = vrot.slane %v8586_v2, %v12719_v35  ;;  %v8601_v10 = vrot.slane %v8587_v15, %v12719_v35  ;;  %v11249_v44 = vpop.f32.mrb[50].mxu0 }
 0xfe2   :  { %v8686_v52 = vcombine.low %v8662_v55, %v8678_v47  ;;  %v8687_v58 = vcombine.high %v8662_v55, %v8678_v47  ;;  %v8702_v19 = vcombine.low %v8669_v61, %v8685_v20  ;;  %v8703_v29 = vcombine.high %v8669_v61, %v8685_v20  ;;  %v8334_v25 = vpop.f32.mrb[51].mxu0 }
 0xfe3   :  { %v8618_v27 = vcombine.low %v8594_v33, %v8610_v12  ;;  %v8619_v17 = vcombine.high %v8594_v33, %v8610_v12  ;;  %v8634_v34 = vcombine.low %v8601_v10, %v8617_v51  ;;  %v8635_v24 = vcombine.high %v8601_v10, %v8617_v51 }
 0xfe4   :  { %v8694_v32 = vrot.slane %v8686_v52, %v12724_v43  ;;  %v8701_v30 = vrot.slane %v8687_v58, %v12724_v43  ;;  %v8710_v5 = vrot.slane %v8702_v19, %v12724_v43  ;;  %v8717_v63 = vrot.slane %v8703_v29, %v12724_v43 }
 0xfe5   :  { %v8626_v7 = vrot.slane %v8618_v27, %v12724_v43  ;;  %v8633_v21 = vrot.slane %v8619_v17, %v12724_v43  ;;  %v8642_v22 = vrot.slane %v8634_v34, %v12724_v43  ;;  %v8649_v41 = vrot.slane %v8635_v24, %v12724_v43  ;;  %v11263_v31 = vpop.f32.mrb[52].mxu0 }
 0xfe6   :  { %v8926_v57 = vcombine.low %v8694_v32, %v8701_v30  ;;  %v10307_v40 = vcombine.high %v8694_v32, %v8701_v30  ;;  %v8942_v53 = vcombine.low %v8710_v5, %v8717_v63  ;;  %v10308_v26 = vcombine.high %v8710_v5, %v8717_v63  ;;  %v8496_v56 = vpop.f32.mrb[53].mxu0 }
 0xfe7   :  { %v8858_v8 = vcombine.low %v8626_v7, %v8633_v21  ;;  %v10305_v1 = vcombine.high %v8626_v7, %v8633_v21  ;;  %v8874_v49 = vcombine.low %v8642_v22, %v8649_v41  ;;  %v10306_v50 = vcombine.high %v8642_v22, %v8649_v41 }
 0xfe8   :  { %v15022_v38 = vrot.slane %v8926_v57, %v12719_v35  ;;  %v15025_v37 = vrot.slane %v10307_v40, %v12719_v35  ;;  %v15028_v54 = vrot.slane %v8942_v53, %v12719_v35  ;;  %v15031_v23 = vrot.slane %v10308_v26, %v12719_v35  ;;  %v11270_v39 = vpop.f32.mrb[72].mxu1 }
 0xfe9   :  { %v15034_v11 = vrot.slane %v8858_v8, %v12719_v35  ;;  %v15037_v13 = vrot.slane %v10305_v1, %v12719_v35  ;;  %v15040_v36 = vrot.slane %v8874_v49, %v12719_v35  ;;  %v15043_v45 = vrot.slane %v10306_v50, %v12719_v35  ;;  %v8577_v48 = vpop.f32.mrb[73].mxu1 }
 0xfea   :  { %v8790_v18 = vcombine.low %v11249_v44, %v11263_v31  ;;  %v8791_v42 = vcombine.high %v11249_v44, %v11263_v31  ;;  %v8722_v14 = vcombine.low %v8334_v25, %v8496_v56  ;;  %v8723_v2 = vcombine.high %v8334_v25, %v8496_v56 }
 0xfeb   :  { %v8806_v15 = vcombine.low %v15001_v3, %v11270_v39  ;;  %v8807_v47 = vcombine.high %v15001_v3, %v11270_v39  ;;  %v8738_v20 = vcombine.low %v15003_v16, %v8577_v48  ;;  %v8739_v55 = vcombine.high %v15003_v16, %v8577_v48 }
 0xfec   :  { %v8798_v61 = vrot.slane %v8790_v18, %v12719_v35  ;;  %v8805_v12 = vrot.slane %v8791_v42, %v12719_v35  ;;  %v8730_v51 = vrot.slane %v8722_v14, %v12719_v35  ;;  %v8737_v33 = vrot.slane %v8723_v2, %v12719_v35 }
 0xfed   :  { %v8814_v10 = vrot.slane %v8806_v15, %v12719_v35  ;;  %v8821_v44 = vrot.slane %v8807_v47, %v12719_v35  ;;  %v8746_v52 = vrot.slane %v8738_v20, %v12719_v35  ;;  %v8753_v3 = vrot.slane %v8739_v55, %v12719_v35 }
 0xfee   :  { %v8891_v58 = vcombine.high %v15034_v11, %v15037_v13  ;;  %v8907_v16 = vcombine.high %v15040_v36, %v15043_v45  ;;  %v8959_v19 = vcombine.high %v15022_v38, %v15025_v37  ;;  %v8975_v29 = vcombine.high %v15028_v54, %v15031_v23 }
 0xfef   :  { %v8822_v25 = vcombine.low %v8798_v61, %v8814_v10  ;;  %v8823_v27 = vcombine.high %v8798_v61, %v8814_v10  ;;  %v8838_v17 = vcombine.low %v8805_v12, %v8821_v44  ;;  %v8839_v34 = vcombine.high %v8805_v12, %v8821_v44 }
 0xff0   :  { %v8754_v24 = vcombine.low %v8730_v51, %v8746_v52  ;;  %v8755_v32 = vcombine.high %v8730_v51, %v8746_v52  ;;  %v8770_v30 = vcombine.low %v8737_v33, %v8753_v3  ;;  %v8771_v5 = vcombine.high %v8737_v33, %v8753_v3 }
 0xff1   :  { %v8830_v63 = vrot.slane %v8822_v25, %v12724_v43  ;;  %v8837_v7 = vrot.slane %v8823_v27, %v12724_v43  ;;  %v8846_v21 = vrot.slane %v8838_v17, %v12724_v43  ;;  %v8853_v22 = vrot.slane %v8839_v34, %v12724_v43 }
 0xff2   :  { %v8762_v41 = vrot.slane %v8754_v24, %v12724_v43  ;;  %v8769_v31 = vrot.slane %v8755_v32, %v12724_v43  ;;  %v8778_v57 = vrot.slane %v8770_v30, %v12724_v43  ;;  %v8785_v40 = vrot.slane %v8771_v5, %v12724_v43 }
 0xff3   :  { %v9062_v53 = vcombine.low %v8830_v63, %v8837_v7  ;;  %v10311_v26 = vcombine.high %v8830_v63, %v8837_v7  ;;  %v9078_v56 = vcombine.low %v8846_v21, %v8853_v22  ;;  %v10312_v8 = vcombine.high %v8846_v21, %v8853_v22  ;;  %v10325_v21 = vld [vmem:[%s15717_s6 + $0xe0] sm:$0xff]  ;;  %v10326_v22 = vld [vmem:[%s15717_s6 + $0xe8] sm:$0xff] }
 0xff4   :  { %v8994_v1 = vcombine.low %v8762_v41, %v8769_v31  ;;  %v10309_v49 = vcombine.high %v8762_v41, %v8769_v31  ;;  %v9010_v50 = vcombine.low %v8778_v57, %v8785_v40  ;;  %v10310_v39 = vcombine.high %v8778_v57, %v8785_v40 }
 0xff5   :  { %v9069_v48 = vrot.slane %v9062_v53, %v12719_v35  ;;  %v9077_v18 = vrot.slane %v10311_v26, %v12719_v35  ;;  %v9085_v42 = vrot.slane %v9078_v56, %v12719_v35  ;;  %v9093_v14 = vrot.slane %v10312_v8, %v12719_v35  ;;  %v10327_v53 = vld [vmem:[%s15717_s6 + $0xf0] sm:$0xff]  ;;  %v10328_v26 = vld [vmem:[%s15717_s6 + $0xf8] sm:$0xff] }
 0xff6   :  { %v9001_v2 = vrot.slane %v8994_v1, %v12719_v35  ;;  %v9009_v15 = vrot.slane %v10309_v49, %v12719_v35  ;;  %v9017_v47 = vrot.slane %v9010_v50, %v12719_v35  ;;  %v9025_v20 = vrot.slane %v10310_v39, %v12719_v35 }
 0xff7   :  { %v8905_v55 = vrot.slane %v8891_v58, %v12724_v43  ;;  %v8921_v61 = vrot.slane %v8907_v16, %v12724_v43  ;;  %v8973_v12 = vrot.slane %v8959_v19, %v12724_v43  ;;  %v8989_v51 = vrot.slane %v8975_v29, %v12724_v43 }
 0xff8   :  { %v8890_v33 = vcombine.low %v15034_v11, %v15037_v13  ;;  %v8906_v10 = vcombine.low %v15040_v36, %v15043_v45  ;;  %v8958_v44 = vcombine.low %v15022_v38, %v15025_v37  ;;  %v8974_v35 = vcombine.low %v15028_v54, %v15031_v23 }
 0xff9   :  { %v8924_v52 = vcombine.low %v8905_v55, %v8921_v61  ;;  %v8992_v3 = vcombine.low %v8973_v12, %v8989_v51  ;;  %v8925_v58 = vcombine.high %v8905_v55, %v8921_v61  ;;  %v8993_v16 = vcombine.high %v8973_v12, %v8989_v51 }
 0xffa   :  { %v15094_v19 = vrot.slane %v8890_v33, %v12724_v43  ;;  %v8914_v29 = vrot.slane %v8906_v10, %v12724_v43  ;;  %v8966_v11 = vrot.slane %v8958_v44, %v12724_v43  ;;  %v8982_v13 = vrot.slane %v8974_v35, %v12724_v43 }
 0xffb   :  { %v12063_v36 = vpack.i.bf16 %v8992_v3, %v8924_v52  ;;  %v12068_v45 = vpack.i.bf16 %v8993_v16, %v8925_v58  ;;  %v9027_v25 = vcombine.high %v9001_v2, %v9009_v15  ;;  %v9043_v38 = vcombine.high %v9017_v47, %v9025_v20 }
 0xffc   :  { %v8923_v37 = vcombine.high %v15094_v19, %v8914_v29  ;;  %v8991_v54 = vcombine.high %v8966_v11, %v8982_v13  ;;  %v9095_v23 = vcombine.high %v9069_v48, %v9077_v18  ;;  %v9111_v27 = vcombine.high %v9085_v42, %v9093_v14 }
 0xffd   :  { %12064 = vrot.lane.b32.xlu0 %v12063_v36, %s12273_s23  ;;  %v9041_v17 = vrot.slane %v9027_v25, %v12724_v43  ;;  %v9057_v34 = vrot.slane %v9043_v38, %v12724_v43  ;;  %v9026_v24 = vcombine.low %v9001_v2, %v9009_v15  ;;  %v9042_v32 = vcombine.low %v9017_v47, %v9025_v20 }
 0xffe   :  { %v12058_v30 = vpack.i.bf16 %v8991_v54, %v8923_v37  ;;  %v9109_v5 = vrot.slane %v9095_v23, %v12724_v43  ;;  %v9125_v63 = vrot.slane %v9111_v27, %v12724_v43  ;;  %v9094_v7 = vcombine.low %v9069_v48, %v9077_v18 }
 0xfff   :  { %v9060_v41 = vcombine.low %v9041_v17, %v9057_v34  ;;  %v9034_v31 = vrot.slane %v9026_v24, %v12724_v43  ;;  %v9050_v57 = vrot.slane %v9042_v32, %v12724_v43  ;;  %v9110_v40 = vcombine.low %v9085_v42, %v9093_v14 }
0x1000   :  { %12059 = vrot.lane.b32.xlu1 %v12058_v30, %s12275_s25  ;;  %v9128_v56 = vcombine.low %v9109_v5, %v9125_v63  ;;  %v9102_v8 = vrot.slane %v9094_v7, %v12724_v43  ;;  %v9061_v1 = vcombine.high %v9041_v17, %v9057_v34  ;;  %v9129_v49 = vcombine.high %v9109_v5, %v9125_v63  ;;  %v10330_v7 = vld [vmem:[%s15718_s7 + $0x1] ss:$0 sm:$0xff] }
0x1001   :  { %v9059_v50 = vcombine.high %v9034_v31, %v9050_v57  ;;  %v9118_v39 = vrot.slane %v9110_v40, %v12724_v43  ;;  %v8990_v48 = vcombine.low %v8966_v11, %v8982_v13  ;;  %v11851_v18 = vpack.c.bf16 %v10326_v22, %v10325_v21 }
0x1002   :  { %v12078_v42 = vpack.i.bf16 %v9128_v56, %v9060_v41  ;;  %v12083_v14 = vpack.i.bf16 %v9129_v49, %v9061_v1  ;;  %v11855_v2 = vpack.c.bf16 %v10328_v26, %v10327_v53  ;;  %v8922_v15 = vcombine.low %v15094_v19, %v8914_v29 }
0x1003   :  { %v9127_v47 = vcombine.high %v9102_v8, %v9118_v39  ;;  %11852 = vmatprep.subr.bf16.mxu0 %v11851_v18  ;;  %v9058_v20 = vcombine.low %v9034_v31, %v9050_v57  ;;  %v9126_v55 = vcombine.low %v9102_v8, %v9118_v39  ;;  %v10335_v39 = vld [vmem:[%s15719_s8 + $0x200] sm:$0xff] }
0x1004   :  { %12069 = vrot.lane.b32.xlu1 %v12068_v45, %s12274_s24  ;;  %12079 = vrot.lane.b32.xlu0 %v12078_v42, %s12273_s23 }
0x1005   :  { %v12073_v61 = vpack.i.bf16 %v9127_v47, %v9059_v50  ;;  %11854 = vmatpush3.bf16.msra.mxu0 %v11851_v18 }
0x1006   :  { %11856 = vmatprep.subr.bf16.mxu0 %v11855_v2 }
0x1008   :  { %12074 = vrot.lane.b32.xlu1 %v12073_v61, %s12275_s25  ;;  %v10350_v61 = vld [vmem:[%s15719_s8 + $0x278] sm:$0xff] }
0x1009   :  { %11858 = vmatpush3.bf16.msra.mxu0 %v11855_v2  ;;  %v10341_v2 = vld [vmem:[%s15719_s8 + $0x230] sm:$0xff] }
0x100c   :  { %12084 = vrot.lane.b32.xlu1 %v12083_v14, %s12274_s24  ;;  %v10337_v14 = vld [vmem:[%s15719_s8 + $0x210] sm:$0xff] }
0x100d   :  { %v11893_v47 = vpack.c.bf16 %v10341_v2, %v10337_v14 }
0x106f   :  { %v12065_v43 = vpop.permute.xlu0 %12064 }
0x1070   :  { %v12067_v10 = vunpack.i.h.bf16 %v12065_v43  ;;  %v12066_v44 = vunpack.i.l.bf16 %v12065_v43 }
0x1072   :  { %v12060_v12 = vpop.permute.xlu1 %12059 }
0x1073   :  { %v12062_v51 = vunpack.i.h.bf16 %v12060_v12  ;;  %v12061_v33 = vunpack.i.l.bf16 %v12060_v12 }
0x1075   :  { %v9179_v35 = vsel %vm2175_vm0, %v8990_v48, %v12062_v51  ;;  %v9178_v52 = vsel %vm2175_vm0, %v8922_v15, %v12061_v33  ;;  %v10339_v48 = vld [vmem:[%s15719_s8 + $0x220] sm:$0xff]  ;;  %v10344_v15 = vld [vmem:[%s15719_s8 + $0x248] sm:$0xff] }
0x1076   :  { %v12070_v3 = vpop.permute.xlu1 %12069  ;;  %v9182_v19 = vsel %vm4293_vm3, %v9178_v52, %v12066_v44  ;;  %v9183_v29 = vsel %vm4293_vm3, %v9179_v35, %v12067_v10  ;;  %v12080_v36 = vpop.permute.xlu0 %12079  ;;  %v11861_v42 = vpack.c.bf16 %v10339_v48, %v10335_v39  ;;  %v10343_v51 = vld [vmem:[%s15719_s8 + $0x240] sm:$0xff]  ;;  %v10345_v10 = vld [vmem:[%s15719_s8 + $0x250] sm:$0xff]  ;;  %v10352_v52 = vld [vmem:[%s15719_s8 + $0x288] sm:$0xff] }
0x1077   :  { %v12072_v58 = vunpack.i.h.bf16 %v12070_v3  ;;  %v12071_v16 = vunpack.i.l.bf16 %v12070_v3  ;;  %v12082_v37 = vunpack.i.h.bf16 %v12080_v36  ;;  %v12081_v54 = vunpack.i.l.bf16 %v12080_v36  ;;  %v10347_v33 = vld [vmem:[%s15719_s8 + $0x260] sm:$0xff]  ;;  %v10349_v35 = vld [vmem:[%s15719_s8 + $0x270] sm:$0xff]  ;;  %v10356_v3 = vld [vmem:[%s15719_s8 + $0x2a8] sm:$0xff] }
0x1078   :  { %v11865_v44 = vpack.c.bf16 %v10347_v33, %v10343_v51  ;;  %v10355_v36 = vld [vmem:[%s15719_s8 + $0x2a0] sm:$0xff]  ;;  %v10372_v48 = vld [vmem:[%s15719_s8 + $0x328] sm:$0xff] }
0x1079   :  { %v9186_v11 = vsel %vm4298_vm4, %v9182_v19, %v12071_v16  ;;  %v9187_v13 = vsel %vm4298_vm4, %v9183_v29, %v12072_v58  ;;  %v11897_v58 = vpack.c.bf16 %v10349_v35, %v10345_v10  ;;  %v11867_v16 = vpack.c.bf16 %v10356_v3, %v10352_v52  ;;  %v10354_v19 = vld [vmem:[%s15719_s8 + $0x298] sm:$0xff]  ;;  %v10375_v35 = vld [vmem:[%s15719_s8 + $0x340] sm:$0xff] }
0x107a   :  { %11303 = vmatprep.mubr.f32.mxu0 %v9186_v11  ;;  %v12075_v45 = vpop.permute.xlu1 %12074  ;;  %v10358_v29 = vld [vmem:[%s15719_s8 + $0x2b8] sm:$0xff]  ;;  %v10351_v11 = vld [vmem:[%s15719_s8 + $0x280] sm:$0xff] }
0x107b   :  { %11304 = vmatmul.mubr.f32.vlgmr.msra.gmra.mrb[54].mxu0 %v9187_v13  ;;  %v12077_v25 = vunpack.i.h.bf16 %v12075_v45  ;;  %v12076_v38 = vunpack.i.l.bf16 %v12075_v45  ;;  %v11899_v13 = vpack.c.bf16 %v10358_v29, %v10354_v19  ;;  %v10353_v45 = vld [vmem:[%s15719_s8 + $0x290] sm:$0xff]  ;;  %v10378_v10 = vld [vmem:[%s15719_s8 + $0x358] sm:$0xff]  ;;  %v10379_v3 = vld [vmem:[%s15719_s8 + $0x360] sm:$0xff] }
0x107c   :  { %v11881_v19 = vpack.c.bf16 %v10379_v3, %v10375_v35  ;;  %v10384_v29 = vld [vmem:[%s15719_s8 + $0x388] sm:$0xff]  ;;  %v10400_v35 = vld [vmem:[%s15721_s10 + $0x200] sm:$0xff] }
0x107d   :  { %v9180_v23 = vsel %vm2175_vm0, %v9058_v20, %v12076_v38  ;;  %v9181_v27 = vsel %vm2175_vm0, %v9126_v55, %v12077_v25  ;;  %v10348_v20 = vld [vmem:[%s15719_s8 + $0x268] sm:$0xff]  ;;  %v10346_v55 = vld [vmem:[%s15719_s8 + $0x258] sm:$0xff]  ;;  %v10357_v25 = vld [vmem:[%s15719_s8 + $0x2b0] sm:$0xff]  ;;  %v11869_v38 = vpack.c.bf16 %v10355_v36, %v10351_v11 }
0x107e   :  { %v12085_v17 = vpop.permute.xlu1 %12084  ;;  %v9184_v32 = vsel %vm4293_vm3, %v9180_v23, %v12081_v54  ;;  %v9185_v30 = vsel %vm4293_vm3, %v9181_v27, %v12082_v37  ;;  %v11863_v43 = vpack.c.bf16 %v10348_v20, %v10344_v15  ;;  %v11895_v12 = vpack.c.bf16 %v10350_v61, %v10346_v55  ;;  %v10367_v15 = vld [vmem:[%s15719_s8 + $0x300] sm:$0xff]  ;;  %v10369_v20 = vld [vmem:[%s15719_s8 + $0x310] sm:$0xff]  ;;  %v10388_v11 = vld [vmem:[%s15719_s8 + $0x3a8] sm:$0xff] }
0x107f   :  { %v12087_v34 = vunpack.i.h.bf16 %v12085_v17  ;;  %v12086_v24 = vunpack.i.l.bf16 %v12085_v17  ;;  %v11901_v37 = vpack.c.bf16 %v10357_v25, %v10353_v45  ;;  %v10373_v61 = vld [vmem:[%s15719_s8 + $0x330] sm:$0xff]  ;;  %v11883_v45 = vpack.c.bf16 %v10388_v11, %v10384_v29  ;;  %v10390_v25 = vld [vmem:[%s15719_s8 + $0x3b8] sm:$0xff]  ;;  %v10432_v3 = vld [vmem:[%s15721_s10 + $0x300] sm:$0xff] }
0x1080   :  { %v11909_v51 = vpack.c.bf16 %v10373_v61, %v10369_v20  ;;  %v10451_v29 = vld [vmem:[%s15721_s10 + $0x398] sm:$0xff] }
0x1081   :  { %v9188_v5 = vsel %vm4298_vm4, %v9184_v32, %v12086_v24  ;;  %v9189_v63 = vsel %vm4298_vm4, %v9185_v30, %v12087_v34 }
0x1082   :  { %11306 = vmatprep.mubr.f32.mxu0 %v9188_v5 }
0x1083   :  { %11307 = vmatmul.mubr.f32.gmra.mrb[56].mxu0 %v9189_v63 }
0x1084   :  { %9613 = vmatprep.mubr.f32.mxu0 %v15744_v6 }
0x114e   :  { %v11305_v21 = vpop.f32.mrb[54].mxu0 }
0x114f   :  { %v9287_v22 = vadd.f32 %v11305_v21, %v10330_v7  ;;  %v9281_v41 = vpop.f32.mrb[55].mxu0 }
0x1150   :  { %v9282_v31 = vadd.f32 %v10330_v7, %v9281_v41 }
0x1151   :  { %v15144_v57 = vadd.f32 %v9287_v22, %v14264_v28  ;;  %v10340_v28 = vld [vmem:[%s15719_s8 + $0x228] sm:$0xff] }
0x1152   :  { %v15147_v40 = vadd.f32 %v9282_v31, %v14258_v46  ;;  %v10336_v46 = vld [vmem:[%s15719_s8 + $0x208] sm:$0xff] }
0x1153   :  { %9310 = vadd.xlane.f32.xlu1 %v15144_v57  ;;  %v11859_v50 = vpack.c.bf16 %v10340_v28, %v10336_v46 }
0x1154   :  { %9308 = vadd.xlane.f32.xlu0 %v15147_v40 }
0x1155   :  { %11860 = vmatprep.subr.bf16.mxu1 %v11859_v50  ;;  %v10365_v50 = vld [vmem:[%s15719_s8 + $0x2f0] sm:$0xff] }
0x1156   :  { %v11308_v53 = vpop.f32.mrb[56].mxu0  ;;  %11862 = vmatpush1.bf16.msra.mxu1 %v11861_v42  ;;  %v10374_v42 = vld [vmem:[%s15719_s8 + $0x338] sm:$0xff] }
0x1157   :  { %v9291_v26 = vpop.f32.mrb[57].mxu0  ;;  %v9297_v8 = vadd.f32 %v11308_v53, %v10330_v7  ;;  %11864 = vmatprep.subr.bf16.mxu1 %v11863_v43  ;;  %v10364_v53 = vld [vmem:[%s15719_s8 + $0x2e8] sm:$0xff] }
0x1158   :  { %v9292_v56 = vadd.f32 %v10330_v7, %v9291_v26  ;;  %v10362_v26 = vld [vmem:[%s15719_s8 + $0x2d8] sm:$0xff]  ;;  %v10376_v43 = vld [vmem:[%s15719_s8 + $0x348] sm:$0xff] }
0x1159   :  { %v15156_v49 = vadd.f32 %v9297_v8, %v14274_v62  ;;  %v10342_v62 = vld [vmem:[%s15719_s8 + $0x238] sm:$0xff] }
0x115a   :  { %v15152_v1 = vadd.f32 %v9292_v56, %v14269_v4  ;;  %v10338_v4 = vld [vmem:[%s15719_s8 + $0x218] sm:$0xff]  ;;  %11866 = vmatpush1.bf16.msra.mxu1 %v11865_v44 }
0x115b   :  { %v11891_v18 = vpack.c.bf16 %v10342_v62, %v10338_v4  ;;  %11868 = vmatprep.subr.bf16.mxu1 %v11867_v16  ;;  %v10366_v8 = vld [vmem:[%s15719_s8 + $0x2f8] sm:$0xff]  ;;  %v10361_v4 = vld [vmem:[%s15719_s8 + $0x2d0] sm:$0xff]  ;;  %v10368_v62 = vld [vmem:[%s15719_s8 + $0x308] sm:$0xff] }
0x115c   :  { %9312 = vadd.xlane.f32.xlu0 %v15152_v1  ;;  %v11903_v46 = vpack.c.bf16 %v10366_v8, %v10362_v26  ;;  %v11905_v39 = vpack.c.bf16 %v10365_v50, %v10361_v4  ;;  %v11875_v14 = vpack.c.bf16 %v10372_v48, %v10368_v62  ;;  %v10382_v44 = vld [vmem:[%s15719_s8 + $0x378] sm:$0xff]  ;;  %v10381_v16 = vld [vmem:[%s15719_s8 + $0x370] sm:$0xff]  ;;  %v10449_v4 = vld [vmem:[%s15721_s10 + $0x388] sm:$0xff] }
0x115d   :  { %11892 = vmatprep.subr.bf16.mxu0 %v11891_v18  ;;  %v10370_v18 = vld [vmem:[%s15719_s8 + $0x318] sm:$0xff]  ;;  %v11911_v52 = vpack.c.bf16 %v10382_v44, %v10378_v10  ;;  %v10397_v26 = vld [vmem:[%s15719_s8 + $0x3f0] sm:$0xff] }
0x115e   :  { %11894 = vmatpush1.bf16.msra.mxu0 %v11893_v47  ;;  %11870 = vmatpush1.bf16.msra.mxu1 %v11869_v38  ;;  %v11907_v2 = vpack.c.bf16 %v10374_v42, %v10370_v18  ;;  %v10371_v47 = vld [vmem:[%s15719_s8 + $0x320] sm:$0xff] }
0x115f   :  { %11896 = vmatprep.subr.bf16.mxu0 %v11895_v12  ;;  %v11877_v55 = vpack.c.bf16 %v10371_v47, %v10367_v15  ;;  %v10380_v12 = vld [vmem:[%s15719_s8 + $0x368] sm:$0xff]  ;;  %v10383_v38 = vld [vmem:[%s15719_s8 + $0x380] sm:$0xff] }
0x1160   :  { %9314 = vadd.xlane.f32.xlu0 %v15156_v49  ;;  %v11879_v33 = vpack.c.bf16 %v10380_v12, %v10376_v43 }
0x1162   :  { %11898 = vmatpush1.bf16.msra.mxu0 %v11897_v58  ;;  %v10377_v58 = vld [vmem:[%s15719_s8 + $0x350] sm:$0xff] }
0x1163   :  { %11900 = vmatprep.subr.bf16.mxu0 %v11899_v13  ;;  %v10386_v13 = vld [vmem:[%s15719_s8 + $0x398] sm:$0xff]  ;;  %v11913_v36 = vpack.c.bf16 %v10381_v16, %v10377_v58  ;;  %v10433_v58 = vld [vmem:[%s15721_s10 + $0x308] sm:$0xff] }
0x1164   :  { %v10419_v16 = vld [vmem:[%s15721_s10 + $0x298] sm:$0xff] }
0x1166   :  { %11902 = vmatpush1.bf16.msra.mxu0 %v11901_v37  ;;  %v10387_v37 = vld [vmem:[%s15719_s8 + $0x3a0] sm:$0xff] }
0x1167   :  { %11904 = vmatprep.subr.bf16.mxu0 %v11903_v46  ;;  %v10448_v46 = vld [vmem:[%s15721_s10 + $0x380] sm:$0xff] }
0x1168   :  { %v11955_v50 = vpack.c.bf16 %v10449_v4, %v10448_v46  ;;  %v10423_v46 = vld [vmem:[%s15721_s10 + $0x2b8] sm:$0xff] }
0x1169   :  { %v10455_v4 = vld [vmem:[%s15721_s10 + $0x3b8] sm:$0xff] }
0x116a   :  { %11906 = vmatpush1.bf16.msra.mxu0 %v11905_v39 }
0x116b   :  { %11908 = vmatprep.subr.bf16.mxu0 %v11907_v2 }
0x116e   :  { %11910 = vmatpush1.bf16.msra.mxu0 %v11909_v51  ;;  %v15386_v51 = vld [vmem:[%s15723_s12 + $0x1] ss:$0 sm:$0xff] }
0x116f   :  { %11912 = vmatprep.subr.bf16.mxu0 %v11911_v52  ;;  %v10401_v52 = vld [vmem:[%s15721_s10 + $0x208] sm:$0xff] }
0x1172   :  { %11914 = vmatpush1.bf16.msra.mxu0 %v11913_v36  ;;  %v11925_v36 = vpack.c.bf16 %v10401_v52, %v10400_v35  ;;  %v10408_v35 = vld [vmem:[%s15721_s10 + $0x240] sm:$0xff]  ;;  %v10409_v52 = vld [vmem:[%s15721_s10 + $0x248] sm:$0xff] }
0x11e0   :  { %v9311_v54 = vpop.xlane.xlu1 %9310 }
0x11e1   :  { %v9317_v23 = vmul.f32 0.0078125, %v9311_v54  ;;  %v9309_v27 = vpop.xlane.xlu0 %9308  ;;  %v11915_v54 = vpack.c.bf16 %v10390_v25, %v10386_v13  ;;  %v10402_v25 = vld [vmem:[%s15721_s10 + $0x210] sm:$0xff] }
0x11e2   :  { %v9316_v17 = vmul.f32 0.0078125, %v9309_v27  ;;  %v10389_v27 = vld [vmem:[%s15719_s8 + $0x3b0] sm:$0xff] }
0x11e3   :  { %v15232_v34 = vsub.f32 %v15144_v57, %v9317_v23  ;;  %v10385_v23 = vld [vmem:[%s15719_s8 + $0x390] sm:$0xff]  ;;  %11916 = vmatprep.subr.bf16.mxu0 %v11915_v54 }
0x11e4   :  { %v15235_v24 = vsub.f32 %v15147_v40, %v9316_v17  ;;  %v10360_v40 = vld [vmem:[%s15719_s8 + $0x2c8] sm:$0xff]  ;;  %v11885_v17 = vpack.c.bf16 %v10387_v37, %v10383_v38  ;;  %v10403_v38 = vld [vmem:[%s15721_s10 + $0x218] sm:$0xff] }
0x11e5   :  { %v9325_v32 = vmul.f32 %v15232_v34, %v15232_v34  ;;  %v11871_v56 = vpack.c.bf16 %v10364_v53, %v10360_v40  ;;  %v10393_v53 = vld [vmem:[%s15719_s8 + $0x3d0] sm:$0xff] }
0x11e6   :  { %v9324_v30 = vmul.f32 %v15235_v24, %v15235_v24  ;;  %v11921_v8 = vpack.c.bf16 %v10397_v26, %v10393_v53  ;;  %v10405_v53 = vld [vmem:[%s15721_s10 + $0x228] sm:$0xff] }
0x11e7   :  { %9330 = vadd.xlane.f32.xlu0 %v9325_v32  ;;  %11872 = vmatprep.subr.bf16.mxu1 %v11871_v56  ;;  %v10392_v32 = vld [vmem:[%s15719_s8 + $0x3c8] sm:$0xff] }
0x11e8   :  { %9328 = vadd.xlane.f32.xlu1 %v9324_v30  ;;  %v10396_v30 = vld [vmem:[%s15719_s8 + $0x3e8] sm:$0xff] }
0x11e9   :  { %v9313_v5 = vpop.xlane.xlu0 %9312 }
0x11ea   :  { %v9318_v63 = vmul.f32 0.0078125, %v9313_v5  ;;  %v10394_v5 = vld [vmem:[%s15719_s8 + $0x3d8] sm:$0xff] }
0x11ec   :  { %v15242_v7 = vsub.f32 %v15152_v1, %v9318_v63  ;;  %v10359_v1 = vld [vmem:[%s15719_s8 + $0x2c0] sm:$0xff]  ;;  %v11917_v63 = vpack.c.bf16 %v10389_v27, %v10385_v23  ;;  %v10434_v23 = vld [vmem:[%s15721_s10 + $0x310] sm:$0xff]  ;;  %v10435_v27 = vld [vmem:[%s15721_s10 + $0x318] sm:$0xff] }
0x11ed   :  { %v9315_v21 = vpop.xlane.xlu0 %9314 }
0x11ee   :  { %v9319_v22 = vmul.f32 0.0078125, %v9315_v21  ;;  %v9326_v41 = vmul.f32 %v15242_v7, %v15242_v7  ;;  %v11887_v21 = vpack.c.bf16 %v10396_v30, %v10392_v32  ;;  %11918 = vmatpush1.bf16.msra.mxu0 %v11917_v63  ;;  %v10421_v32 = vld [vmem:[%s15721_s10 + $0x2a8] sm:$0xff]  ;;  %v10452_v30 = vld [vmem:[%s15721_s10 + $0x3a0] sm:$0xff] }
0x11f0   :  { %v15247_v31 = vsub.f32 %v15156_v49, %v9319_v22  ;;  %9332 = vadd.xlane.f32.xlu1 %v9326_v41  ;;  %v10363_v49 = vld [vmem:[%s15719_s8 + $0x2e0] sm:$0xff]  ;;  %v10398_v22 = vld [vmem:[%s15719_s8 + $0x3f8] sm:$0xff] }
0x11f1   :  { %v11873_v28 = vpack.c.bf16 %v10363_v49, %v10359_v1  ;;  %v10391_v41 = vld [vmem:[%s15719_s8 + $0x3c0] sm:$0xff]  ;;  %v11919_v40 = vpack.c.bf16 %v10398_v22, %v10394_v5  ;;  %v10417_v49 = vld [vmem:[%s15721_s10 + $0x288] sm:$0xff] }
0x11f2   :  { %v9327_v57 = vmul.f32 %v15247_v31, %v15247_v31  ;;  %v10416_v1 = vld [vmem:[%s15721_s10 + $0x280] sm:$0xff]  ;;  %v10453_v5 = vld [vmem:[%s15721_s10 + $0x3a8] sm:$0xff] }
0x11f3   :  { %11874 = vmatpush1.bf16.msra.mxu1 %v11873_v28  ;;  %11920 = vmatprep.subr.bf16.mxu0 %v11919_v40  ;;  %v11923_v28 = vpack.c.bf16 %v10417_v49, %v10416_v1  ;;  %v10404_v40 = vld [vmem:[%s15721_s10 + $0x220] sm:$0xff]  ;;  %v10422_v1 = vld [vmem:[%s15721_s10 + $0x2b0] sm:$0xff] }
0x11f4   :  { %9334 = vadd.xlane.f32.xlu0 %v9327_v57  ;;  %11876 = vmatprep.subr.bf16.mxu1 %v11875_v14  ;;  %v10395_v57 = vld [vmem:[%s15719_s8 + $0x3e0] sm:$0xff]  ;;  %s12248_s8 = scalar_lea.vmem %s10087_s1, 512 }
0x11f5   :  { %v11889_v56 = vpack.c.bf16 %v10395_v57, %v10391_v41  ;;  %11922 = vmatpush1.bf16.msra.mxu0 %v11921_v8  ;;  %v11961_v57 = vpack.c.bf16 %v10435_v27, %v10434_v23  ;;  %v10436_v8 = vld [vmem:[%s15721_s10 + $0x320] sm:$0xff]  ;;  %v10429_v27 = vld [vmem:[%s15721_s10 + $0x2e8] sm:$0xff]  ;;  %p12249_p0 = scmp.ne.s32.totalorder %s10087_s1, %s12248_s8  ;;  %p12254_p2 = scmp.lt.s32.totalorder %s12248_s8, %s12248_s8 }
0x11f6   :  { %11956 = vmatprep.subr.bf16.mxu0 %v11955_v50  ;;  %v10428_v23 = vld [vmem:[%s15721_s10 + $0x2e0] sm:$0xff] }
0x11f7   :  { %11878 = vmatpush1.bf16.msra.mxu1 %v11877_v55  ;;  %p12255_p3 = por %p12254_p2, %p12253_p1 }
0x11f8   :  { %11880 = vmatprep.subr.bf16.mxu1 %v11879_v33  ;;  %v15391_v33 = vld [vmem:[%s15724_s13 + $0x1] ss:$0 sm:$0xff] }
0x11f9   :  { %p12256_p4 = pnand %p12255_p3, %p12249_p0 }
0x11fb   :  { %11882 = vmatpush1.bf16.msra.mxu1 %v11881_v19  ;;  %v10450_v19 = vld [vmem:[%s15721_s10 + $0x390] sm:$0xff] }
0x11fc   :  { %11884 = vmatprep.subr.bf16.mxu1 %v11883_v45  ;;  %v11957_v45 = vpack.c.bf16 %v10433_v58, %v10432_v3  ;;  %v11959_v54 = vpack.c.bf16 %v10451_v29, %v10450_v19  ;;  %v10459_v19 = vld [vmem:[%s15721_s10 + $0x3d8] sm:$0xff]  ;;  %v11941_v29 = vpack.c.bf16 %v10409_v52, %v10408_v35 }
0x11ff   :  { %11886 = vmatpush1.bf16.msra.mxu1 %v11885_v17  ;;  %v10420_v17 = vld [vmem:[%s15721_s10 + $0x2a0] sm:$0xff] }
0x1200   :  { %11888 = vmatprep.subr.bf16.mxu1 %v11887_v21  ;;  %v11929_v21 = vpack.c.bf16 %v10403_v38, %v10402_v25  ;;  %v11931_v26 = vpack.c.bf16 %v10421_v32, %v10420_v17  ;;  %v10460_v17 = vld [vmem:[%s15721_s10 + $0x3e0] sm:$0xff]  ;;  %v10461_v32 = vld [vmem:[%s15721_s10 + $0x3e8] sm:$0xff] }
0x1203   :  { %11890 = vmatpush1.bf16.msra.mxu1 %v11889_v56  ;;  %v11963_v56 = vpack.c.bf16 %v10453_v5, %v10452_v30 }
0x1204   :  { %11924 = vmatprep.subr.bf16.mxu1 %v11923_v28  ;;  %v10454_v28 = vld [vmem:[%s15721_s10 + $0x3b0] sm:$0xff] }
0x1274   :  { %v9331_v62 = vpop.xlane.xlu0 %9330 }
0x1275   :  { %v9337_v39 = vmul.f32 0.0078125, %v9331_v62  ;;  %v9329_v48 = vpop.xlane.xlu1 %9328  ;;  %v11933_v62 = vpack.c.bf16 %v10405_v53, %v10404_v40  ;;  %v10444_v40 = vld [vmem:[%s15721_s10 + $0x360] sm:$0xff] }
0x1276   :  { %v9336_v18 = vmul.f32 0.0078125, %v9329_v48 }
0x1277   :  { %v9341_v42 = vadd.f32 1e-05, %v9337_v39 }
0x1278   :  { %v9340_v14 = vadd.f32 1e-05, %v9336_v18 }
0x1279   :  { %12232 = vrsqrt.f32 %v9341_v42  ;;  %v10406_v42 = vld [vmem:[%s15721_s10 + $0x230] sm:$0xff] }
0x127a   :  { %12234 = vrsqrt.f32 %v9340_v14  ;;  %v10407_v14 = vld [vmem:[%s15721_s10 + $0x238] sm:$0xff] }
0x127d   :  { %v9333_v2 = vpop.xlane.xlu1 %9332 }
0x127e   :  { %v9338_v15 = vmul.f32 0.0078125, %v9333_v2  ;;  %v11935_v2 = vpack.c.bf16 %v10423_v46, %v10422_v1  ;;  %v10463_v46 = vld [vmem:[%s15721_s10 + $0x3f8] sm:$0xff] }
0x1280   :  { %v9342_v47 = vadd.f32 1e-05, %v9338_v15  ;;  %v11967_v15 = vpack.c.bf16 %v10455_v4, %v10454_v28  ;;  %v10414_v4 = vld [vmem:[%s15721_s10 + $0x270] sm:$0xff] }
0x1281   :  { %v9335_v20 = vpop.xlane.xlu0 %9334 }
0x1282   :  { %12236 = vrsqrt.f32 %v9342_v47  ;;  %v9339_v55 = vmul.f32 0.0078125, %v9335_v20  ;;  %v10438_v47 = vld [vmem:[%s15721_s10 + $0x330] sm:$0xff]  ;;  %v10424_v20 = vld [vmem:[%s15721_s10 + $0x2c0] sm:$0xff] }
0x1283   :  { %v12233_v61 = vpop.eup %12232 }
0x1284   :  { %v12235_v43 = vpop.eup %12234  ;;  %v9343_v12 = vadd.f32 1e-05, %v9339_v55  ;;  %v9349_v44 = vmul.f32 %v12233_v61, %v15232_v34  ;;  %v10418_v34 = vld [vmem:[%s15721_s10 + $0x290] sm:$0xff]  ;;  %v10425_v61 = vld [vmem:[%s15721_s10 + $0x2c8] sm:$0xff] }
0x1285   :  { %v9348_v10 = vmul.f32 %v12235_v43, %v15235_v24  ;;  %v11927_v37 = vpack.c.bf16 %v10419_v16, %v10418_v34  ;;  %v10456_v43 = vld [vmem:[%s15721_s10 + $0x3c0] sm:$0xff]  ;;  %v11939_v3 = vpack.c.bf16 %v10425_v61, %v10424_v20  ;;  %v10426_v34 = vld [vmem:[%s15721_s10 + $0x2d0] sm:$0xff] }
0x1286   :  { %12238 = vrsqrt.f32 %v9343_v12  ;;  %v9359_v13 = vmul.f32 %v15386_v51, %v9349_v44  ;;  %v10457_v12 = vld [vmem:[%s15721_s10 + $0x3c8] sm:$0xff]  ;;  %v10458_v16 = vld [vmem:[%s15721_s10 + $0x3d0] sm:$0xff] }
0x1287   :  { %v9358_v24 = vmul.f32 %v15386_v51, %v9348_v10  ;;  %v11971_v58 = vpack.c.bf16 %v10457_v12, %v10456_v43  ;;  %v11975_v38 = vpack.c.bf16 %v10459_v19, %v10458_v16 }
0x1288   :  { %v15453_v22 = vadd.f32 %v15391_v33, %v9359_v13 }
0x1289   :  { %v15421_v11 = vadd.f32 %v15391_v33, %v9358_v24  ;;  %v10427_v24 = vld [vmem:[%s15721_s10 + $0x2d8] sm:$0xff] }
0x128a   :  { %v11943_v25 = vpack.c.bf16 %v10427_v24, %v10426_v34 }
0x128b   :  { %9525 = vmatmul.mubr.f32.vlgmr.msra.gmra.mrb[74].mxu1 %v15421_v11  ;;  %9614 = vmatmul.mubr.f32.vlgmr.msra.gmra.mrb[58].mxu0 %v15421_v11 }
0x128c   :  { %v12237_v63 = vpop.eup %12236  ;;  %9530 = vmatprep.mubr.f32.mxu1 %v15744_v6  ;;  %9619 = vmatprep.mubr.f32.mxu0 %v15744_v6 }
0x128d   :  { %v9350_v41 = vmul.f32 %v12237_v63, %v15242_v7  ;;  %11926 = vmatpush3.bf16.msra.mxu1 %v11925_v36  ;;  %11958 = vmatpush3.bf16.msra.mxu0 %v11957_v45  ;;  %v10437_v7 = vld [vmem:[%s15721_s10 + $0x328] sm:$0xff]  ;;  %v10410_v36 = vld [vmem:[%s15721_s10 + $0x250] sm:$0xff]  ;;  %v10411_v45 = vld [vmem:[%s15721_s10 + $0x258] sm:$0xff]  ;;  %v11947_v63 = vpack.c.bf16 %v10429_v27, %v10428_v23 }
0x128e   :  { %11928 = vmatprep.subr.bf16.mxu1 %v11927_v37  ;;  %11960 = vmatprep.subr.bf16.mxu0 %v11959_v54  ;;  %v11965_v18 = vpack.c.bf16 %v10437_v7, %v10436_v8  ;;  %v10442_v37 = vld [vmem:[%s15721_s10 + $0x350] sm:$0xff]  ;;  %v10443_v54 = vld [vmem:[%s15721_s10 + $0x358] sm:$0xff]  ;;  %v11945_v30 = vpack.c.bf16 %v10411_v45, %v10410_v36 }
0x128f   :  { %9531 = vmatmul.mubr.f32.gmra.mrb[76].mxu1 %v15453_v22  ;;  %9620 = vmatmul.mubr.f32.gmra.mrb[60].mxu0 %v15453_v22  ;;  %v9360_v49 = vmul.f32 %v15386_v51, %v9350_v41  ;;  %v11977_v5 = vpack.c.bf16 %v10443_v54, %v10442_v37  ;;  %v10412_v41 = vld [vmem:[%s15721_s10 + $0x260] sm:$0xff]  ;;  %v10431_v8 = vld [vmem:[%s15721_s10 + $0x2f8] sm:$0xff] }
0x1290   :  { %v12239_v50 = vpop.eup %12238  ;;  %9536 = vmatprep.mubr.f32.mxu1 %v15744_v6  ;;  %9625 = vmatprep.mubr.f32.mxu0 %v15744_v6 }
0x1291   :  { %v15486_v39 = vadd.f32 %v15391_v33, %v9360_v49  ;;  %v9351_v48 = vmul.f32 %v12239_v50, %v15247_v31  ;;  %11930 = vmatpush3.bf16.msra.mxu1 %v11929_v21  ;;  %11962 = vmatpush3.bf16.msra.mxu0 %v11961_v57  ;;  %v10439_v31 = vld [vmem:[%s15721_s10 + $0x338] sm:$0xff]  ;;  %v11979_v21 = vpack.c.bf16 %v10461_v32, %v10460_v17  ;;  %v10413_v57 = vld [vmem:[%s15721_s10 + $0x268] sm:$0xff]  ;;  %v10462_v49 = vld [vmem:[%s15721_s10 + $0x3f0] sm:$0xff] }
0x1292   :  { %11932 = vmatprep.subr.bf16.mxu1 %v11931_v26  ;;  %11964 = vmatprep.subr.bf16.mxu0 %v11963_v56  ;;  %v11969_v44 = vpack.c.bf16 %v10439_v31, %v10438_v47  ;;  %v11949_v53 = vpack.c.bf16 %v10413_v57, %v10412_v41  ;;  %v10445_v26 = vld [vmem:[%s15721_s10 + $0x368] sm:$0xff]  ;;  %v10430_v56 = vld [vmem:[%s15721_s10 + $0x2f0] sm:$0xff]  ;;  %v11983_v28 = vpack.c.bf16 %v10463_v46, %v10462_v49  ;;  %v10415_v50 = vld [vmem:[%s15721_s10 + $0x278] sm:$0xff]  ;;  %v15745_v31 = vsub.s32 3, %v12615_v59 }
0x1293   :  { %9537 = vmatmul.mubr.f32.gmra.mrb[78].mxu1 %v15486_v39  ;;  %9626 = vmatmul.mubr.f32.gmra.mrb[62].mxu0 %v15486_v39  ;;  %v9361_v55 = vmul.f32 %v15386_v51, %v9351_v48  ;;  %v11937_v51 = vpack.c.bf16 %v10407_v14, %v10406_v42  ;;  %v11981_v7 = vpack.c.bf16 %v10445_v26, %v10444_v40  ;;  %v10399_v14 = vld [vmem:[%s15720_s9 + $0x4] sm:$0xf] }
0x1294   :  { %9542 = vmatprep.mubr.f32.mxu1 %v15744_v6  ;;  %9631 = vmatprep.mubr.f32.mxu0 %v15744_v6  ;;  %v10440_v6 = vld [vmem:[%s15721_s10 + $0x340] sm:$0xff]  ;;  %v11951_v1 = vpack.c.bf16 %v10431_v8, %v10430_v56  ;;  %v11953_v48 = vpack.c.bf16 %v10415_v50, %v10414_v4  ;;  %v9447_v47 = vrot.slane %v10399_v14, %v12618_v60 }
0x1295   :  { %v15519_v10 = vadd.f32 %v15391_v33, %v9361_v55  ;;  %11934 = vmatpush3.bf16.msra.mxu1 %v11933_v62  ;;  %11966 = vmatpush3.bf16.msra.mxu0 %v11965_v18  ;;  %v10441_v33 = vld [vmem:[%s15721_s10 + $0x348] sm:$0xff]  ;;  %v10446_v62 = vld [vmem:[%s15721_s10 + $0x370] sm:$0xff]  ;;  %v10447_v18 = vld [vmem:[%s15721_s10 + $0x378] sm:$0xff]  ;;  %v9455_v20 = vrot.slane %v10399_v14, %v15745_v31 }
0x1296   :  { %11936 = vmatprep.subr.bf16.mxu1 %v11935_v2  ;;  %11968 = vmatprep.subr.bf16.mxu0 %v11967_v15  ;;  %v11973_v13 = vpack.c.bf16 %v10441_v33, %v10440_v6  ;;  %v11985_v42 = vpack.c.bf16 %v10447_v18, %v10446_v62  ;;  %v9443_v2 = vrot.slane %v10399_v14, %v12635_v9  ;;  %v10465_v62 = vld [vmem:[%s15722_s11 + $0x1] ss:$0 sm:$0xff] }
0x1297   :  { %9543 = vmatmul.mubr.f32.gmra.mrb[80].mxu1 %v15519_v10  ;;  %9632 = vmatmul.mubr.f32.gmra.mrb[64].mxu0 %v15519_v10  ;;  %v9451_v15 = vrot.slane %v10399_v14, %v12625_v0 }
0x1299   :  { %11938 = vmatpush3.bf16.msra.mxu1 %v11937_v51  ;;  %11970 = vmatpush3.bf16.msra.mxu0 %v11969_v44 }
0x129a   :  { %11940 = vmatprep.subr.bf16.mxu1 %v11939_v3  ;;  %11972 = vmatprep.subr.bf16.mxu0 %v11971_v58 }
0x129d   :  { %11942 = vmatpush3.bf16.msra.mxu1 %v11941_v29  ;;  %11974 = vmatpush3.bf16.msra.mxu0 %v11973_v13 }
0x129e   :  { %11944 = vmatprep.subr.bf16.mxu1 %v11943_v25  ;;  %11976 = vmatprep.subr.bf16.mxu0 %v11975_v38 }
0x12a1   :  { %11946 = vmatpush3.bf16.msra.mxu1 %v11945_v30  ;;  %11978 = vmatpush3.bf16.msra.mxu0 %v11977_v5 }
0x12a2   :  { %11948 = vmatprep.subr.bf16.mxu1 %v11947_v63  ;;  %11980 = vmatprep.subr.bf16.mxu0 %v11979_v21 }
0x12a5   :  { %11950 = vmatpush3.bf16.msra.mxu1 %v11949_v53  ;;  %11982 = vmatpush3.bf16.msra.mxu0 %v11981_v7 }
0x12a6   :  { %11952 = vmatprep.subr.bf16.mxu1 %v11951_v1  ;;  %11984 = vmatprep.subr.bf16.mxu0 %v11983_v28 }
0x12a9   :  { %11954 = vmatpush3.bf16.msra.mxu1 %v11953_v48  ;;  %11986 = vmatpush3.bf16.msra.mxu0 %v11985_v42 }
0x135e   :  { %v9526_v55 = vpop.f32.mrb[74].mxu1  ;;  %v9615_v61 = vpop.f32.mrb[58].mxu0 }
0x135f   :  { %v9527_v43 = vadd.f32 %v9526_v55, %v9443_v2  ;;  %v9616_v12 = vadd.f32 %v9615_v61, %v9451_v15  ;;  %v9528_v51 = vpop.f32.mrb[75].mxu1  ;;  %v9617_v44 = vpop.f32.mrb[59].mxu0 }
0x1360   :  { %v9529_v35 = vadd.f32 %v9528_v51, %v9447_v47  ;;  %v9618_v52 = vadd.f32 %v9617_v44, %v9455_v20 }
0x1361   :  { %v9638_v9 = vmax.f32 %v9527_v43, 0.0  ;;  %v9640_v34 = vmax.f32 %v9616_v12, 0.0 }
0x1362   :  { %v9639_v3 = vmax.f32 %v9529_v35, 0.0  ;;  %v9641_v58 = vmax.f32 %v9618_v52, 0.0  ;;  %v9532_v6 = vpop.f32.mrb[76].mxu1  ;;  %v9621_v33 = vpop.f32.mrb[60].mxu0 }
0x1363   :  { %v9533_v0 = vadd.f32 %v9532_v6, %v9443_v2  ;;  %v9622_v24 = vadd.f32 %v9621_v33, %v9451_v15  ;;  %v9534_v60 = vpop.f32.mrb[77].mxu1  ;;  %v9623_v16 = vpop.f32.mrb[61].mxu0 }
0x1364   :  { %v9535_v59 = vadd.f32 %v9534_v60, %v9447_v47  ;;  %v9624_v19 = vadd.f32 %v9623_v16, %v9455_v20  ;;  %9791 = vmatprep.mubr.f32.mxu1 %v9639_v3  ;;  %9876 = vmatprep.mubr.f32.mxu0 %v9641_v58 }
0x1365   :  { %9792 = vmatmul.mubr.f32.vlgmr.msra.gmra.mrb[82].mxu1 %v9638_v9  ;;  %9877 = vmatmul.mubr.f32.vlgmr.msra.gmra.mrb[66].mxu0 %v9640_v34  ;;  %v9642_v25 = vmax.f32 %v9533_v0, 0.0  ;;  %v9644_v38 = vmax.f32 %v9622_v24, 0.0 }
0x1366   :  { %v9643_v29 = vmax.f32 %v9535_v59, 0.0  ;;  %v9645_v13 = vmax.f32 %v9624_v19, 0.0  ;;  %v9538_v36 = vpop.f32.mrb[78].mxu1  ;;  %v9627_v45 = vpop.f32.mrb[62].mxu0 }
0x1367   :  { %v9539_v37 = vadd.f32 %v9538_v36, %v9443_v2  ;;  %v9628_v54 = vadd.f32 %v9627_v45, %v9451_v15  ;;  %v9540_v23 = vpop.f32.mrb[79].mxu1  ;;  %v9629_v27 = vpop.f32.mrb[63].mxu0 }
0x1368   :  { %9796 = vmatprep.mubr.f32.mxu1 %v9643_v29  ;;  %9881 = vmatprep.mubr.f32.mxu0 %v9645_v13  ;;  %v9541_v17 = vadd.f32 %v9540_v23, %v9447_v47  ;;  %v9630_v32 = vadd.f32 %v9629_v27, %v9455_v20 }
0x1369   :  { %9797 = vmatmul.mubr.f32.gmra.mrb[84].mxu1 %v9642_v25  ;;  %9882 = vmatmul.mubr.f32.gmra.mrb[68].mxu0 %v9644_v38  ;;  %v9646_v41 = vmax.f32 %v9539_v37, 0.0  ;;  %v9648_v57 = vmax.f32 %v9628_v54, 0.0  ;;  %v9970_v25 = vld [vmem:[%s15727_s16 + $0x8] sm:$0xff]  ;;  %v9971_v38 = vld [vmem:[%s15727_s16 + $0x10] sm:$0xff] }
0x136a   :  { %v9647_v30 = vmax.f32 %v9541_v17, 0.0  ;;  %v9649_v5 = vmax.f32 %v9630_v32, 0.0  ;;  %v9544_v63 = vpop.f32.mrb[80].mxu1  ;;  %v9633_v21 = vpop.f32.mrb[64].mxu0 }
0x136b   :  { %v9545_v40 = vadd.f32 %v9544_v63, %v9443_v2  ;;  %v9634_v53 = vadd.f32 %v9633_v21, %v9451_v15  ;;  %v9546_v26 = vpop.f32.mrb[81].mxu1  ;;  %v9635_v56 = vpop.f32.mrb[65].mxu0 }
0x136c   :  { %v9547_v8 = vadd.f32 %v9546_v26, %v9447_v47  ;;  %v9636_v7 = vadd.f32 %v9635_v56, %v9455_v20  ;;  %9801 = vmatprep.mubr.f32.mxu1 %v9647_v30  ;;  %9886 = vmatprep.mubr.f32.mxu0 %v9649_v5 }
0x136d   :  { %9802 = vmatmul.mubr.f32.gmra.mrb[86].mxu1 %v9646_v41  ;;  %9887 = vmatmul.mubr.f32.gmra.mrb[70].mxu0 %v9648_v57  ;;  %v9650_v46 = vmax.f32 %v9545_v40, 0.0  ;;  %v9652_v28 = vmax.f32 %v9634_v53, 0.0 }
0x136e   :  { %v9651_v1 = vmax.f32 %v9547_v8, 0.0  ;;  %v9653_v49 = vmax.f32 %v9636_v7, 0.0  ;;  %v9973_v7 = vld [vmem:[%s15727_s16 + $0x20] sm:$0xff] }
0x1370   :  { %9806 = vmatprep.mubr.f32.mxu1 %v9651_v1  ;;  %9891 = vmatprep.mubr.f32.mxu0 %v9653_v49  ;;  %v9974_v1 = vld [vmem:[%s15727_s16 + $0x28] sm:$0xff] }
0x1371   :  { %9807 = vmatmul.mubr.f32.gmra.mrb[88].mxu1 %v9650_v46  ;;  %9892 = vmatmul.mubr.f32.gmra.mrb[72].mxu0 %v9652_v28  ;;  %v11995_v49 = vpack.c.bf16 %v9974_v1, %v9973_v7  ;;  %v9975_v46 = vld [vmem:[%s15727_s16 + $0x30] sm:$0xff]  ;;  %v9976_v28 = vld [vmem:[%s15727_s16 + $0x38] sm:$0xff] }
0x1438   :  { %v10819_v4 = vpop.f32.mrb[82].mxu1  ;;  %v10863_v50 = vpop.f32.mrb[66].mxu0 }
0x1439   :  { %v10820_v48 = vpop.f32.mrb[83].mxu1  ;;  %v10864_v18 = vpop.f32.mrb[67].mxu0 }
0x143a   :  { %v10821_v42 = vadd.f32 %v10820_v48, %v10819_v4  ;;  %v10865_v14 = vadd.f32 %v10864_v18, %v10863_v50  ;;  %v11999_v4 = vpack.c.bf16 %v9976_v28, %v9975_v46  ;;  %v9977_v50 = vld [vmem:[%s15727_s16 + $0x40] sm:$0xff]  ;;  %v9979_v18 = vld [vmem:[%s15727_s16 + $0x50] sm:$0xff] }
0x143c   :  { %v9794_v2 = vadd.f32 %v10821_v42, %v10465_v62  ;;  %v10822_v15 = vpop.f32.mrb[84].mxu1  ;;  %v10866_v47 = vpop.f32.mrb[68].mxu0  ;;  %v9980_v42 = vld [vmem:[%s15727_s16 + $0x58] sm:$0xff] }
0x143d   :  { %v10823_v31 = vpop.f32.mrb[85].mxu1  ;;  %v10867_v20 = vpop.f32.mrb[69].mxu0 }
0x143e   :  { %v9879_v55 = vadd.f32 %v10865_v14, %v9794_v2  ;;  %v10824_v61 = vadd.f32 %v10823_v31, %v10822_v15  ;;  %v10868_v43 = vadd.f32 %v10867_v20, %v10866_v47  ;;  %v12007_v14 = vpack.c.bf16 %v9980_v42, %v9979_v18  ;;  %v9981_v2 = vld [vmem:[%s15727_s16 + $0x60] sm:$0xff]  ;;  %v9982_v15 = vld [vmem:[%s15727_s16 + $0x68] sm:$0xff]  ;;  %v9983_v47 = vld [vmem:[%s15727_s16 + $0x70] sm:$0xff] }
0x143f   :  { %v12011_v31 = vpack.c.bf16 %v9982_v15, %v9981_v2  ;;  %v9984_v20 = vld [vmem:[%s15727_s16 + $0x78] sm:$0xff] }
0x1440   :  { %v9799_v12 = vadd.f32 %v10824_v61, %v10465_v62  ;;  %v9897_v51 = vadd.f32 %v9879_v55, %v15421_v11  ;;  %v10825_v44 = vpop.f32.mrb[86].mxu1  ;;  %v10869_v35 = vpop.f32.mrb[70].mxu0  ;;  %v12015_v55 = vpack.c.bf16 %v9984_v20, %v9983_v47 }
0x1441   :  { %v10826_v52 = vpop.f32.mrb[87].mxu1  ;;  %v10870_v3 = vpop.f32.mrb[71].mxu0 }
0x1442   :  { %v9884_v58 = vadd.f32 %v10868_v43, %v9799_v12  ;;  %9905 = vadd.xlane.f32.xlu1 %v9897_v51  ;;  %v10827_v6 = vadd.f32 %v10826_v52, %v10825_v44  ;;  %v10871_v33 = vadd.f32 %v10870_v3, %v10869_v35 }
0x1444   :  { %v9804_v9 = vadd.f32 %v10827_v6, %v10465_v62  ;;  %v9898_v34 = vadd.f32 %v9884_v58, %v15453_v22  ;;  %v10828_v0 = vpop.f32.mrb[88].mxu1  ;;  %v10872_v24 = vpop.f32.mrb[72].mxu0  ;;  %v9969_v22 = vld [vmem:[%s15727_s16] sm:$0xff] }
0x1445   :  { %v10829_v60 = vpop.f32.mrb[89].mxu1  ;;  %v10873_v16 = vpop.f32.mrb[73].mxu0  ;;  %v11987_v37 = vpack.c.bf16 %v9970_v25, %v9969_v22 }
0x1446   :  { %v9889_v59 = vadd.f32 %v10871_v33, %v9804_v9  ;;  %9907 = vadd.xlane.f32.xlu0 %v9898_v34  ;;  %v10830_v19 = vadd.f32 %v10829_v60, %v10828_v0  ;;  %v10874_v29 = vadd.f32 %v10873_v16, %v10872_v24  ;;  %v10468_v0 = vld [vmem:[%s15725_s14 + $0x1] ss:$0 sm:$0xff] }
0x1447   :  { %11988 = vmatprep.subr.bf16.mxu1 %v11987_v37  ;;  %v10469_v60 = vld [vmem:[%s15726_s15 + $0x1] ss:$0 sm:$0xff] }
0x1448   :  { %v9809_v11 = vadd.f32 %v10830_v19, %v10465_v62  ;;  %v9899_v13 = vadd.f32 %v9889_v59, %v15486_v39  ;;  %v9972_v39 = vld [vmem:[%s15727_s16 + $0x18] sm:$0xff]  ;;  %11990 = vmatpush3.bf16.msra.mxu1 %v11987_v37  ;;  %v9978_v62 = vld [vmem:[%s15727_s16 + $0x48] sm:$0xff] }
0x1449   :  { %v11991_v54 = vpack.c.bf16 %v9972_v39, %v9971_v38  ;;  %v12003_v48 = vpack.c.bf16 %v9978_v62, %v9977_v50 }
0x144a   :  { %v9894_v36 = vadd.f32 %v10874_v29, %v9809_v11  ;;  %9909 = vadd.xlane.f32.xlu1 %v9899_v13 }
0x144b   :  { %11992 = vmatprep.subr.bf16.mxu1 %v11991_v54 }
0x144c   :  { %v9900_v45 = vadd.f32 %v9894_v36, %v15519_v10  ;;  %11994 = vmatpush3.bf16.msra.mxu1 %v11991_v54 }
0x144d   :  { %11996 = vmatprep.subr.bf16.mxu1 %v11995_v49 }
0x144e   :  { %9911 = vadd.xlane.f32.xlu0 %v9900_v45 }
0x1450   :  { %11998 = vmatpush3.bf16.msra.mxu1 %v11995_v49 }
0x1451   :  { %12000 = vmatprep.subr.bf16.mxu1 %v11999_v4 }
0x1454   :  { %12002 = vmatpush3.bf16.msra.mxu1 %v11999_v4 }
0x1455   :  { %12004 = vmatprep.subr.bf16.mxu1 %v12003_v48 }
0x1458   :  { %12006 = vmatpush3.bf16.msra.mxu1 %v12003_v48 }
0x1459   :  { %12008 = vmatprep.subr.bf16.mxu1 %v12007_v14 }
0x145c   :  { %12010 = vmatpush3.bf16.msra.mxu1 %v12007_v14 }
0x145d   :  { %12012 = vmatprep.subr.bf16.mxu1 %v12011_v31 }
0x1460   :  { %12014 = vmatpush3.bf16.msra.mxu1 %v12011_v31 }
0x1461   :  { %12016 = vmatprep.subr.bf16.mxu1 %v12015_v55 }
0x1464   :  { %12018 = vmatpush3.bf16.msra.mxu1 %v12015_v55 }
0x14cf   :  { %v9906_v10 = vpop.xlane.xlu1 %9905 }
0x14d0   :  { %v9913_v23 = vmul.f32 0.0078125, %v9906_v10  ;;  %v10470_v10 = vld [vmem:[%s15728_s17] ss:$0 sm:$0xff] }
0x14d2   :  { %v15634_v27 = vsub.f32 %v9897_v51, %v9913_v23 }
0x14d3   :  { %v9908_v17 = vpop.xlane.xlu0 %9907 }
0x14d4   :  { %v9914_v32 = vmul.f32 0.0078125, %v9908_v17  ;;  %v9921_v30 = vmul.f32 %v15634_v27, %v15634_v27 }
0x14d6   :  { %v15638_v5 = vsub.f32 %v9898_v34, %v9914_v32  ;;  %9925 = vadd.xlane.f32.xlu1 %v9921_v30 }
0x14d7   :  { %v9910_v63 = vpop.xlane.xlu1 %9909 }
0x14d8   :  { %v9915_v21 = vmul.f32 0.0078125, %v9910_v63  ;;  %v9922_v41 = vmul.f32 %v15638_v5, %v15638_v5 }
0x14da   :  { %v15642_v57 = vsub.f32 %v9899_v13, %v9915_v21  ;;  %9927 = vadd.xlane.f32.xlu0 %v9922_v41 }
0x14db   :  { %v9912_v40 = vpop.xlane.xlu0 %9911 }
0x14dc   :  { %v9916_v53 = vmul.f32 0.0078125, %v9912_v40  ;;  %v9923_v26 = vmul.f32 %v15642_v57, %v15642_v57 }
0x14de   :  { %v15646_v56 = vsub.f32 %v9900_v45, %v9916_v53  ;;  %9929 = vadd.xlane.f32.xlu1 %v9923_v26 }
0x14e0   :  { %v9924_v8 = vmul.f32 %v15646_v56, %v15646_v56 }
0x14e2   :  { %9931 = vadd.xlane.f32.xlu0 %v9924_v8 }
0x1563   :  { %v9926_v61 = vpop.xlane.xlu1 %9925 }
0x1564   :  { %v9933_v43 = vmul.f32 0.0078125, %v9926_v61 }
0x1566   :  { %v9937_v12 = vadd.f32 1e-05, %v9933_v43 }
0x1567   :  { %v9928_v51 = vpop.xlane.xlu0 %9927 }
0x1568   :  { %12240 = vrsqrt.f32 %v9937_v12  ;;  %v9934_v44 = vmul.f32 0.0078125, %v9928_v51 }
0x156a   :  { %v9938_v35 = vadd.f32 1e-05, %v9934_v44 }
0x156b   :  { %v9930_v52 = vpop.xlane.xlu1 %9929 }
0x156c   :  { %12242 = vrsqrt.f32 %v9938_v35  ;;  %v9935_v3 = vmul.f32 0.0078125, %v9930_v52 }
0x156e   :  { %v9939_v58 = vadd.f32 1e-05, %v9935_v3 }
0x156f   :  { %v9932_v6 = vpop.xlane.xlu0 %9931 }
0x1570   :  { %12244 = vrsqrt.f32 %v9939_v58  ;;  %v9936_v33 = vmul.f32 0.0078125, %v9932_v6 }
0x1572   :  { %v12241_v9 = vpop.eup %12240  ;;  %v9940_v34 = vadd.f32 1e-05, %v9936_v33 }
0x1573   :  { %v9945_v24 = vmul.f32 %v12241_v9, %v15634_v27 }
0x1574   :  { %12246 = vrsqrt.f32 %v9940_v34 }
0x1575   :  { %v9955_v16 = vmul.f32 %v10468_v0, %v9945_v24 }
0x1576   :  { %v12243_v59 = vpop.eup %12242 }
0x1577   :  { %v9946_v19 = vmul.f32 %v12243_v59, %v15638_v5  ;;  %v9965_v29 = vadd.f32 %v10469_v60, %v9955_v16 }
0x1579   :  { %11341 = vmatprep.mubr.f32.mxu1 %v9965_v29  ;;  %v9956_v11 = vmul.f32 %v10468_v0, %v9946_v19 }
0x157a   :  { %v12245_v13 = vpop.eup %12244 }
0x157b   :  { %v9966_v36 = vadd.f32 %v10469_v60, %v9956_v11  ;;  %v9947_v45 = vmul.f32 %v12245_v13, %v15642_v57 }
0x157d   :  { %11342 = vmatmul.mubr.f32.vlgmr.msra.gmra.mrb[90].mxu1 %v9966_v36  ;;  %v9957_v22 = vmul.f32 %v10468_v0, %v9947_v45 }
0x157e   :  { %v12247_v25 = vpop.eup %12246 }
0x157f   :  { %v9967_v38 = vadd.f32 %v10469_v60, %v9957_v22  ;;  %v9948_v37 = vmul.f32 %v12247_v25, %v15646_v56 }
0x1581   :  { %11344 = vmatprep.mubr.f32.mxu1 %v9967_v38  ;;  %v9958_v39 = vmul.f32 %v10468_v0, %v9948_v37 }
0x1583   :  { %v9968_v54 = vadd.f32 %v10469_v60, %v9958_v39 }
0x1585   :  { %11345 = vmatmul.mubr.f32.gmra.mrb[92].mxu1 %v9968_v54 }
0x1650   :  { %v11343_v23 = vpop.f32.mrb[90].mxu1 }
0x1651   :  { %v10064_v27 = vadd.f32 %v11343_v23, %v10470_v10  ;;  %v10058_v17 = vpop.f32.mrb[91].mxu1 }
0x1652   :  { %v10059_v32 = vadd.f32 %v10470_v10, %v10058_v17 }
0x1653   :  { %10078 = vst [vmem:[#allocation2 + $0x8] sm:$0xff] %v10064_v27 }
0x1654   :  { %10077 = vst [vmem:[#allocation2] sm:$0xff] %v10059_v32 }
0x1658   :  { %v11346_v30 = vpop.f32.mrb[92].mxu1 }
0x1659   :  { %v10074_v5 = vadd.f32 %v11346_v30, %v10470_v10  ;;  %v10068_v63 = vpop.f32.mrb[93].mxu1 }
0x165a   :  { %v10069_v21 = vadd.f32 %v10470_v10, %v10068_v63 }
0x165b   :  { %10080 = vst [vmem:[#allocation2 + $0x18] sm:$0xff] %v10074_v5 }
0x165c   :  { %10079 = vst [vmem:[#allocation2 + $0x10] sm:$0xff] %v10069_v21 }
0x165d   :  { %12259 = shalt.err (!%p12256_p4)
}
0x165e   :  { %s12260_s29 = scalar_lea.hbm %s15729_s18, 512 }
0x165f   :  { %p12261_p5 = scmp.ne.s32.totalorder %s15729_s18, %s12260_s29  ;;  %p12264_p6 = scmp.lt.u32.totalorder %s12260_s29, %s15729_s18 }
0x1661   :  { %p12266_p7 = pnand %p12264_p6, %p12261_p5 }
0x1663   :  { %12269 = shalt.err (!%p12266_p7)
}
0x1664   :  { %s12279_s7 = smov 128   ;;  %s12280_s24 = smov 8  }
0x1665   :  { %10092 = dma.vmem_to_hbm [thread:$0]  %s10087_s1, 512, %s15729_s18, [#allocation3], %s12279_s7, %s12279_s7, %s12280_s24  }
0x1666   :  { %12270 = dma.done.wait [#allocation3], 512  }
0x1667   :  { %12271 = vsyncadd [#allocation3], 4294966784 }
0x1668   :  { %10096 = vsyncpa [#allocation3], 1 }

</bundles_post_ra>
